<compile_context>
chip_gen: v5e
topology: v5e:2x2
jax: 0.10.0
libtpu: 0.0.40
codegen_flags: <defaults>
</compile_context>

<pallas_src>
import functools

import jax
import jax.numpy as jnp
import numpy as np
from jax import lax
from jax.experimental import pallas as pl
from jax.experimental.pallas import tpu as pltpu

# dboxes.scale_xy = 0.1, dboxes.scale_wh = 0.2 (standard SSD300 defaults)
SCALE_XY = 10.0   # = 1 / 0.1
SCALE_WH = 5.0    # = 1 / 0.2


def _smooth_l1(d):
    ad = jnp.abs(d)
    return jnp.where(ad < 1.0, 0.5 * d * d, ad - 0.5)


def ssd_loss_kernel(ploc_ref, plabel_ref, gloc_ref, glabel_ref, dboxes_ref, out_ref,
                    *, a_valid, idx_bits, use_bf16_ce):
    # Block shapes (B samples per grid step):
    #   ploc_ref   (B, 4, A)   plabel_ref (B, C, A)   gloc_ref (B, 4, A)
    #   glabel_ref (B, 1, A)   dboxes_ref (1, 4, A)   out_ref  (B, 1, 1)
    ploc = ploc_ref[...].astype(jnp.float32)
    plabel = plabel_ref[...].astype(jnp.float32)
    gloc = gloc_ref[...].astype(jnp.float32)
    glabel = glabel_ref[...]                                  # (B, 1, A) int32
    dbox = dboxes_ref[...].astype(jnp.float32)                # (1, 4, A)

    B, C, A = plabel.shape

    lane = lax.broadcasted_iota(jnp.int32, (B, 1, A), 2)      # anchor index
    valid = lane < a_valid                                    # real (un-padded) anchors

    maskb = glabel > 0                                        # positive anchors
    maskf = maskb.astype(jnp.float32)
    pos_i = jnp.sum(maskb.astype(jnp.int32), axis=2, keepdims=True)   # (B, 1, 1)
    pos_f = pos_i.astype(jnp.float32)

    # ---- _location_vec + SmoothL1 location loss ------------------------------
    d_xy = dbox[:, 0:2, :]
    inv_dwh = 1.0 / dbox[:, 2:4, :]                           # hoisted, shared below
    gxy = SCALE_XY * (gloc[:, 0:2, :] - d_xy) * inv_dwh       # (B, 2, A)
    # Background anchors may carry degenerate gt w/h; mask the ratio to 1 so the
    # log stays finite (these lanes are zeroed by maskf below anyway).
    ratio = jnp.where(maskb, gloc[:, 2:4, :] * inv_dwh, 1.0)
    gwh = SCALE_WH * jnp.log(ratio)
    sl1 = (jnp.sum(_smooth_l1(ploc[:, 0:2, :] - gxy), axis=1, keepdims=True)
           + jnp.sum(_smooth_l1(ploc[:, 2:4, :] - gwh), axis=1, keepdims=True))  # (B,1,A)
    loc_loss = jnp.sum(maskf * sl1, axis=2, keepdims=True)    # (B, 1, 1)

    # ---- per-anchor cross entropy over the class axis ------------------------
    m = jnp.max(plabel, axis=1, keepdims=True)                # (B, 1, A)
    z = plabel - m
    if use_bf16_ce:
        e = jnp.exp(z.astype(jnp.bfloat16)).astype(jnp.float32)
    else:
        e = jnp.exp(z)
    lse = jnp.log(jnp.sum(e, axis=1, keepdims=True)) + m      # (B, 1, A)
    cls_iota = lax.broadcasted_iota(jnp.int32, (B, C, A), 1)
    tgt = jnp.sum(jnp.where(cls_iota == glabel, plabel, 0.0), axis=1, keepdims=True)
    con = jnp.where(valid, lse - tgt, 0.0)                    # (B, 1, A), >= 0

    # ---- hard-negative mining -------------------------------------------------
    # Composite ranking key: [truncated con_neg bit pattern | reversed anchor idx].
    # con_neg >= 0, so its f32 bit pattern is order preserving; the low `idx_bits`
    # bits are replaced by (A - 1 - idx) so all keys are unique, ties resolve to the
    # lowest index (matching the stable double-argsort reference) and padded lanes
    # (con forced to 0, highest indices) always rank last.
    con_neg = jnp.where(maskb, 0.0, con)
    con_bits = pltpu.bitcast(con_neg, jnp.int32)
    key = (con_bits & jnp.int32(-(1 << idx_bits))) | (jnp.int32(A - 1) - lane)

    k = jnp.minimum(3 * pos_i, a_valid)                       # (B, 1, 1) #hard negatives

    # Exact k-th largest key via a 4-bit/step radix select: 8 short serial count steps
    # (vs. 32 + ~16 bisection reductions before), shared by all B samples in the block.
    d16 = lax.broadcasted_iota(jnp.int32, (1, 16, 1), 1)
    p = jnp.zeros((B, 1, 1), jnp.int32)
    for step in range(8):
        shift = 28 - 4 * step
        thr = p + d16 * jnp.int32(1 << shift)                 # (B, 16, 1)
        cnt = jnp.sum((key >= thr).astype(jnp.int32), axis=2, keepdims=True)
        # `thr > p` rejects the d=0 candidate and any digit that wrapped past int32.
        ok = jnp.logical_and(cnt >= k, thr > p)
        digit = jnp.sum(ok.astype(jnp.int32), axis=1, keepdims=True)   # (B, 1, 1)
        p = p + digit * jnp.int32(1 << shift)

    neg_f = (key >= p).astype(jnp.float32)                    # exactly k anchors (k >= 1)

    con_loss = jnp.sum(con * (maskf + neg_f), axis=2, keepdims=True)   # (B, 1, 1)

    # ---- combine, normalize by #positives -------------------------------------
    total = loc_loss + con_loss
    num_mask = (pos_i > 0).astype(jnp.float32)
    pos_c = jnp.maximum(pos_f, 1e-6)
    out_ref[...] = total * num_mask / pos_c                   # per-sample loss (B, 1, 1)


def ssd_loss(ploc, plabel, gloc, glabel, dboxes, *, block_batch=4, use_bf16_ce=True):
    """Mean SSD loss.  ploc/gloc (N,4,A) f32, plabel (N,C,A) f32, glabel (N,A) int,
    dboxes (1,4,A) f32 (xywh)."""
    N, C, A = plabel.shape

    # Pad anchors to a lane-dense multiple of 128; padded lanes are masked in-kernel.
    A_pad = ((A + 127) // 128) * 128
    pad_a = A_pad - A
    if pad_a:
        ploc = jnp.pad(ploc, ((0, 0), (0, 0), (0, pad_a)))
        plabel = jnp.pad(plabel, ((0, 0), (0, 0), (0, pad_a)))
        gloc = jnp.pad(gloc, ((0, 0), (0, 0), (0, pad_a)))
        glabel = jnp.pad(glabel, ((0, 0), (0, pad_a)))
        # padded default-box w/h = 1 keeps 1/d_wh finite on padded lanes
        dboxes = jnp.concatenate(
            [jnp.pad(dboxes[:, :2, :], ((0, 0), (0, 0), (0, pad_a))),
             jnp.pad(dboxes[:, 2:, :], ((0, 0), (0, 0), (0, pad_a)), constant_values=1.0)],
            axis=1)

    # Samples per grid step.  Review guidance: ~8 on v5e/v6e (raise vmem_limit_bytes
    # to ~96 MiB for full SSD300), 2-4 (f32 CE) / 4-8 (bf16 CE) on v7x (64 MiB VMEM).
    B = max(1, min(block_batch, N))
    N_pad = ((N + B - 1) // B) * B
    pad_n = N_pad - N
    if pad_n:
        ploc = jnp.pad(ploc, ((0, pad_n), (0, 0), (0, 0)))
        plabel = jnp.pad(plabel, ((0, pad_n), (0, 0), (0, 0)))
        gloc = jnp.pad(gloc, ((0, pad_n), (0, 0), (0, 0)))
        glabel = jnp.pad(glabel, ((0, pad_n), (0, 0)))

    glabel3 = glabel.reshape(N_pad, 1, A_pad).astype(jnp.int32)
    idx_bits = max((A_pad - 1).bit_length(), 1)    # 14 for SSD300 -> >= 9 mantissa bits kept

    kernel = functools.partial(ssd_loss_kernel, a_valid=A, idx_bits=idx_bits,
                               use_bf16_ce=use_bf16_ce)
    per_sample = pl.pallas_call(
        kernel,
        out_shape=jax.ShapeDtypeStruct((N_pad, 1, 1), jnp.float32),
        grid=(N_pad // B,),
        in_specs=[
            pl.BlockSpec((B, 4, A_pad), lambda i: (i, 0, 0)),   # ploc
            pl.BlockSpec((B, C, A_pad), lambda i: (i, 0, 0)),   # plabel
            pl.BlockSpec((B, 4, A_pad), lambda i: (i, 0, 0)),   # gloc
            pl.BlockSpec((B, 1, A_pad), lambda i: (i, 0, 0)),   # glabel
            pl.BlockSpec((1, 4, A_pad), lambda i: (0, 0, 0)),   # dboxes (shared, constant)
        ],
        out_specs=pl.BlockSpec((B, 1, 1), lambda i: (i, 0, 0)),
        compiler_params=pltpu.CompilerParams(
            dimension_semantics=("parallel",),
            vmem_limit_bytes=48 * 1024 * 1024,
        ),
    )(ploc, plabel, gloc, glabel3, dboxes)
    return jnp.mean(per_sample[:N, 0, 0])


# ---------------- pure-JAX reference (mirrors the PyTorch forward) -------------
def ssd_loss_ref(ploc, plabel, gloc, glabel, dboxes):
    mask = glabel > 0
    pos_num = jnp.sum(mask, axis=1)
    d_xy = dboxes[:, :2, :]
    d_wh = dboxes[:, 2:, :]
    gxy = SCALE_XY * (gloc[:, :2, :] - d_xy) / d_wh
    gwh = SCALE_WH * jnp.log(gloc[:, 2:, :] / d_wh)
    vec_gd = jnp.concatenate([gxy, gwh], axis=1)
    diff = ploc - vec_gd
    ad = jnp.abs(diff)
    sl1 = jnp.where(ad < 1.0, 0.5 * diff * diff, ad - 0.5)
    loc_loss = jnp.sum(mask.astype(jnp.float32) * jnp.sum(sl1, axis=1), axis=1)

    logits = jnp.transpose(plabel, (0, 2, 1))                    # (N, A, C)
    lse = jax.nn.logsumexp(logits, axis=-1)
    tgt = jnp.take_along_axis(logits, glabel[..., None], axis=-1)[..., 0]
    con = lse - tgt

    con_neg = jnp.where(mask, 0.0, con)
    con_idx = jnp.argsort(-con_neg, axis=1)                      # stable descending
    con_rank = jnp.argsort(con_idx, axis=1)
    neg_num = jnp.minimum(3 * pos_num, mask.shape[1])[:, None]
    neg_mask = con_rank < neg_num
    con_loss = jnp.sum(con * (mask.astype(jnp.float32) + neg_mask.astype(jnp.float32)), axis=1)

    total = loc_loss + con_loss
    num_mask = (pos_num > 0).astype(jnp.float32)
    pos_f = jnp.maximum(pos_num.astype(jnp.float32), 1e-6)
    return jnp.mean(total * num_mask / pos_f)


if __name__ == "__main__":
    # Small stand-in for SSD300 (real shapes: N, 81, 8732).  A=200 exercises the
    # anchor-padding path (->256); N=6 with block_batch=4 exercises batch padding (->8).
    N, C, A = 6, 8, 200

    key = jax.random.PRNGKey(0)
    k1, k2, k3, k4, k5, k6 = jax.random.split(key, 6)

    # deterministic synthetic default boxes (xywh, positive w/h)
    d_cxy = jax.random.uniform(k1, (1, 2, A), jnp.float32, 0.05, 0.95)
    d_wh = jax.random.uniform(k2, (1, 2, A), jnp.float32, 0.10, 0.50)
    dboxes = jnp.concatenate([d_cxy, d_wh], axis=1)              # (1, 4, A)

    # ground-truth boxes matched to anchors (xywh, positive w/h for the log)
    g_cxy = jax.random.uniform(k3, (N, 2, A), jnp.float32, 0.0, 1.0)
    g_wh = jax.random.uniform(k4, (N, 2, A), jnp.float32, 0.05, 0.60)
    gloc = jnp.concatenate([g_cxy, g_wh], axis=1)                # (N, 4, A)

    ploc = 0.1 * jax.random.normal(k5, (N, 4, A), jnp.float32)   # predicted regressions
    plabel = jax.random.normal(k6, (N, C, A), jnp.float32)       # predicted class logits

    # Mix of regimes: dense positives (3*pos > A, positives re-enter the negative set),
    # sparse positives (real hard-negative mining), one all-background sample (pos = 0).
    labels = jax.random.randint(jax.random.PRNGKey(1), (N, A), 1, C, dtype=jnp.int32)
    u = jax.random.uniform(jax.random.PRNGKey(2), (N, A))
    keep_p = jnp.array([[0.7], [0.2], [0.05], [0.5], [0.0], [0.15]], jnp.float32)
    glabel = jnp.where(u < keep_p, labels, 0).astype(jnp.int32)

    out = jax.block_until_ready(ssd_loss(ploc, plabel, gloc, glabel, dboxes))
    ref = jax.block_until_ready(ssd_loss_ref(ploc, plabel, gloc, glabel, dboxes))
    np.testing.assert_allclose(np.asarray(out), np.asarray(ref), rtol=1e-2, atol=1e-3)

    print("KERNEL_OK")
</pallas_src>

<mosaic_0001>
module attributes {stable_mosaic.version = 11 : i64} {
  func.func @ssd_loss_kernel(%arg0: i32, %arg1: memref<4x4x256xf32, #tpu.memory_space<vmem>>, %arg2: memref<4x8x256xf32, #tpu.memory_space<vmem>>, %arg3: memref<4x4x256xf32, #tpu.memory_space<vmem>>, %arg4: memref<4x1x256xi32, #tpu.memory_space<vmem>>, %arg5: memref<1x4x256xf32, #tpu.memory_space<vmem>>, %arg6: memref<4x1x1xf32, #tpu.memory_space<vmem>>) attributes {dimension_semantics = [#tpu.dimension_semantics<parallel>], iteration_bounds = array<i64: 2>, scalar_prefetch = 0 : i64, scratch_operands = 0 : i64, tpu.core_type = #tpu.core_type<tc>, window_params = [{transform_indices = @transform_0, window_bounds = array<i64: 4, 4, 256>}, {transform_indices = @transform_1, window_bounds = array<i64: 4, 8, 256>}, {transform_indices = @transform_2, window_bounds = array<i64: 4, 4, 256>}, {transform_indices = @transform_3, window_bounds = array<i64: 4, 1, 256>}, {pipeline_mode = #tpu.pipeline_mode<synchronous>, transform_indices = @transform_4, window_bounds = array<i64: 1, 4, 256>}, {transform_indices = @transform_5, window_bounds = array<i64: 4, 1, 1>}]} {
    %c0 = arith.constant 0 : index
    %c0_0 = arith.constant 0 : index
    %c0_1 = arith.constant 0 : index
    %0 = vector.load %arg1[%c0, %c0_0, %c0_1] : memref<4x4x256xf32, #tpu.memory_space<vmem>>, vector<4x4x256xf32>
    %c0_2 = arith.constant 0 : index
    %c0_3 = arith.constant 0 : index
    %c0_4 = arith.constant 0 : index
    %1 = vector.load %arg2[%c0_2, %c0_3, %c0_4] : memref<4x8x256xf32, #tpu.memory_space<vmem>>, vector<4x8x256xf32>
    %c0_5 = arith.constant 0 : index
    %c0_6 = arith.constant 0 : index
    %c0_7 = arith.constant 0 : index
    %2 = vector.load %arg3[%c0_5, %c0_6, %c0_7] : memref<4x4x256xf32, #tpu.memory_space<vmem>>, vector<4x4x256xf32>
    %c0_8 = arith.constant 0 : index
    %c0_9 = arith.constant 0 : index
    %c0_10 = arith.constant 0 : index
    %3 = vector.load %arg4[%c0_8, %c0_9, %c0_10] : memref<4x1x256xi32, #tpu.memory_space<vmem>>, vector<4x1x256xi32>
    %c0_11 = arith.constant 0 : index
    %c0_12 = arith.constant 0 : index
    %c0_13 = arith.constant 0 : index
    %4 = vector.load %arg5[%c0_11, %c0_12, %c0_13] : memref<1x4x256xf32, #tpu.memory_space<vmem>>, vector<1x4x256xf32>
    %5 = tpu.iota {dimensions = array<i32: 2>} : vector<4x1x256xi32>
    %c200_i32 = arith.constant 200 : i32
    %6 = vector.broadcast %c200_i32 : i32 to vector<4x1x256xi32>
    %7 = arith.cmpi slt, %5, %6 : vector<4x1x256xi32>
    %c0_i32 = arith.constant 0 : i32
    %8 = vector.broadcast %c0_i32 : i32 to vector<4x1x256xi32>
    %9 = arith.cmpi sgt, %3, %8 : vector<4x1x256xi32>
    %10 = arith.extui %9 : vector<4x1x256xi1> to vector<4x1x256xi32>
    %11 = arith.sitofp %10 : vector<4x1x256xi32> to vector<4x1x256xf32>
    %12 = arith.extui %9 : vector<4x1x256xi1> to vector<4x1x256xi32>
    %cst = arith.constant dense<0> : vector<4x1xi32>
    %13 = vector.multi_reduction <add>, %12, %cst [2] : vector<4x1x256xi32> to vector<4x1xi32>
    %14 = vector.shape_cast %13 : vector<4x1xi32> to vector<4x1x1xi32>
    %15 = arith.sitofp %14 : vector<4x1x1xi32> to vector<4x1x1xf32>
    %16 = vector.extract_strided_slice %4 {offsets = [0, 0, 0], sizes = [1, 2, 256], strides = [1, 1, 1]} : vector<1x4x256xf32> to vector<1x2x256xf32>
    %17 = vector.extract_strided_slice %4 {offsets = [0, 2, 0], sizes = [1, 2, 256], strides = [1, 1, 1]} : vector<1x4x256xf32> to vector<1x2x256xf32>
    %cst_14 = arith.constant 1.000000e+00 : f32
    %18 = vector.broadcast %cst_14 : f32 to vector<1x2x256xf32>
    %19 = arith.divf %18, %17 : vector<1x2x256xf32>
    %20 = vector.extract_strided_slice %2 {offsets = [0, 0, 0], sizes = [4, 2, 256], strides = [1, 1, 1]} : vector<4x4x256xf32> to vector<4x2x256xf32>
    %21 = vector.broadcast %16 : vector<1x2x256xf32> to vector<4x2x256xf32>
    %22 = arith.subf %20, %21 : vector<4x2x256xf32>
    %cst_15 = arith.constant 1.000000e+01 : f32
    %23 = vector.broadcast %cst_15 : f32 to vector<4x2x256xf32>
    %24 = arith.mulf %23, %22 : vector<4x2x256xf32>
    %25 = vector.broadcast %19 : vector<1x2x256xf32> to vector<4x2x256xf32>
    %26 = arith.mulf %24, %25 : vector<4x2x256xf32>
    %27 = vector.extract_strided_slice %2 {offsets = [0, 2, 0], sizes = [4, 2, 256], strides = [1, 1, 1]} : vector<4x4x256xf32> to vector<4x2x256xf32>
    %28 = vector.broadcast %19 : vector<1x2x256xf32> to vector<4x2x256xf32>
    %29 = arith.mulf %27, %28 : vector<4x2x256xf32>
    %cst_16 = arith.constant 1.000000e+00 : f32
    %30 = vector.shape_cast %9 : vector<4x1x256xi1> to vector<4x1x256xi1>
    %31 = vector.broadcast %30 : vector<4x1x256xi1> to vector<4x2x256xi1>
    %32 = vector.broadcast %cst_16 : f32 to vector<4x2x256xf32>
    %33 = arith.select %31, %29, %32 : vector<4x2x256xi1>, vector<4x2x256xf32>
    %34 = math.log %33 : vector<4x2x256xf32>
    %cst_17 = arith.constant 5.000000e+00 : f32
    %35 = vector.broadcast %cst_17 : f32 to vector<4x2x256xf32>
    %36 = arith.mulf %35, %34 : vector<4x2x256xf32>
    %37 = vector.extract_strided_slice %0 {offsets = [0, 0, 0], sizes = [4, 2, 256], strides = [1, 1, 1]} : vector<4x4x256xf32> to vector<4x2x256xf32>
    %38 = arith.subf %37, %26 : vector<4x2x256xf32>
    %39 = math.absf %38 : vector<4x2x256xf32>
    %cst_18 = arith.constant 1.000000e+00 : f32
    %40 = vector.broadcast %cst_18 : f32 to vector<4x2x256xf32>
    %41 = arith.cmpf olt, %39, %40 : vector<4x2x256xf32>
    %cst_19 = arith.constant 5.000000e-01 : f32
    %42 = vector.broadcast %cst_19 : f32 to vector<4x2x256xf32>
    %43 = arith.mulf %42, %38 : vector<4x2x256xf32>
    %44 = arith.mulf %43, %38 : vector<4x2x256xf32>
    %cst_20 = arith.constant 5.000000e-01 : f32
    %45 = vector.broadcast %cst_20 : f32 to vector<4x2x256xf32>
    %46 = arith.subf %39, %45 : vector<4x2x256xf32>
    %47 = arith.select %41, %44, %46 : vector<4x2x256xi1>, vector<4x2x256xf32>
    %cst_21 = arith.constant dense<0.000000e+00> : vector<4x256xf32>
    %48 = vector.multi_reduction <add>, %47, %cst_21 [1] : vector<4x2x256xf32> to vector<4x256xf32>
    %49 = vector.shape_cast %48 : vector<4x256xf32> to vector<4x1x256xf32>
    %50 = vector.extract_strided_slice %0 {offsets = [0, 2, 0], sizes = [4, 2, 256], strides = [1, 1, 1]} : vector<4x4x256xf32> to vector<4x2x256xf32>
    %51 = arith.subf %50, %36 : vector<4x2x256xf32>
    %52 = math.absf %51 : vector<4x2x256xf32>
    %cst_22 = arith.constant 1.000000e+00 : f32
    %53 = vector.broadcast %cst_22 : f32 to vector<4x2x256xf32>
    %54 = arith.cmpf olt, %52, %53 : vector<4x2x256xf32>
    %cst_23 = arith.constant 5.000000e-01 : f32
    %55 = vector.broadcast %cst_23 : f32 to vector<4x2x256xf32>
    %56 = arith.mulf %55, %51 : vector<4x2x256xf32>
    %57 = arith.mulf %56, %51 : vector<4x2x256xf32>
    %cst_24 = arith.constant 5.000000e-01 : f32
    %58 = vector.broadcast %cst_24 : f32 to vector<4x2x256xf32>
    %59 = arith.subf %52, %58 : vector<4x2x256xf32>
    %60 = arith.select %54, %57, %59 : vector<4x2x256xi1>, vector<4x2x256xf32>
    %cst_25 = arith.constant dense<0.000000e+00> : vector<4x256xf32>
    %61 = vector.multi_reduction <add>, %60, %cst_25 [1] : vector<4x2x256xf32> to vector<4x256xf32>
    %62 = vector.shape_cast %61 : vector<4x256xf32> to vector<4x1x256xf32>
    %63 = arith.addf %49, %62 : vector<4x1x256xf32>
    %64 = arith.mulf %11, %63 : vector<4x1x256xf32>
    %cst_26 = arith.constant dense<0.000000e+00> : vector<4x1xf32>
    %65 = vector.multi_reduction <add>, %64, %cst_26 [2] : vector<4x1x256xf32> to vector<4x1xf32>
    %66 = vector.shape_cast %65 : vector<4x1xf32> to vector<4x1x1xf32>
    %cst_27 = arith.constant dense<0xFF800000> : vector<4x256xf32>
    %67 = vector.multi_reduction <maximumf>, %1, %cst_27 [1] : vector<4x8x256xf32> to vector<4x256xf32>
    %68 = vector.shape_cast %67 : vector<4x256xf32> to vector<4x1x256xf32>
    %69 = vector.broadcast %68 : vector<4x1x256xf32> to vector<4x8x256xf32>
    %70 = arith.subf %1, %69 : vector<4x8x256xf32>
    %71 = arith.truncf %70 : vector<4x8x256xf32> to vector<4x8x256xbf16>
    %72 = math.exp %71 : vector<4x8x256xbf16>
    %73 = arith.extf %72 : vector<4x8x256xbf16> to vector<4x8x256xf32>
    %cst_28 = arith.constant dense<0.000000e+00> : vector<4x256xf32>
    %74 = vector.multi_reduction <add>, %73, %cst_28 [1] : vector<4x8x256xf32> to vector<4x256xf32>
    %75 = vector.shape_cast %74 : vector<4x256xf32> to vector<4x1x256xf32>
    %76 = math.log %75 : vector<4x1x256xf32>
    %77 = arith.addf %76, %68 : vector<4x1x256xf32>
    %78 = tpu.iota {dimensions = array<i32: 1>} : vector<4x8x256xi32>
    %79 = vector.broadcast %3 : vector<4x1x256xi32> to vector<4x8x256xi32>
    %80 = arith.cmpi eq, %78, %79 : vector<4x8x256xi32>
    %cst_29 = arith.constant 0.000000e+00 : f32
    %81 = vector.broadcast %cst_29 : f32 to vector<4x8x256xf32>
    %82 = arith.select %80, %1, %81 : vector<4x8x256xi1>, vector<4x8x256xf32>
    %cst_30 = arith.constant dense<0.000000e+00> : vector<4x256xf32>
    %83 = vector.multi_reduction <add>, %82, %cst_30 [1] : vector<4x8x256xf32> to vector<4x256xf32>
    %84 = vector.shape_cast %83 : vector<4x256xf32> to vector<4x1x256xf32>
    %85 = arith.subf %77, %84 : vector<4x1x256xf32>
    %cst_31 = arith.constant 0.000000e+00 : f32
    %86 = vector.broadcast %cst_31 : f32 to vector<4x1x256xf32>
    %87 = arith.select %7, %85, %86 : vector<4x1x256xi1>, vector<4x1x256xf32>
    %cst_32 = arith.constant 0.000000e+00 : f32
    %88 = vector.broadcast %cst_32 : f32 to vector<4x1x256xf32>
    %89 = arith.select %9, %88, %87 : vector<4x1x256xi1>, vector<4x1x256xf32>
    %90 = tpu.bitcast %89 : vector<4x1x256xf32> -> vector<4x1x256xi32>
    %c-256_i32 = arith.constant -256 : i32
    %91 = vector.broadcast %c-256_i32 : i32 to vector<4x1x256xi32>
    %92 = arith.andi %90, %91 : vector<4x1x256xi32>
    %c255_i32 = arith.constant 255 : i32
    %93 = vector.broadcast %c255_i32 : i32 to vector<4x1x256xi32>
    %94 = arith.subi %93, %5 : vector<4x1x256xi32>
    %95 = arith.ori %92, %94 : vector<4x1x256xi32>
    %c3_i32 = arith.constant 3 : i32
    %96 = vector.broadcast %c3_i32 : i32 to vector<4x1x1xi32>
    %97 = arith.muli %96, %14 : vector<4x1x1xi32>
    %c200_i32_33 = arith.constant 200 : i32
    %98 = vector.broadcast %c200_i32_33 : i32 to vector<4x1x1xi32>
    %99 = arith.minsi %97, %98 : vector<4x1x1xi32>
    %100 = tpu.iota {dimensions = array<i32: 1>} : vector<1x16x1xi32>
    %c0_i32_34 = arith.constant 0 : i32
    %101 = vector.broadcast %c0_i32_34 : i32 to vector<4x1x1xi32>
    %c268435456_i32 = arith.constant 268435456 : i32
    %102 = vector.broadcast %c268435456_i32 : i32 to vector<1x16x1xi32>
    %103 = arith.muli %100, %102 : vector<1x16x1xi32>
    %104 = vector.broadcast %101 : vector<4x1x1xi32> to vector<4x16x1xi32>
    %105 = vector.broadcast %103 : vector<1x16x1xi32> to vector<4x16x1xi32>
    %106 = arith.addi %104, %105 : vector<4x16x1xi32>
    %107 = vector.broadcast %95 : vector<4x1x256xi32> to vector<4x16x256xi32>
    %108 = vector.broadcast %106 : vector<4x16x1xi32> to vector<4x16x256xi32>
    %109 = arith.cmpi sge, %107, %108 : vector<4x16x256xi32>
    %110 = arith.extui %109 : vector<4x16x256xi1> to vector<4x16x256xi32>
    %cst_35 = arith.constant dense<0> : vector<4x16xi32>
    %111 = vector.multi_reduction <add>, %110, %cst_35 [2] : vector<4x16x256xi32> to vector<4x16xi32>
    %112 = vector.shape_cast %111 : vector<4x16xi32> to vector<4x16x1xi32>
    %113 = vector.broadcast %99 : vector<4x1x1xi32> to vector<4x16x1xi32>
    %114 = arith.cmpi sge, %112, %113 : vector<4x16x1xi32>
    %115 = vector.broadcast %101 : vector<4x1x1xi32> to vector<4x16x1xi32>
    %116 = arith.cmpi sgt, %106, %115 : vector<4x16x1xi32>
    %117 = arith.andi %114, %116 : vector<4x16x1xi1>
    %118 = arith.extui %117 : vector<4x16x1xi1> to vector<4x16x1xi32>
    %cst_36 = arith.constant dense<0> : vector<4x1xi32>
    %119 = vector.multi_reduction <add>, %118, %cst_36 [1] : vector<4x16x1xi32> to vector<4x1xi32>
    %120 = vector.shape_cast %119 : vector<4x1xi32> to vector<4x1x1xi32>
    %c268435456_i32_37 = arith.constant 268435456 : i32
    %121 = vector.broadcast %c268435456_i32_37 : i32 to vector<4x1x1xi32>
    %122 = arith.muli %120, %121 : vector<4x1x1xi32>
    %123 = arith.addi %101, %122 : vector<4x1x1xi32>
    %c16777216_i32 = arith.constant 16777216 : i32
    %124 = vector.broadcast %c16777216_i32 : i32 to vector<1x16x1xi32>
    %125 = arith.muli %100, %124 : vector<1x16x1xi32>
    %126 = vector.broadcast %123 : vector<4x1x1xi32> to vector<4x16x1xi32>
    %127 = vector.broadcast %125 : vector<1x16x1xi32> to vector<4x16x1xi32>
    %128 = arith.addi %126, %127 : vector<4x16x1xi32>
    %129 = vector.broadcast %95 : vector<4x1x256xi32> to vector<4x16x256xi32>
    %130 = vector.broadcast %128 : vector<4x16x1xi32> to vector<4x16x256xi32>
    %131 = arith.cmpi sge, %129, %130 : vector<4x16x256xi32>
    %132 = arith.extui %131 : vector<4x16x256xi1> to vector<4x16x256xi32>
    %cst_38 = arith.constant dense<0> : vector<4x16xi32>
    %133 = vector.multi_reduction <add>, %132, %cst_38 [2] : vector<4x16x256xi32> to vector<4x16xi32>
    %134 = vector.shape_cast %133 : vector<4x16xi32> to vector<4x16x1xi32>
    %135 = vector.broadcast %99 : vector<4x1x1xi32> to vector<4x16x1xi32>
    %136 = arith.cmpi sge, %134, %135 : vector<4x16x1xi32>
    %137 = vector.broadcast %123 : vector<4x1x1xi32> to vector<4x16x1xi32>
    %138 = arith.cmpi sgt, %128, %137 : vector<4x16x1xi32>
    %139 = arith.andi %136, %138 : vector<4x16x1xi1>
    %140 = arith.extui %139 : vector<4x16x1xi1> to vector<4x16x1xi32>
    %cst_39 = arith.constant dense<0> : vector<4x1xi32>
    %141 = vector.multi_reduction <add>, %140, %cst_39 [1] : vector<4x16x1xi32> to vector<4x1xi32>
    %142 = vector.shape_cast %141 : vector<4x1xi32> to vector<4x1x1xi32>
    %c16777216_i32_40 = arith.constant 16777216 : i32
    %143 = vector.broadcast %c16777216_i32_40 : i32 to vector<4x1x1xi32>
    %144 = arith.muli %142, %143 : vector<4x1x1xi32>
    %145 = arith.addi %123, %144 : vector<4x1x1xi32>
    %c1048576_i32 = arith.constant 1048576 : i32
    %146 = vector.broadcast %c1048576_i32 : i32 to vector<1x16x1xi32>
    %147 = arith.muli %100, %146 : vector<1x16x1xi32>
    %148 = vector.broadcast %145 : vector<4x1x1xi32> to vector<4x16x1xi32>
    %149 = vector.broadcast %147 : vector<1x16x1xi32> to vector<4x16x1xi32>
    %150 = arith.addi %148, %149 : vector<4x16x1xi32>
    %151 = vector.broadcast %95 : vector<4x1x256xi32> to vector<4x16x256xi32>
    %152 = vector.broadcast %150 : vector<4x16x1xi32> to vector<4x16x256xi32>
    %153 = arith.cmpi sge, %151, %152 : vector<4x16x256xi32>
    %154 = arith.extui %153 : vector<4x16x256xi1> to vector<4x16x256xi32>
    %cst_41 = arith.constant dense<0> : vector<4x16xi32>
    %155 = vector.multi_reduction <add>, %154, %cst_41 [2] : vector<4x16x256xi32> to vector<4x16xi32>
    %156 = vector.shape_cast %155 : vector<4x16xi32> to vector<4x16x1xi32>
    %157 = vector.broadcast %99 : vector<4x1x1xi32> to vector<4x16x1xi32>
    %158 = arith.cmpi sge, %156, %157 : vector<4x16x1xi32>
    %159 = vector.broadcast %145 : vector<4x1x1xi32> to vector<4x16x1xi32>
    %160 = arith.cmpi sgt, %150, %159 : vector<4x16x1xi32>
    %161 = arith.andi %158, %160 : vector<4x16x1xi1>
    %162 = arith.extui %161 : vector<4x16x1xi1> to vector<4x16x1xi32>
    %cst_42 = arith.constant dense<0> : vector<4x1xi32>
    %163 = vector.multi_reduction <add>, %162, %cst_42 [1] : vector<4x16x1xi32> to vector<4x1xi32>
    %164 = vector.shape_cast %163 : vector<4x1xi32> to vector<4x1x1xi32>
    %c1048576_i32_43 = arith.constant 1048576 : i32
    %165 = vector.broadcast %c1048576_i32_43 : i32 to vector<4x1x1xi32>
    %166 = arith.muli %164, %165 : vector<4x1x1xi32>
    %167 = arith.addi %145, %166 : vector<4x1x1xi32>
    %c65536_i32 = arith.constant 65536 : i32
    %168 = vector.broadcast %c65536_i32 : i32 to vector<1x16x1xi32>
    %169 = arith.muli %100, %168 : vector<1x16x1xi32>
    %170 = vector.broadcast %167 : vector<4x1x1xi32> to vector<4x16x1xi32>
    %171 = vector.broadcast %169 : vector<1x16x1xi32> to vector<4x16x1xi32>
    %172 = arith.addi %170, %171 : vector<4x16x1xi32>
    %173 = vector.broadcast %95 : vector<4x1x256xi32> to vector<4x16x256xi32>
    %174 = vector.broadcast %172 : vector<4x16x1xi32> to vector<4x16x256xi32>
    %175 = arith.cmpi sge, %173, %174 : vector<4x16x256xi32>
    %176 = arith.extui %175 : vector<4x16x256xi1> to vector<4x16x256xi32>
    %cst_44 = arith.constant dense<0> : vector<4x16xi32>
    %177 = vector.multi_reduction <add>, %176, %cst_44 [2] : vector<4x16x256xi32> to vector<4x16xi32>
    %178 = vector.shape_cast %177 : vector<4x16xi32> to vector<4x16x1xi32>
    %179 = vector.broadcast %99 : vector<4x1x1xi32> to vector<4x16x1xi32>
    %180 = arith.cmpi sge, %178, %179 : vector<4x16x1xi32>
    %181 = vector.broadcast %167 : vector<4x1x1xi32> to vector<4x16x1xi32>
    %182 = arith.cmpi sgt, %172, %181 : vector<4x16x1xi32>
    %183 = arith.andi %180, %182 : vector<4x16x1xi1>
    %184 = arith.extui %183 : vector<4x16x1xi1> to vector<4x16x1xi32>
    %cst_45 = arith.constant dense<0> : vector<4x1xi32>
    %185 = vector.multi_reduction <add>, %184, %cst_45 [1] : vector<4x16x1xi32> to vector<4x1xi32>
    %186 = vector.shape_cast %185 : vector<4x1xi32> to vector<4x1x1xi32>
    %c65536_i32_46 = arith.constant 65536 : i32
    %187 = vector.broadcast %c65536_i32_46 : i32 to vector<4x1x1xi32>
    %188 = arith.muli %186, %187 : vector<4x1x1xi32>
    %189 = arith.addi %167, %188 : vector<4x1x1xi32>
    %c4096_i32 = arith.constant 4096 : i32
    %190 = vector.broadcast %c4096_i32 : i32 to vector<1x16x1xi32>
    %191 = arith.muli %100, %190 : vector<1x16x1xi32>
    %192 = vector.broadcast %189 : vector<4x1x1xi32> to vector<4x16x1xi32>
    %193 = vector.broadcast %191 : vector<1x16x1xi32> to vector<4x16x1xi32>
    %194 = arith.addi %192, %193 : vector<4x16x1xi32>
    %195 = vector.broadcast %95 : vector<4x1x256xi32> to vector<4x16x256xi32>
    %196 = vector.broadcast %194 : vector<4x16x1xi32> to vector<4x16x256xi32>
    %197 = arith.cmpi sge, %195, %196 : vector<4x16x256xi32>
    %198 = arith.extui %197 : vector<4x16x256xi1> to vector<4x16x256xi32>
    %cst_47 = arith.constant dense<0> : vector<4x16xi32>
    %199 = vector.multi_reduction <add>, %198, %cst_47 [2] : vector<4x16x256xi32> to vector<4x16xi32>
    %200 = vector.shape_cast %199 : vector<4x16xi32> to vector<4x16x1xi32>
    %201 = vector.broadcast %99 : vector<4x1x1xi32> to vector<4x16x1xi32>
    %202 = arith.cmpi sge, %200, %201 : vector<4x16x1xi32>
    %203 = vector.broadcast %189 : vector<4x1x1xi32> to vector<4x16x1xi32>
    %204 = arith.cmpi sgt, %194, %203 : vector<4x16x1xi32>
    %205 = arith.andi %202, %204 : vector<4x16x1xi1>
    %206 = arith.extui %205 : vector<4x16x1xi1> to vector<4x16x1xi32>
    %cst_48 = arith.constant dense<0> : vector<4x1xi32>
    %207 = vector.multi_reduction <add>, %206, %cst_48 [1] : vector<4x16x1xi32> to vector<4x1xi32>
    %208 = vector.shape_cast %207 : vector<4x1xi32> to vector<4x1x1xi32>
    %c4096_i32_49 = arith.constant 4096 : i32
    %209 = vector.broadcast %c4096_i32_49 : i32 to vector<4x1x1xi32>
    %210 = arith.muli %208, %209 : vector<4x1x1xi32>
    %211 = arith.addi %189, %210 : vector<4x1x1xi32>
    %c256_i32 = arith.constant 256 : i32
    %212 = vector.broadcast %c256_i32 : i32 to vector<1x16x1xi32>
    %213 = arith.muli %100, %212 : vector<1x16x1xi32>
    %214 = vector.broadcast %211 : vector<4x1x1xi32> to vector<4x16x1xi32>
    %215 = vector.broadcast %213 : vector<1x16x1xi32> to vector<4x16x1xi32>
    %216 = arith.addi %214, %215 : vector<4x16x1xi32>
    %217 = vector.broadcast %95 : vector<4x1x256xi32> to vector<4x16x256xi32>
    %218 = vector.broadcast %216 : vector<4x16x1xi32> to vector<4x16x256xi32>
    %219 = arith.cmpi sge, %217, %218 : vector<4x16x256xi32>
    %220 = arith.extui %219 : vector<4x16x256xi1> to vector<4x16x256xi32>
    %cst_50 = arith.constant dense<0> : vector<4x16xi32>
    %221 = vector.multi_reduction <add>, %220, %cst_50 [2] : vector<4x16x256xi32> to vector<4x16xi32>
    %222 = vector.shape_cast %221 : vector<4x16xi32> to vector<4x16x1xi32>
    %223 = vector.broadcast %99 : vector<4x1x1xi32> to vector<4x16x1xi32>
    %224 = arith.cmpi sge, %222, %223 : vector<4x16x1xi32>
    %225 = vector.broadcast %211 : vector<4x1x1xi32> to vector<4x16x1xi32>
    %226 = arith.cmpi sgt, %216, %225 : vector<4x16x1xi32>
    %227 = arith.andi %224, %226 : vector<4x16x1xi1>
    %228 = arith.extui %227 : vector<4x16x1xi1> to vector<4x16x1xi32>
    %cst_51 = arith.constant dense<0> : vector<4x1xi32>
    %229 = vector.multi_reduction <add>, %228, %cst_51 [1] : vector<4x16x1xi32> to vector<4x1xi32>
    %230 = vector.shape_cast %229 : vector<4x1xi32> to vector<4x1x1xi32>
    %c256_i32_52 = arith.constant 256 : i32
    %231 = vector.broadcast %c256_i32_52 : i32 to vector<4x1x1xi32>
    %232 = arith.muli %230, %231 : vector<4x1x1xi32>
    %233 = arith.addi %211, %232 : vector<4x1x1xi32>
    %c16_i32 = arith.constant 16 : i32
    %234 = vector.broadcast %c16_i32 : i32 to vector<1x16x1xi32>
    %235 = arith.muli %100, %234 : vector<1x16x1xi32>
    %236 = vector.broadcast %233 : vector<4x1x1xi32> to vector<4x16x1xi32>
    %237 = vector.broadcast %235 : vector<1x16x1xi32> to vector<4x16x1xi32>
    %238 = arith.addi %236, %237 : vector<4x16x1xi32>
    %239 = vector.broadcast %95 : vector<4x1x256xi32> to vector<4x16x256xi32>
    %240 = vector.broadcast %238 : vector<4x16x1xi32> to vector<4x16x256xi32>
    %241 = arith.cmpi sge, %239, %240 : vector<4x16x256xi32>
    %242 = arith.extui %241 : vector<4x16x256xi1> to vector<4x16x256xi32>
    %cst_53 = arith.constant dense<0> : vector<4x16xi32>
    %243 = vector.multi_reduction <add>, %242, %cst_53 [2] : vector<4x16x256xi32> to vector<4x16xi32>
    %244 = vector.shape_cast %243 : vector<4x16xi32> to vector<4x16x1xi32>
    %245 = vector.broadcast %99 : vector<4x1x1xi32> to vector<4x16x1xi32>
    %246 = arith.cmpi sge, %244, %245 : vector<4x16x1xi32>
    %247 = vector.broadcast %233 : vector<4x1x1xi32> to vector<4x16x1xi32>
    %248 = arith.cmpi sgt, %238, %247 : vector<4x16x1xi32>
    %249 = arith.andi %246, %248 : vector<4x16x1xi1>
    %250 = arith.extui %249 : vector<4x16x1xi1> to vector<4x16x1xi32>
    %cst_54 = arith.constant dense<0> : vector<4x1xi32>
    %251 = vector.multi_reduction <add>, %250, %cst_54 [1] : vector<4x16x1xi32> to vector<4x1xi32>
    %252 = vector.shape_cast %251 : vector<4x1xi32> to vector<4x1x1xi32>
    %c16_i32_55 = arith.constant 16 : i32
    %253 = vector.broadcast %c16_i32_55 : i32 to vector<4x1x1xi32>
    %254 = arith.muli %252, %253 : vector<4x1x1xi32>
    %255 = arith.addi %233, %254 : vector<4x1x1xi32>
    %c1_i32 = arith.constant 1 : i32
    %256 = vector.broadcast %c1_i32 : i32 to vector<1x16x1xi32>
    %257 = arith.muli %100, %256 : vector<1x16x1xi32>
    %258 = vector.broadcast %255 : vector<4x1x1xi32> to vector<4x16x1xi32>
    %259 = vector.broadcast %257 : vector<1x16x1xi32> to vector<4x16x1xi32>
    %260 = arith.addi %258, %259 : vector<4x16x1xi32>
    %261 = vector.broadcast %95 : vector<4x1x256xi32> to vector<4x16x256xi32>
    %262 = vector.broadcast %260 : vector<4x16x1xi32> to vector<4x16x256xi32>
    %263 = arith.cmpi sge, %261, %262 : vector<4x16x256xi32>
    %264 = arith.extui %263 : vector<4x16x256xi1> to vector<4x16x256xi32>
    %cst_56 = arith.constant dense<0> : vector<4x16xi32>
    %265 = vector.multi_reduction <add>, %264, %cst_56 [2] : vector<4x16x256xi32> to vector<4x16xi32>
    %266 = vector.shape_cast %265 : vector<4x16xi32> to vector<4x16x1xi32>
    %267 = vector.broadcast %99 : vector<4x1x1xi32> to vector<4x16x1xi32>
    %268 = arith.cmpi sge, %266, %267 : vector<4x16x1xi32>
    %269 = vector.broadcast %255 : vector<4x1x1xi32> to vector<4x16x1xi32>
    %270 = arith.cmpi sgt, %260, %269 : vector<4x16x1xi32>
    %271 = arith.andi %268, %270 : vector<4x16x1xi1>
    %272 = arith.extui %271 : vector<4x16x1xi1> to vector<4x16x1xi32>
    %cst_57 = arith.constant dense<0> : vector<4x1xi32>
    %273 = vector.multi_reduction <add>, %272, %cst_57 [1] : vector<4x16x1xi32> to vector<4x1xi32>
    %274 = vector.shape_cast %273 : vector<4x1xi32> to vector<4x1x1xi32>
    %c1_i32_58 = arith.constant 1 : i32
    %275 = vector.broadcast %c1_i32_58 : i32 to vector<4x1x1xi32>
    %276 = arith.muli %274, %275 : vector<4x1x1xi32>
    %277 = arith.addi %255, %276 : vector<4x1x1xi32>
    %278 = vector.broadcast %277 : vector<4x1x1xi32> to vector<4x1x256xi32>
    %279 = arith.cmpi sge, %95, %278 : vector<4x1x256xi32>
    %280 = arith.extui %279 : vector<4x1x256xi1> to vector<4x1x256xi32>
    %281 = arith.sitofp %280 : vector<4x1x256xi32> to vector<4x1x256xf32>
    %282 = arith.addf %11, %281 : vector<4x1x256xf32>
    %283 = arith.mulf %87, %282 : vector<4x1x256xf32>
    %cst_59 = arith.constant dense<0.000000e+00> : vector<4x1xf32>
    %284 = vector.multi_reduction <add>, %283, %cst_59 [2] : vector<4x1x256xf32> to vector<4x1xf32>
    %285 = vector.shape_cast %284 : vector<4x1xf32> to vector<4x1x1xf32>
    %286 = arith.addf %66, %285 : vector<4x1x1xf32>
    %c0_i32_60 = arith.constant 0 : i32
    %287 = vector.broadcast %c0_i32_60 : i32 to vector<4x1x1xi32>
    %288 = arith.cmpi sgt, %14, %287 : vector<4x1x1xi32>
    %289 = arith.extui %288 : vector<4x1x1xi1> to vector<4x1x1xi32>
    %290 = arith.sitofp %289 : vector<4x1x1xi32> to vector<4x1x1xf32>
    %cst_61 = arith.constant 9.99999997E-7 : f32
    %291 = vector.broadcast %cst_61 : f32 to vector<4x1x1xf32>
    %292 = arith.maximumf %15, %291 : vector<4x1x1xf32>
    %293 = arith.mulf %286, %290 : vector<4x1x1xf32>
    %294 = arith.divf %293, %292 : vector<4x1x1xf32>
    %c0_62 = arith.constant 0 : index
    %c0_63 = arith.constant 0 : index
    %c0_64 = arith.constant 0 : index
    %295 = vector.load %arg6[%c0_62, %c0_63, %c0_64] : memref<4x1x1xf32, #tpu.memory_space<vmem>>, vector<4x1x1xf32>
    tpu.vector_store %arg6[%c0_62, %c0_63, %c0_64], %294 {strides = array<i32>} : memref<4x1x1xf32, #tpu.memory_space<vmem>>, vector<4x1x1xf32>,
    return
  }
  func.func @transform_0(%arg0: i32) -> (i32, i32, i32) {
    %c0_i32 = arith.constant 0 : i32
    %c0_i32_0 = arith.constant 0 : i32
    %c0_i32_1 = arith.constant 0 : i32
    return %arg0, %c0_i32, %c0_i32_0 : i32, i32, i32
  }
  func.func @transform_1(%arg0: i32) -> (i32, i32, i32) {
    %c0_i32 = arith.constant 0 : i32
    %c0_i32_0 = arith.constant 0 : i32
    %c0_i32_1 = arith.constant 0 : i32
    return %arg0, %c0_i32, %c0_i32_0 : i32, i32, i32
  }
  func.func @transform_2(%arg0: i32) -> (i32, i32, i32) {
    %c0_i32 = arith.constant 0 : i32
    %c0_i32_0 = arith.constant 0 : i32
    %c0_i32_1 = arith.constant 0 : i32
    return %arg0, %c0_i32, %c0_i32_0 : i32, i32, i32
  }
  func.func @transform_3(%arg0: i32) -> (i32, i32, i32) {
    %c0_i32 = arith.constant 0 : i32
    %c0_i32_0 = arith.constant 0 : i32
    %c0_i32_1 = arith.constant 0 : i32
    return %arg0, %c0_i32, %c0_i32_0 : i32, i32, i32
  }
  func.func @transform_4(%arg0: i32) -> (i32, i32, i32) {
    %c0_i32 = arith.constant 0 : i32
    %c0_i32_0 = arith.constant 0 : i32
    %c0_i32_1 = arith.constant 0 : i32
    %c0_i32_2 = arith.constant 0 : i32
    return %c0_i32, %c0_i32_0, %c0_i32_1 : i32, i32, i32
  }
  func.func @transform_5(%arg0: i32) -> (i32, i32, i32) {
    %c0_i32 = arith.constant 0 : i32
    %c0_i32_0 = arith.constant 0 : i32
    %c0_i32_1 = arith.constant 0 : i32
    return %arg0, %c0_i32, %c0_i32_0 : i32, i32, i32
  }
}

</mosaic_0001>

<bundles_post_ra>
// kernel: tpu_custom_call.1
= control target key start
LH: loop header
LB: loop body
LE: loop exit
PB: predicated region body
PF: predicated region fallthrough
CT: control target
= control target key end

     0   :  { %s5683_s0 = inlined_call_operand.hbm [shape: f32[8,4,256], index: 0, kind: input, shape index: {}]   ;;  %s5684_s1 = inlined_call_operand.hbm [shape: f32[8,8,256], index: 1, kind: input, shape index: {}]   ;;  %s5685_s2 = inlined_call_operand.hbm [shape: f32[8,4,256], index: 2, kind: input, shape index: {}]   ;;  %s5686_s3 = inlined_call_operand.hbm [shape: s32[8,1,256], index: 3, kind: input, shape index: {}]   ;;  %s5687_s4 = inlined_call_operand.hbm [shape: f32[1,4,256], index: 4, kind: input, shape index: {}]   ;;  %s5688_s5 = inlined_call_operand.vmem [shape: f32[8,1,1], index: 5, kind: output, shape index: {}]  }
   0x1   :  { %5715 = sst [smem:[#allocation34_spill]] %s5684_s1 }
   0x2   :  { %5716 = sst [smem:[#allocation35_spill]] %s5687_s4 }
   0x3   :  { %10 = vsyncpa [#allocation3], 0 }
   0x4   :  { %12 = vsyncpa [#allocation3 + $0x1], 0 }
   0x5   :  { %13 = vsyncpa [#allocation5], 0 }
   0x6   :  { %15 = vsyncpa [#allocation5 + $0x1], 0 }
   0x7   :  { %16 = vsyncpa [#allocation8], 0 }
   0x8   :  { %18 = vsyncpa [#allocation8 + $0x1], 0  ;;  %s3721_s18 = smov 0   ;;  %s3723_s19 = smov 0  }
   0x9   :  { %s3725_s20 = smov 0   ;;  %s3727_s21 = smov 0  }
   0xa LB: > { %5717 = sst [smem:[#allocation14_spill]] %s3676_s20  ;;  %s3740_s22 = sadd.s32 4294967295, %s3680_s21   ;;  %s3680_s21 = sphi %s3727_s21, %s5809_s21   ;;  %s3676_s20 = sphi %s3725_s20, %s5806_s20   ;;  %s3672_s19 = sphi %s3723_s19, %s5808_s19   ;;  %s3668_s18 = sphi %s3721_s18, %s5807_s18  }
   0xb   : > { %s3743_s23 = sadd.s32 1, %s3680_s21   ;;  %s31_s25 = sadd.s32 1, %s3676_s20 }
   0xc   : > { %s28_s24 = ssub.s32 %s3680_s21, %s3743_s23  ;;  %p38_p1 = scmp.ne.s32.totalorder %s3676_s20, %s3672_s19 }
   0xd   : > { %p29_p0 = scmp.eq.s32.totalorder %s28_s24, 0  ;;  %p39_p2 = scmp.eq.s32.totalorder %s3680_s21, 0 }
   0xe   : > { %p44_p3 = scmp.ne.s32.totalorder %s3672_s19, %s3668_s18  ;;  %p45_p5 = scmp.eq.s32.totalorder %s3740_s22, 0 }
   0xf   : > { %s3753_s26 = scalar_select %p29_p0, %s3676_s20, %s31_s25  }
  0x10   : > { %p3755_p4 = por %p39_p2, %p38_p1  ;;  %p3295_p6 = scmp.ge.s32.totalorder %s3680_s21, 1 }
  0x11   : > { %5718 = sst [smem:[#allocation15_spill]] %s3753_s26  ;;  %p180_p7 = scmp.lt.s32.totalorder %s3680_s21, 3 }
  0x12   : > { %p3764_p8 = por %p45_p5, %p44_p3  ;;  %s5722_s4 = sld [smem:[#allocation35_spill]] }
  0x13   : > { %p3768_p9 = pnand %p3295_p6, %p180_p7  ;;  %s3682_s8 = smov [#allocation9]  }
  0x14   : > { %s194_s9 = sshll.u32 %s3682_s8, 4  ;;  %p3383_p12 = scmp.lt.s32.totalorder %s3680_s21, 2  ;;  %s195_s9 = int_to_ptr.vmem [resolvable:$true] %s194_s9 }
  0x15   : > { %p3365_p10 = pneg %p3768_p9  ;;  %s3781_s10 = sand.u32 1, %s3676_s20  }
  0x16   : > { %s5689_s11 = sand.u32 1, %s3680_s21   ;;  %p3786_p13 = pnand %p3383_p12, %p3755_p4 }
  0x17   : > { %p3366_p11 = pnand %p3365_p10, %p45_p5  ;;  %s3302_s13 = sshll.u32 %s3781_s10, 6 }
  0x18   : > { %s192_s7 = sshll.u32 %s5722_s4, 4  ;;  %s3349_s14 = sshll.u32 %s3680_s21, 6  ;;  %s193_s7 = int_to_ptr.hbm [resolvable:$true] %s192_s7 }
  0x19   : > { %3368 = dma.hbm_to_vmem [thread:$0]  (!%p3366_p11), %s193_s7, 128, %s195_s9, [#allocation8]  }
  0x1a   : > { %s5724_s1 = sld [smem:[#allocation34_spill]]  ;;  %s232_s24 = scalar_lea.vmem [#allocation4], %s3302_s13 }
  0x1b   : > { %s241_s25 = sshll.u32 %s232_s24, 4  ;;  %s3797_s27 = scalar_lea.sflag [#allocation5], %s5689_s11  ;;  %s242_s25 = int_to_ptr.vmem [resolvable:$true] %s241_s25 }
  0x1c   : > { %p3518_p1 = pneg %p3786_p13 }
  0x20   : > { %s238_s17 = scalar_lea.hbm %s5724_s1, %s3349_s14  ;;  %s3521_s9 = scalar_lea.hbm %s5724_s1, 128 }
  0x21   : > { %s239_s18 = sshll.u32 %s238_s17, 4  ;;  %s240_s18 = int_to_ptr.hbm [resolvable:$true] %s239_s18 }
  0x22   : > { %s3514_s30 = sshra.s32 %s240_s18, 4  ;;  %s3515_s30 = int_to_ptr.hbm [resolvable:$true] %s3514_s30 }
  0x23   : > { %s3516_s6 = scalar_lea.hbm %s3515_s30, 64  ;;  %p3522_p4 = scmp.lt.s32.totalorder %s3515_s30, %s5724_s1 }
  0x24   : > { %p3517_p0 = scmp.ne.s32.totalorder %s3515_s30, %s3516_s6  ;;  %p3523_p6 = scmp.lt.s32.totalorder %s3521_s9, %s3516_s6 }
  0x26   : > { %p3519_p2 = pnand %p3518_p1, %p3517_p0  ;;  %p3524_p7 = por %p3523_p6, %p3522_p4 }
  0x28   : > { %p3520_p3 = pneg %p3519_p2 }
  0x2a   : > { %p3525_p10 = pnand %p3524_p7, %p3520_p3 }
  0x2c   : > { %3528 = shalt.err (!%p3525_p10)
}
  0x2d   : > { %s3683_s15 = smov 256   ;;  %s3684_s16 = smov 16  }
  0x2e   : > { %3375 = dma.hbm_to_vmem [thread:$0]  (!%p3786_p13), %s240_s18, 1024, %s242_s25, %s3797_s27, %s3683_s15, %s3683_s15, %s3684_s16  }
  0x2f   : > { %s3298_s17 = sshll.u32 %s3781_s10, 5  ;;  %s3347_s24 = sshll.u32 %s3680_s21, 5 }
  0x30   : > { %s215_s30 = scalar_lea.hbm %s5683_s0, %s3347_s24  ;;  %s209_s9 = scalar_lea.vmem [#allocation2], %s3298_s17 }
  0x31   : > { %s216_s6 = sshll.u32 %s215_s30, 4  ;;  %s218_s13 = sshll.u32 %s209_s9, 4  ;;  %s217_s6 = int_to_ptr.hbm [resolvable:$true] %s216_s6  ;;  %s219_s13 = int_to_ptr.vmem [resolvable:$true] %s218_s13 }
  0x32   : > { %s206_s14 = scalar_lea.sflag [#allocation3], %s3781_s10  ;;  %s3544_s11 = sshra.s32 %s217_s6, 4  ;;  %s3545_s11 = int_to_ptr.hbm [resolvable:$true] %s3544_s11 }
  0x33   : > { %s3546_s1 = scalar_lea.hbm %s3545_s11, 32  ;;  %s3551_s15 = scalar_lea.hbm %s5683_s0, 64 }
  0x34   : > { %p3547_p11 = scmp.ne.s32.totalorder %s3545_s11, %s3546_s1  ;;  %p3552_p2 = scmp.lt.s32.totalorder %s3545_s11, %s5683_s0 }
  0x35   : > { %p3553_p3 = scmp.lt.s32.totalorder %s3551_s15, %s3546_s1 }
  0x36   : > { %p3549_p12 = pnand %p3547_p11, %p3518_p1 }
  0x37   : > { %p3554_p4 = por %p3553_p3, %p3552_p2 }
  0x38   : > { %p3550_p0 = pneg %p3549_p12 }
  0x3a   : > { %p3555_p6 = pnand %p3554_p4, %p3550_p0 }
  0x3c   : > { %3558 = shalt.err (!%p3555_p6)
}
  0x3d   : > { %s3685_s8 = smov 128   ;;  %s3686_s30 = smov 8  }
  0x3e   : > { %3372 = dma.hbm_to_vmem [thread:$0]  (!%p3786_p13), %s217_s6, 512, %s219_s13, %s206_s14, %s3685_s8, %s3685_s8, %s3686_s30  }
  0x3f   : > { %s261_s26 = scalar_lea.hbm %s5685_s2, %s3347_s24  ;;  %s255_s25 = scalar_lea.vmem [#allocation6], %s3298_s17 }
  0x40   : > { %s262_s18 = sshll.u32 %s261_s26, 4  ;;  %s264_s20 = sshll.u32 %s255_s25, 4  ;;  %s263_s18 = int_to_ptr.hbm [resolvable:$true] %s262_s18  ;;  %s265_s20 = int_to_ptr.vmem [resolvable:$true] %s264_s20 }
  0x41   : > { %s3574_s11 = sshra.s32 %s263_s18, 4  ;;  %s3581_s6 = scalar_lea.hbm %s5685_s2, 64  ;;  %s3575_s11 = int_to_ptr.hbm [resolvable:$true] %s3574_s11 }
  0x42   : > { %s3576_s1 = scalar_lea.hbm %s3575_s11, 32  ;;  %p3582_p12 = scmp.lt.s32.totalorder %s3575_s11, %s5685_s2 }
  0x43   : > { %p3577_p7 = scmp.ne.s32.totalorder %s3575_s11, %s3576_s1  ;;  %p3583_p0 = scmp.lt.s32.totalorder %s3581_s6, %s3576_s1 }
  0x45   : > { %p3579_p10 = pnand %p3577_p7, %p3518_p1  ;;  %p3584_p2 = por %p3583_p0, %p3582_p12 }
  0x47   : > { %p3580_p11 = pneg %p3579_p10 }
  0x49   : > { %p3585_p3 = pnand %p3584_p2, %p3580_p11 }
  0x4b   : > { %3588 = shalt.err (!%p3585_p3)
}
  0x4c   : > { %3378 = dma.hbm_to_vmem [thread:$0]  (!%p3786_p13), %s263_s18, 512, %s265_s20, %s3797_s27, %s3685_s8, %s3685_s8, %s3686_s30  }
  0x4d   : > { %s3310_s26 = sshll.u32 %s3781_s10, 3  ;;  %s3352_s17 = sshll.u32 %s3680_s21, 3 }
  0x4e   : > { %s283_s7 = scalar_lea.hbm %s5686_s3, %s3352_s17  ;;  %s278_s25 = scalar_lea.vmem [#allocation7], %s3310_s26 }
  0x4f   : > { %s284_s9 = sshll.u32 %s283_s7, 4  ;;  %s286_s11 = sshll.u32 %s278_s25, 4  ;;  %s285_s9 = int_to_ptr.hbm [resolvable:$true] %s284_s9  ;;  %s287_s11 = int_to_ptr.vmem [resolvable:$true] %s286_s11 }
  0x50   : > { %s5725_s1 = sand.u32 1, %s3680_s21   ;;  %s3604_s16 = sshra.s32 %s285_s9, 4  ;;  %s3605_s16 = int_to_ptr.hbm [resolvable:$true] %s3604_s16 }
  0x51   : > { %s275_s15 = scalar_lea.sflag [#allocation8], %s5725_s1  ;;  %s3606_s6 = scalar_lea.hbm %s3605_s16, 8 }
  0x52   : > { %p3607_p4 = scmp.ne.s32.totalorder %s3605_s16, %s3606_s6  ;;  %s3611_s27 = scalar_lea.hbm %s5686_s3, 16 }
  0x53   : > { %p3612_p10 = scmp.lt.s32.totalorder %s3605_s16, %s5686_s3  ;;  %p3613_p11 = scmp.lt.s32.totalorder %s3611_s27, %s3606_s6 }
  0x54   : > { %p3609_p6 = pnand %p3607_p4, %p3518_p1 }
  0x55   : > { %p3614_p12 = por %p3613_p11, %p3612_p10 }
  0x56   : > { %p3610_p7 = pneg %p3609_p6 }
  0x58   : > { %p3615_p0 = pnand %p3614_p12, %p3610_p7 }
  0x5a   : > { %3618 = shalt.err (!%p3615_p0)
}
  0x5b   : > { %s3687_s21 = smov 32   ;;  %s3688_s18 = smov 2  }
  0x5c   : > { %3381 = dma.hbm_to_vmem [thread:$0]  (!%p3786_p13), %s285_s9, 128, %s287_s11, %s275_s15, %s3687_s21, %s3687_s21, %s3688_s18  }
  0x5d   : > { %298 = sbr.rel (%p3768_p9) target bundleno = 1751 (0x6d7), region = 40 }
  0x62   : > { %s300_s13 = sand.u32 1, %s3672_s19  }
  0x63   : > { %s3314_s4 = sshll.u32 %s300_s13, 5  ;;  %s301_s26 = scalar_lea.sflag [#allocation3], %s300_s13 }
  0x64   : > { %s3866_s17 = scalar_lea.vmem [#allocation2], %s3314_s4 }
  0x65   : > { %3651 = dma.done.wait (%p3764_p8), %s301_s26, 512  }
  0x66   : > { %3653 = vsyncadd (%p3764_p8), %s301_s26, 4294966784  ;;  %s310_s24 = sand.u32 1, %s3740_s22   ;;  %s3315_s12 = sshll.u32 %s300_s13, 6 }
  0x67   : > { %s311_s14 = scalar_lea.sflag [#allocation5], %s310_s24  ;;  %s3873_s7 = scalar_lea.vmem [#allocation4], %s3315_s12 }
  0x68   : > { %3655 = dma.done.wait (%p3764_p8), %s311_s14, 1536  }
  0x69   : > { %3657 = vsyncadd (%p3764_p8), %s311_s14, 4294965760  ;;  %s3317_s29 = sshll.u32 %s300_s13, 3  ;;  %s3879_s9 = scalar_lea.vmem [#allocation6], %s3314_s4 }
  0x6a   : > { %s331_s25 = scalar_lea.sflag [#allocation8], %s310_s24  ;;  %s3881_s11 = scalar_lea.vmem [#allocation7], %s3317_s29 }
  0x6b   : > { %3659 = dma.done.wait (%p3764_p8), %s331_s25, 128  }
  0x6c   : > { %3661 = vsyncadd (%p3764_p8), %s331_s25, 4294967168 }
  0x6d   : > { %3663 = dma.done.wait (%p45_p5), [#allocation8], 128  }
  0x6e   : > { %3665 = vsyncadd (%p45_p5), [#allocation8], 4294967168  ;;  %v3892_v0 = vld [vmem:[%s3881_s11] sm:$0x3]  ;;  %v3894_v1 = vld [vmem:[#allocation9] sm:$0xff]  ;;  %v5700_v3 = vmov 0   ;;  %v411_v18 = vlaneseq }
  0x6f   : > { %vm416_vm0 = vcmp.gt.s32.totalorder %v3892_v0, 0  ;;  %3426 = vrcp.f32 %v3894_v1  ;;  %v3899_v2 = vld [vmem:[%s3873_s7] sm:$0xff]  ;;  %vm436_vm1 = vcmask 1040384   ;;  %v3909_v7 = vld [vmem:[%s3873_s7 + $0x8] sm:$0xff]  ;;  %v510_v8 = vand.u32 2147483647, %v3894_v1 }
  0x70   : > { %v3904_v4 = vsel %vm416_vm0, 1, %v5700_v3  ;;  %v939_v9 = vrot.slane %v3899_v2, 4  ;;  %v3914_v10 = vld [vmem:[%s3873_s7 + $0x10] sm:$0xff]  ;;  %v945_v15 = vrot.slane %v3909_v7, 4  ;;  %v3925_v16 = vld [vmem:[%s3873_s7 + $0x18] sm:$0xff]  ;;  %vm506_vm2 = vweird.f32 %v3894_v1  ;;  %v402_v31 = vld [vmem:[%s3879_s9] sm:$0xff] }
  0x71   : > { %v428_v5 = vperm.slane %v3904_v4, 0  ;;  %v429_v6 = vperm.slane %v3904_v4, 1  ;;  %v512_v19 = vand.u32 2147483648, %v3894_v1  ;;  %v951_v20 = vrot.slane %v3914_v10, 4  ;;  %v3937_v26 = vld [vmem:[%s3881_s11 + $0x2] sm:$0x3] }
  0x72   : > { %v940_v14 = vmax.f32 %v3899_v2, %v939_v9  ;;  %vm3931_vm3 = vcmp.eq.f32.partialorder %v510_v8, 8.507059e+37  ;;  %v946_v25 = vmax.f32 %v3909_v7, %v945_v15  ;;  %v957_v28 = vrot.slane %v3925_v16, 4  ;;  %s3319_s28 = sshll.u32 %s3740_s22, 2 }
  0x73   : > { %v437_v11 = vsel %vm436_vm1, %v428_v5, 0  ;;  %v438_v12 = vsel %vm436_vm1, %v429_v6, 0  ;;  %v952_v27 = vmax.f32 %v3914_v10, %v951_v20  ;;  %vm417_vm5 = vcmp.gt.s32.totalorder %v3937_v26, 0  ;;  %v3996_v20 = vld [vmem:[%s3866_s17] sm:$0xff]  ;;  %p386_p5 = scmp.lt.s32.totalorder %s3319_s28, 7 }
  0x74   : > { %v439_v13 = vadd.s32 %v438_v12, %v437_v11  ;;  %v941_v24 = vrot.slane %v940_v14, 2  ;;  %v516_v33 = vsub.f32 %v402_v31, %v3894_v1  ;;  %v947_v34 = vrot.slane %v946_v25, 2 }
  0x75   : > { %v3427_v17 = vpop.eup %3426  ;;  %v3947_v35 = vsel %vm417_vm5, 1, %v5700_v3  ;;  %v953_v36 = vrot.slane %v952_v27, 2  ;;  %v513_v42 = vor.u32 1.1754944e-38, %v512_v19  ;;  %v958_v45 = vmax.f32 %v3925_v16, %v957_v28  ;;  %s5811_s28 = smov (!%p386_p5, %s3319_s28), 7 }
  0x76   : > { %v441_v21 = vshrl.u32 %v439_v13, 16  ;;  %v502_v22 = vmul.f32 %v3427_v17, %v3894_v1  ;;  %vm507_vm4 = vweird.f32 %v3427_v17  ;;  %v942_v32 = vmax.f32 %v940_v14, %v941_v24  ;;  %s5650_s15 = scalar_lea.vmem %s5688_s5, %s5811_s28 }
  0x77   : > { %v430_v39 = vperm.slane %v3947_v35, 0  ;;  %v431_v40 = vperm.slane %v3947_v35, 1  ;;  %vm3954_vm6 = vmor %vm506_vm2, %vm507_vm4  ;;  %v948_v43 = vmax.f32 %v946_v25, %v947_v34  ;;  %v440_v44 = vand.u32 65535, %v439_v13 }
  0x78   : > { %v443_v29 = vcvt.s32.f32 %v441_v21  ;;  %v503_v30 = vsub.f32 1.0, %v502_v22  ;;  %v943_v38 = vrot.slane %v942_v32, 1  ;;  %v3967_v50 = vshrl.u32 %v411_v18, 7 }
  0x79   : > { %v452_v48 = vsel %vm436_vm1, %v430_v39, 0  ;;  %v453_v49 = vsel %vm436_vm1, %v431_v40, 0  ;;  %v949_v51 = vrot.slane %v948_v43, 1  ;;  %v442_v52 = vcvt.s32.f32 %v440_v44 }
  0x7a   : > { %v504_v37 = vmul.f32 %v3427_v17, %v503_v30  ;;  %446 = vadd.xlane.f32.xlu0 %v443_v29  ;;  %v3959_v47 = vmax.f32 %v942_v32, %v943_v38  ;;  %v3969_v53 = vadd.s32 %v453_v49, %v452_v48  ;;  %v1118_v55 = vperm.slane %v3892_v0, 1 }
  0x7b   : > { %v954_v57 = vmax.f32 %v952_v27, %v953_v36  ;;  %v3980_v59 = vmax.f32 %v948_v43, %v949_v51  ;;  %444 = vadd.xlane.f32.xlu1 %v442_v52  ;;  %v959_v61 = vrot.slane %v958_v45, 2  ;;  %v520_v63 = vmul.f32 10.0, %v516_v33  ;;  %v4035_v52 = vld [vmem:[%s3881_s11 + $0x4] sm:$0x3] }
  0x7c   : > { %v505_v46 = vadd.f32 %v3427_v17, %v504_v37  ;;  %v987_v56 = vsub.f32 %v3899_v2, %v3959_v47  ;;  %v456_v60 = vshrl.u32 %v3969_v53, 16  ;;  %vm1126_vm7 = vcmp.eq.s32.totalorder %v3967_v50, %v1118_v55 }
  0x7d   : > { %v988_v11 = vsub.f32 %v3909_v7, %v3980_v59  ;;  %v955_v15 = vrot.slane %v954_v57, 1  ;;  %v3993_v19 = vand.u32 127, %v411_v18  ;;  %v960_v22 = vmax.f32 %v958_v45, %v959_v61 }
  0x7e   : > { %v509_v54 = vsel %vm3954_vm6, %v3427_v17, %v505_v46  ;;  %v995_v9 = vpack.c.bf16 %v987_v56, %v987_v56  ;;  %v458_v12 = vcvt.s32.f32 %v456_v60  ;;  %v3991_v17 = vld [vmem:[%s3873_s7 + $0x20] sm:$0xff]  ;;  %v1117_v23 = vperm.slane %v3892_v0, 0 }
  0x7f   : > { %v3978_v58 = vsel %vm3931_vm3, %v513_v42, %v509_v54  ;;  %v996_v21 = vpack.c.bf16 %v988_v11, %v988_v11  ;;  %v4000_v27 = vmax.f32 %v954_v57, %v955_v15  ;;  %v1134_v29 = vsel %vm1126_vm7, %v3909_v7, 0.0 }
  0x80   : > { %v525_v62 = vrot.slane %v3978_v58, 6  ;;  %v532_v8 = vmul.f32 %v3978_v58, %v402_v31  ;;  %v1003_v14 = vunpack.c.l.bf16 %v995_v9  ;;  %v961_v30 = vrot.slane %v960_v22, 1 }
  0x81   : > { %v1004_v28 = vunpack.c.l.bf16 %v996_v21  ;;  %v963_v31 = vrot.slane %v3991_v17, 4  ;;  %vm4006_vm8 = vcmp.eq.s32.totalorder %v428_v5, 1  ;;  %v989_v33 = vsub.f32 %v3914_v10, %v4000_v27 }
  0x82   : > { %v3987_v13 = vrot.slane %v525_v62, 4  ;;  %548 = vst [vmem:[#allocation1] ss:$2 sm:$0xff] %v532_v8  ;;  %461 = vadd.xlane.f32.xlu0 %v458_v12  ;;  %v1011_v25 = vmul.f32 1.442695, %v1003_v14  ;;  %vm4015_vm9 = vcmp.eq.s32.totalorder %v429_v6, 1  ;;  %v4020_v5 = vmax.f32 %v960_v22, %v961_v30 }
  0x83   : > { %v1013_v7 = vmul.f32 1.442695, %v1004_v28  ;;  %v1120_v36 = vperm.slane %v3937_v26, 1  ;;  %v1147_v41 = vrot.slane %v1134_v29, 4  ;;  %v997_v42 = vpack.c.bf16 %v989_v33, %v989_v33  ;;  %v4065_v30 = vld [vmem:[%s3873_s7 + $0x28] sm:$0xff] }
  0x84   : > { %v528_v24 = vmul.f32 %v3987_v13, %v520_v63  ;;  %3428 = vpow2.f32 %v1011_v25  ;;  %vm4023_vm10 = vcmp.eq.s32.totalorder %v3967_v50, %v1117_v23  ;;  %v990_v44 = vsub.f32 %v3925_v16, %v4020_v5 }
  0x85   : > { %3430 = vpow2.f32 %v1013_v7  ;;  %v964_v45 = vmax.f32 %v3991_v17, %v963_v31  ;;  %v1119_v55 = vperm.slane %v3937_v26, 0  ;;  %v1005_v57 = vunpack.c.l.bf16 %v997_v42 }
  0x86   : > { %v611_v32 = vsub.f32 %v3996_v20, %v528_v24  ;;  %v998_v56 = vpack.c.bf16 %v990_v44, %v990_v44  ;;  %v1133_v63 = vsel %vm4023_vm10, %v3899_v2, 0.0  ;;  %v1148_v8 = vadd.f32 %v1147_v41, %v1134_v29 }
  0x87   : > { %vm418_vm12 = vcmp.gt.s32.totalorder %v4035_v52, 0  ;;  %vm4049_vm13 = vcmp.eq.s32.totalorder %v3967_v50, %v1120_v36  ;;  %v1015_v15 = vmul.f32 1.442695, %v1005_v57  ;;  %v1141_v22 = vrot.slane %v1133_v63, 4 }
  0x88   : > { %v615_v37 = vand.u32 2147483647, %v611_v32  ;;  %v623_v38 = vmul.f32 0.5, %v611_v32  ;;  %v1006_v14 = vunpack.c.l.bf16 %v998_v56  ;;  %vm4054_vm14 = vcmp.eq.s32.totalorder %v3967_v50, %v1119_v55 }
  0x89   : > { %v549_v4 = vld.sshfl [vmem:[#allocation1] sm:$0xff pattern:$0x75316420]  ;;  %v550_v6 = vld.sshfl [vmem:[#allocation1 + $0x8] sm:$0xff pattern:$0x75316420]  ;;  %v1142_v44 = vadd.f32 %v1141_v22, %v1133_v63 }
  0x8a   : > { %v563_v46 = vrot.slane %v549_v4, 2  ;;  %v564_v48 = vrot.slane %v550_v6, 2  ;;  %vm4030_vm11 = vcmp.lt.f32.partialorder %v615_v37, 1.0  ;;  %v627_v51 = vmul.f32 %v623_v38, %v611_v32  ;;  %v3429_v60 = vpop.eup %3428 }
  0x8b   : > { %v3324_v54 = vadd.f32 -0.5, %v615_v37  ;;  %v1027_v11 = vpack.c.bf16 %v3429_v60, %v3429_v60  ;;  %v3431_v21 = vpop.eup %3430  ;;  %v455_v24 = vand.u32 65535, %v3969_v53  ;;  %v1017_v28 = vmul.f32 1.442695, %v1006_v14  ;;  %v403_v14 = vld [vmem:[%s3879_s9 + $0x8] sm:$0xff] }
  0x8c   : > { %v579_v61 = vsel %vm4006_vm8, %v563_v46, 1.0  ;;  %v580_v62 = vsel %vm4015_vm9, %v564_v48, 1.0  ;;  %v1028_v25 = vpack.c.bf16 %v3431_v21, %v3431_v21  ;;  %v4062_v29 = vsel %vm418_vm12, 1, %v5700_v3 }
  0x8d   : > { %3432 = vlog2.f32 %v579_v61  ;;  %v635_v9 = vsel %vm4030_vm11, %v627_v51, %v3324_v54  ;;  %v1035_v2 = vunpack.c.l.bf16 %v1027_v11  ;;  %v1149_v18 = vrot.slane %v1148_v8, 2 }
  0x8e   : > { %3434 = vlog2.f32 %v580_v62  ;;  %643 = vst [vmem:[#allocation1] ss:$2 sm:$0xff] %v635_v9  ;;  %v457_v32 = vcvt.s32.f32 %v455_v24  ;;  %v965_v33 = vrot.slane %v964_v45, 2  ;;  %vm735_vm15 = vcmask 1043456  }
  0x8f   : > { %3436 = vpow2.f32 %v1015_v15  ;;  %v1043_v31 = vrot.slane %v1035_v2, 4  ;;  %v1036_v34 = vunpack.c.l.bf16 %v1028_v25  ;;  %v432_v7 = vperm.slane %v4062_v29, 0 }
  0x90   : > { %3438 = vpow2.f32 %v1017_v28  ;;  %v433_v53 = vperm.slane %v4062_v29, 1  ;;  %v4070_v37 = vadd.s32 128, %v3993_v19  ;;  %v1135_v41 = vsel %vm4054_vm14, %v3914_v10, 0.0  ;;  %459 = vadd.xlane.f32.xlu2 %v457_v32 }
  0x91   : > { %v1044_v38 = vadd.f32 %v1043_v31, %v1035_v2  ;;  %v969_v42 = vrot.slane %v4065_v30, 4  ;;  %v1049_v6 = vrot.slane %v1036_v34, 4  ;;  %v1136_v46 = vsel %vm4049_vm13, %v3925_v16, 0.0 }
  0x92   : > { %v467_v51 = vsel %vm436_vm1, %v432_v7, 0  ;;  %v468_v10 = vsel %vm436_vm1, %v433_v53, 0  ;;  %v1150_v56 = vadd.f32 %v1149_v18, %v1148_v8  ;;  %v1153_v57 = vrot.slane %v1135_v41, 4 }
  0x93   : > { %v3433_v36 = vpop.eup %3432  ;;  %v1045_v49 = vrot.slane %v1044_v38, 2  ;;  %v1050_v55 = vadd.f32 %v1049_v6, %v1036_v34  ;;  %v4085_v60 = vmax.f32 %v964_v45, %v965_v33  ;;  %v1143_v12 = vrot.slane %v1142_v44, 2 }
  0x94   : > { %v3435_v43 = vpop.eup %3434  ;;  %v588_v4 = vmul.f32 0.6931472, %v3433_v36  ;;  %v1159_v15 = vrot.slane %v1136_v46, 4  ;;  %v4088_v21 = vadd.s32 %v468_v10, %v467_v51  ;;  %v517_v23 = vsub.f32 %v403_v14, %v3894_v1 }
  0x95   : > { %v590_v48 = vmul.f32 0.6931472, %v3435_v43  ;;  %v3437_v54 = vpop.eup %3436  ;;  %v1046_v16 = vadd.f32 %v1045_v49, %v1044_v38  ;;  %v1051_v11 = vrot.slane %v1050_v55, 2  ;;  %v533_v8 = vmul.f32 %v3978_v58, %v403_v14  ;;  %v4094_v38 = vld [vmem:[%s3866_s17 + $0x8] sm:$0xff] }
  0x96   : > { %v603_v61 = vmul.f32 5.0, %v588_v4  ;;  %v1029_v63 = vpack.c.bf16 %v3437_v54, %v3437_v54  ;;  %v3439_v9 = vpop.eup %3438  ;;  %v1151_v24 = vrot.slane %v1150_v56, 1  ;;  %v521_v32 = vmul.f32 10.0, %v517_v23 }
  0x97   : > { %v604_v62 = vmul.f32 5.0, %v590_v48  ;;  %v1047_v22 = vrot.slane %v1046_v16, 1  ;;  %v1052_v45 = vadd.f32 %v1051_v11, %v1050_v55  ;;  %v1030_v25 = vpack.c.bf16 %v3439_v9, %v3439_v9  ;;  %552 = vst [vmem:[#allocation1 + $0x10] ss:$2 sm:$0xff] %v533_v8 }
  0x98   : > { %v1037_v28 = vunpack.c.l.bf16 %v1029_v63  ;;  %v1154_v33 = vadd.f32 %v1153_v57, %v1135_v41  ;;  %v529_v6 = vmul.f32 %v3987_v13, %v521_v32  ;;  %v1160_v48 = vadd.f32 %v1159_v15, %v1136_v46 }
  0x99   : > { %v731_v2 = vrot.slane %v604_v62, 4  ;;  %v1048_v18 = vadd.f32 %v1047_v22, %v1046_v16  ;;  %v1053_v36 = vrot.slane %v1052_v45, 1  ;;  %v1038_v43 = vunpack.c.l.bf16 %v1030_v25 }
  0x9a   : > { %v1055_v4 = vrot.slane %v1037_v28, 4  ;;  %v471_v49 = vshrl.u32 %v4088_v21, 16  ;;  %v967_v51 = vrot.slane %v4085_v60, 1  ;;  %v1144_v41 = vadd.f32 %v1143_v12, %v1142_v44 }
  0x9b   : > { %v736_v31 = vsel %vm735_vm15, %v603_v61, %v731_v2  ;;  %v1054_v54 = vadd.f32 %v1053_v36, %v1052_v45  ;;  %v1061_v61 = vrot.slane %v1038_v43, 4  ;;  %3440 = vlog2.f32 %v1048_v18  ;;  %v404_v18 = vld [vmem:[%s3879_s9 + $0x10] sm:$0xff] }
  0x9c   : > { %v740_v34 = vrot.slane %v736_v31, 6  ;;  %v1056_v55 = vadd.f32 %v1055_v4, %v1037_v28  ;;  %v612_v57 = vsub.f32 %v4094_v38, %v529_v6  ;;  %v473_v62 = vcvt.s32.f32 %v471_v49 }
  0x9d   : > { %3442 = vlog2.f32 %v1054_v54  ;;  %v4103_v16 = vadd.f32 %v1151_v24, %v1150_v56  ;;  %v1155_v46 = vrot.slane %v1154_v33, 2  ;;  %v1062_v14 = vadd.f32 %v1061_v61, %v1038_v43 }
  0x9e   : > { %v4100_v10 = vsub.f32 %v3996_v20, %v740_v34  ;;  %v1057_v63 = vrot.slane %v1056_v55, 2  ;;  %v616_v9 = vand.u32 2147483647, %v612_v57  ;;  %v624_v11 = vmul.f32 0.5, %v612_v57  ;;  %476 = vadd.xlane.f32.xlu1 %v473_v62 }
  0x9f   : > { %v970_v20 = vmax.f32 %v4065_v30, %v969_v42  ;;  %vm538_vm2 = vcmp.eq.s32.totalorder %v430_v39, 1  ;;  %vm4112_vm3 = vcmp.eq.s32.totalorder %v431_v40, 1  ;;  %v553_v56 = vld.sshfl [vmem:[#allocation1 + $0x10] sm:$0xff pattern:$0x75316420]  ;;  %v1161_v15 = vrot.slane %v1160_v48, 2 }
  0xa0   : > { %v1058_v12 = vadd.f32 %v1057_v63, %v1056_v55  ;;  %v554_v2 = vld.sshfl [vmem:[#allocation1 + $0x18] sm:$0xff pattern:$0x75316420]  ;;  %v565_v22 = vrot.slane %v553_v56, 2  ;;  %vm4116_vm4 = vcmp.lt.f32.partialorder %v616_v9, 1.0  ;;  %v628_v42 = vmul.f32 %v624_v11, %v612_v57 }
  0xa1   : > { %v3325_v8 = vadd.f32 -0.5, %v616_v9  ;;  %v1145_v45 = vrot.slane %v1144_v41, 1  ;;  %v566_v39 = vrot.slane %v554_v2, 2  ;;  %v4121_v35 = vmax.f32 %v4085_v60, %v967_v51  ;;  %v3441_v40 = vpop.eup %3440  ;;  %v4136_v11 = vld [vmem:[%s3866_s17 + $0x10] sm:$0xff]  ;;  %v4139_v56 = vld [vmem:[%s3881_s11 + $0x6] sm:$0x3] }
  0xa2   : > { %v1059_v24 = vrot.slane %v1058_v12, 1  ;;  %v581_v25 = vsel %vm538_vm2, %v565_v22, 1.0  ;;  %v1063_v31 = vrot.slane %v1062_v14, 2  ;;  %v971_v32 = vrot.slane %v970_v20, 2  ;;  %5746 = vst [vmem:[#allocation16_spill] sm:$0xff] %v4139_v56 }
  0xa3   : > { %v636_v28 = vsel %vm4116_vm4, %v628_v42, %v3325_v8  ;;  %v3443_v34 = vpop.eup %3442  ;;  %v582_v36 = vsel %vm4112_vm3, %v566_v39, 1.0  ;;  %3444 = vlog2.f32 %v581_v25  ;;  %v1156_v4 = vadd.f32 %v1155_v46, %v1154_v33 }
  0xa4   : > { %647 = vst [vmem:[#allocation1 + $0x10] ss:$2 sm:$0xff] %v636_v28  ;;  %v1060_v43 = vadd.f32 %v1059_v24, %v1058_v12  ;;  %v1094_v6 = vmul.f32 0.6931472, %v3443_v34  ;;  %3446 = vlog2.f32 %v582_v36  ;;  %v1064_v60 = vadd.f32 %v1063_v31, %v1062_v14 }
  0xa5   : > { %v1162_v49 = vadd.f32 %v1161_v15, %v1160_v48  ;;  %v1092_v51 = vmul.f32 0.6931472, %v3441_v40  ;;  %v518_v54 = vsub.f32 %v404_v18, %v3894_v1  ;;  %v534_v55 = vmul.f32 %v3978_v58, %v404_v18 }
  0xa6   : > { %3448 = vlog2.f32 %v1060_v43  ;;  %v1108_v61 = vadd.f32 %v1094_v6, %v3980_v59  ;;  %v1065_v57 = vrot.slane %v1064_v60, 1  ;;  %v972_v62 = vmax.f32 %v970_v20, %v971_v32 }
  0xa7   : > { %v991_v63 = vsub.f32 %v3991_v17, %v4121_v35  ;;  %vm415_vm6 = vcmp.lt.s32.totalorder %v4070_v37, 200  ;;  %v1146_v33 = vadd.f32 %v1145_v45, %v1144_v41  ;;  %v522_v46 = vmul.f32 10.0, %v518_v54  ;;  %556 = vst [vmem:[#allocation1 + $0x20] ss:$2 sm:$0xff] %v534_v55 }
  0xa8   : > { %v1190_v48 = vsub.f32 %v1108_v61, %v4103_v16  ;;  %v1066_v9 = vadd.f32 %v1065_v57, %v1064_v60  ;;  %v973_v14 = vrot.slane %v972_v62, 1  ;;  %v1157_v12 = vrot.slane %v1156_v4, 1 }
  0xa9   : > { %v999_v44 = vpack.c.bf16 %v991_v63, %v991_v63  ;;  %v3445_v59 = vpop.eup %3444  ;;  %v1163_v20 = vrot.slane %v1162_v49, 1  ;;  %v1121_v15 = vperm.slane %v4035_v52, 0  ;;  %v530_v2 = vmul.f32 %v3987_v13, %v522_v46 }
  0xaa   : > { %v3447_v22 = vpop.eup %3446  ;;  %v1107_v41 = vadd.f32 %v1092_v51, %v3959_v47  ;;  %v592_v23 = vmul.f32 0.6931472, %v3445_v59  ;;  %3450 = vlog2.f32 %v1066_v9  ;;  %v4144_v16 = vmax.f32 %v972_v62, %v973_v14 }
  0xab   : > { %v4148_v8 = vsel %vm415_vm6, %v1190_v48, 0.0  ;;  %v594_v45 = vmul.f32 0.6931472, %v3447_v22  ;;  %v613_v39 = vsub.f32 %v4136_v11, %v530_v2  ;;  %vm419_vm7 = vcmp.gt.s32.totalorder %v4139_v56, 0 }
  0xac   : > { %v3449_v42 = vpop.eup %3448  ;;  %5747 = vst [vmem:[#allocation17_spill] sm:$0xff] %v4148_v8  ;;  %vm4154_vm8 = vcmp.eq.s32.totalorder %v432_v7, 1  ;;  %v1122_v47 = vperm.slane %v4035_v52, 1  ;;  %v992_v40 = vsub.f32 %v4065_v30, %v4144_v16  ;;  %v1007_v25 = vunpack.c.l.bf16 %v999_v44 }
  0xad   : > { %v605_v28 = vmul.f32 5.0, %v592_v23  ;;  %v606_v31 = vmul.f32 5.0, %v594_v45  ;;  %v617_v18 = vand.u32 2147483647, %v613_v39  ;;  %v625_v32 = vmul.f32 0.5, %v613_v39 }
  0xae   : > { %v1213_v34 = vrot.slane %v4148_v8, 7  ;;  %v1158_v36 = vadd.f32 %v1157_v12, %v1156_v4  ;;  %vm4164_vm9 = vcmp.eq.s32.totalorder %v433_v53, 1  ;;  %v557_v43 = vld.sshfl [vmem:[#allocation1 + $0x20] sm:$0xff pattern:$0x75316420]  ;;  %v4171_v6 = vsel %vm419_vm7, 1, %v5700_v3 }
  0xaf   : > { %v4173_v60 = vsub.f32 %v1107_v41, %v1146_v33  ;;  %v732_v51 = vrot.slane %v606_v31, 4  ;;  %v1096_v54 = vmul.f32 0.6931472, %v3449_v42  ;;  %v1164_v55 = vadd.f32 %v1163_v20, %v1162_v49  ;;  %v558_v61 = vld.sshfl [vmem:[#allocation1 + $0x28] sm:$0xff pattern:$0x75316420] }
  0xb0   : > { %v3451_v57 = vpop.eup %3450  ;;  %v567_v4 = vrot.slane %v557_v43, 2  ;;  %v568_v62 = vrot.slane %v558_v61, 2  ;;  %v629_v29 = vmul.f32 %v625_v32, %v613_v39  ;;  %v1000_v53 = vpack.c.bf16 %v992_v40, %v992_v40  ;;  %v4211_v31 = vld [vmem:[%s3873_s7 + $0x38] sm:$0xff] }
  0xb1   : > { %5752 = vst [vmem:[#allocation18_spill] sm:$0xff] %v4173_v60  ;;  %v737_v63 = vsel %vm735_vm15, %v605_v28, %v732_v51  ;;  %v1098_v46 = vmul.f32 0.6931472, %v3451_v57  ;;  %vm4176_vm10 = vcmp.lt.f32.partialorder %v617_v18, 1.0  ;;  %v1019_v9 = vmul.f32 1.442695, %v1007_v25 }
  0xb2   : > { %v741_v14 = vrot.slane %v737_v63, 6  ;;  %v583_v33 = vsel %vm4154_vm8, %v567_v4, 1.0  ;;  %v584_v49 = vsel %vm4164_vm9, %v568_v62, 1.0  ;;  %v3326_v44 = vadd.f32 -0.5, %v617_v18  ;;  %v4208_v28 = vld [vmem:[%s3873_s7 + $0x30] sm:$0xff] }
  0xb3   : > { %v1217_v59 = vsel %vm436_vm1, %v4173_v60, %v1213_v34  ;;  %v1109_v12 = vadd.f32 %v1096_v54, %v4000_v27  ;;  %v1110_v20 = vadd.f32 %v1098_v46, %v4020_v5  ;;  %3452 = vlog2.f32 %v583_v33 }
  0xb4   : > { %v4189_v2 = vsub.f32 %v4094_v38, %v741_v14  ;;  %3454 = vlog2.f32 %v584_v49  ;;  %v637_v22 = vsel %vm4176_vm10, %v629_v29, %v3326_v44  ;;  %v1008_v41 = vunpack.c.l.bf16 %v1000_v53 }
  0xb5   : > { %v1192_v23 = vsub.f32 %v1110_v20, %v1164_v55  ;;  %vm1129_vm11 = vcmp.eq.s32.totalorder %v3967_v50, %v1121_v15  ;;  %651 = vst [vmem:[#allocation1 + $0x20] ss:$2 sm:$0xff] %v637_v22  ;;  %3456 = vpow2.f32 %v1019_v9  ;;  %v1225_v27 = vsel %vm416_vm0, 0.0, %v1217_v59 }
  0xb6   : > { %v1021_v5 = vmul.f32 1.442695, %v1008_v41  ;;  %v434_v42 = vperm.slane %v4171_v6, 0  ;;  %vm1130_vm13 = vcmp.eq.s32.totalorder %v3967_v50, %v1122_v47  ;;  %v435_v45 = vperm.slane %v4171_v6, 1 }
  0xb7   : > { %v4199_v38 = vsel %vm415_vm6, %v1192_v23, 0.0  ;;  %v4203_v39 = vsub.f32 %v1109_v12, %v1158_v36  ;;  %v1137_v24 = vsel %vm1129_vm11, %v3991_v17, 0.0  ;;  %v1233_v25 = vperm.slane %v1225_v27, 0 }
  0xb8   : > { %5755 = vst [vmem:[#allocation19_spill] sm:$0xff] %v4199_v38  ;;  %v1214_v15 = vrot.slane %v4199_v38, 7  ;;  %3458 = vpow2.f32 %v1021_v5  ;;  %v1138_v34 = vsel %vm1130_vm13, %v4065_v30, 0.0  ;;  %v482_v47 = vsel %vm436_vm1, %v434_v42, 0 }
  0xb9   : > { %5756 = vst [vmem:[#allocation20_spill] sm:$0xff] %v4203_v39  ;;  %v3453_v40 = vpop.eup %3452  ;;  %v483_v36 = vsel %vm436_vm1, %v435_v45, 0  ;;  %v1165_v43 = vrot.slane %v1137_v24, 4  ;;  %v975_v55 = vrot.slane %v4208_v28, 4  ;;  %v981_v61 = vrot.slane %v4211_v31, 4 }
  0xba   : > { %v3455_v18 = vpop.eup %3454  ;;  %v596_v32 = vmul.f32 0.6931472, %v3453_v40  ;;  %v1218_v51 = vsel %vm436_vm1, %v4203_v39, %v1214_v15  ;;  %v1171_v4 = vrot.slane %v1138_v34, 4  ;;  %v484_v62 = vadd.s32 %v483_v36, %v482_v47 }
  0xbb   : > { %v3457_v17 = vpop.eup %3456  ;;  %v598_v7 = vmul.f32 0.6931472, %v3455_v18  ;;  %v4225_v29 = vsub.s32 255, %v3993_v19  ;;  %v1234_v53 = vperm.slane %v1225_v27, 1  ;;  %v1241_v63 = vand.u32 4294967040, %v1233_v25 }
  0xbc   : > { %v1031_v54 = vpack.c.bf16 %v3457_v17, %v3457_v17  ;;  %v607_v30 = vmul.f32 5.0, %v596_v32  ;;  %v1226_v9 = vsel %vm417_vm5, 0.0, %v1218_v51  ;;  %v1166_v33 = vadd.f32 %v1165_v43, %v1137_v24 }
  0xbd   : > { %v608_v57 = vmul.f32 5.0, %v598_v7  ;;  %v486_v49 = vshrl.u32 %v484_v62, 16  ;;  %v976_v12 = vmax.f32 %v4208_v28, %v975_v55  ;;  %v982_v20 = vmax.f32 %v4211_v31, %v981_v61 }
  0xbe   : > { %v1039_v46 = vunpack.c.l.bf16 %v1031_v54  ;;  %v3459_v48 = vpop.eup %3458  ;;  %v4232_v22 = vsub.s32 255, %v4070_v37  ;;  %v1172_v41 = vadd.f32 %v1171_v4, %v1138_v34  ;;  %v1242_v27 = vand.u32 4294967040, %v1234_v53 }
  0xbf   : > { %v733_v14 = vrot.slane %v608_v57, 4  ;;  %v1032_v44 = vpack.c.bf16 %v3459_v48, %v3459_v48  ;;  %v488_v23 = vcvt.s32.f32 %v486_v49  ;;  %v1235_v5 = vperm.slane %v1226_v9, 0 }
  0xc0   : > { %v1067_v59 = vrot.slane %v1039_v46, 4  ;;  %v4236_v24 = vor.u32 %v4225_v29, %v1241_v63  ;;  %v1236_v25 = vperm.slane %v1226_v9, 1  ;;  %v1167_v32 = vrot.slane %v1166_v33, 2 }
  0xc1   : > { %v738_v19 = vsel %vm735_vm15, %v607_v30, %v733_v14  ;;  %v1040_v40 = vunpack.c.l.bf16 %v1032_v44  ;;  %491 = vadd.xlane.f32.xlu2 %v488_v23  ;;  %v977_v17 = vrot.slane %v976_v12, 2  ;;  %v983_v7 = vrot.slane %v982_v20, 2  ;;  %v405_v14 = vld [vmem:[%s3879_s9 + $0x18] sm:$0xff] }
  0xc2   : > { %v742_v15 = vrot.slane %v738_v19, 6  ;;  %v1068_v18 = vadd.f32 %v1067_v59, %v1039_v46  ;;  %v1173_v43 = vrot.slane %v1172_v41, 2  ;;  %v470_v51 = vand.u32 65535, %v4088_v21 }
  0xc3   : > { %v1073_v36 = vrot.slane %v1040_v40, 4  ;;  %v485_v54 = vand.u32 65535, %v484_v62  ;;  %v1243_v55 = vand.u32 4294967040, %v1235_v5  ;;  %v978_v30 = vmax.f32 %v976_v12, %v977_v17 }
  0xc4   : > { %v4239_v47 = vsub.f32 %v4136_v11, %v742_v15  ;;  %v1069_v34 = vrot.slane %v1068_v18, 2  ;;  %v984_v4 = vmax.f32 %v982_v20, %v983_v7  ;;  %v472_v53 = vcvt.s32.f32 %v470_v51 }
  0xc5   : > { %v1074_v61 = vadd.f32 %v1073_v36, %v1040_v40  ;;  %v487_v63 = vcvt.s32.f32 %v485_v54  ;;  %v4243_v46 = vor.u32 %v4232_v22, %v1242_v27  ;;  %v4246_v11 = vperm.slane %v4236_v24, 0  ;;  %v4264_v40 = vld [vmem:[%s3866_s17 + $0x18] sm:$0xff] }
  0xc6   : > { %v1070_v57 = vadd.f32 %v1069_v34, %v1068_v18  ;;  %v1244_v48 = vand.u32 4294967040, %v1236_v25  ;;  %v1168_v44 = vadd.f32 %v1167_v32, %v1166_v33  ;;  %v4249_v21 = vadd.f32 %v1173_v43, %v1172_v41  ;;  %474 = vadd.xlane.f32.xlu0 %v472_v53 }
  0xc7   : > { %v1075_v9 = vrot.slane %v1074_v61, 2  ;;  %v519_v62 = vsub.f32 %v405_v14, %v3894_v1  ;;  %489 = vadd.xlane.f32.xlu1 %v487_v63  ;;  %v4253_v59 = vor.u32 %v4225_v29, %v1243_v55  ;;  %v535_v20 = vmul.f32 %v3978_v58, %v405_v14 }
  0xc8   : > { %v1071_v49 = vrot.slane %v1070_v57, 1  ;;  %v979_v19 = vrot.slane %v978_v30, 1  ;;  %v1124_v27 = vperm.slane %v4139_v56, 1  ;;  %v985_v15 = vrot.slane %v984_v4, 1 }
  0xc9   : > { %v1076_v12 = vadd.f32 %v1075_v9, %v1074_v61  ;;  %v523_v5 = vmul.f32 10.0, %v519_v62  ;;  %v4258_v33 = vperm.slane %v4243_v46, 0  ;;  %v4261_v41 = vor.u32 %v4232_v22, %v1244_v48  ;;  %560 = vst [vmem:[#allocation1 + $0x30] ss:$2 sm:$0xff] %v535_v20 }
  0xca   : > { %v1072_v23 = vadd.f32 %v1071_v49, %v1070_v57  ;;  %v4266_v25 = vmax.f32 %v978_v30, %v979_v19  ;;  %v1123_v58 = vperm.slane %v4139_v56, 0  ;;  %v4270_v32 = vmax.f32 %v984_v4, %v985_v15 }
  0xcb   : > { %5757 = vst [vmem:[#allocation21_spill] sm:$0xff] %v4261_v41  ;;  %v1077_v1 = vrot.slane %v1076_v12, 1  ;;  %v531_v18 = vmul.f32 %v3987_v13, %v523_v5  ;;  %v1169_v17 = vrot.slane %v1168_v44, 1  ;;  %v1175_v7 = vrot.slane %v4249_v21, 1 }
  0xcc   : > { %3460 = vlog2.f32 %v1072_v23  ;;  %v993_v34 = vsub.f32 %v4208_v28, %v4266_v25  ;;  %v4276_v43 = vperm.slane %v4253_v59, 0  ;;  %vm1132_vm14 = vcmp.eq.s32.totalorder %v3967_v50, %v1124_v27 }
  0xcd   : > { %v1078_v36 = vadd.f32 %v1077_v1, %v1076_v12  ;;  %v614_v51 = vsub.f32 %v4264_v40, %v531_v18  ;;  %v994_v54 = vsub.f32 %v4211_v31, %v4270_v32  ;;  %v4283_v13 = vperm.slane %v4261_v41, 0 }
  0xce   : > { %v1001_v55 = vpack.c.bf16 %v993_v34, %v993_v34  ;;  %v4286_v61 = vadd.s32 8, %v3967_v50  ;;  %v4289_v53 = vmul.u32 268435456, %v3967_v50  ;;  %vm4293_vm2 = vcmp.eq.s32.totalorder %v434_v42, 1 }
  0xcf   : > { %3462 = vlog2.f32 %v1078_v36  ;;  %v618_v30 = vand.u32 2147483647, %v614_v51  ;;  %v626_v57 = vmul.f32 0.5, %v614_v51  ;;  %v1002_v4 = vpack.c.bf16 %v994_v54, %v994_v54 }
  0xd0   : > { %vm4299_vm3 = vcmp.eq.s32.totalorder %v435_v45, 1  ;;  %v1009_v9 = vunpack.c.l.bf16 %v1001_v55  ;;  %v1140_v14 = vsel %vm1132_vm14, %v4211_v31, 0.0  ;;  %v1170_v62 = vadd.f32 %v1169_v17, %v1168_v44  ;;  %v561_v42 = vld.sshfl [vmem:[#allocation1 + $0x30] sm:$0xff pattern:$0x75316420] }
  0xd1   : > { %vm4305_vm4 = vcmp.eq.s32.totalorder %v3967_v50, %v1123_v58  ;;  %v562_v20 = vld.sshfl [vmem:[#allocation1 + $0x38] sm:$0xff pattern:$0x75316420]  ;;  %v630_v19 = vmul.f32 %v626_v57, %v614_v51  ;;  %v1010_v23 = vunpack.c.l.bf16 %v1002_v4  ;;  %v569_v6 = vrot.slane %v561_v42, 2 }
  0xd2   : > { %v3461_v49 = vpop.eup %3460  ;;  %v570_v45 = vrot.slane %v562_v20, 2  ;;  %vm4309_vm8 = vcmp.lt.f32.partialorder %v618_v30, 1.0  ;;  %v3327_v15 = vadd.f32 -0.5, %v618_v30  ;;  %v1023_v31 = vmul.f32 1.442695, %v1009_v9 }
  0xd3   : > { %v1100_v27 = vmul.f32 0.6931472, %v3461_v49  ;;  %vm1286_vm9 = vcmp.ge.s32.totalorder %v4276_v43, %v4289_v53  ;;  %v4316_v44 = vmul.u32 268435456, %v4286_v61  ;;  %v585_v58 = vsel %vm4293_vm2, %v569_v6, 1.0 }
  0xd4   : > { %v586_v18 = vsel %vm4299_vm3, %v570_v45, 1.0  ;;  %v1025_v36 = vmul.f32 1.442695, %v1010_v23  ;;  %vm1287_vm10 = vcmp.ge.s32.totalorder %v4283_v13, %v4289_v53  ;;  %v1176_v34 = vadd.f32 %v1175_v7, %v4249_v21 }
  0xd5   : > { %v3463_v1 = vpop.eup %3462  ;;  %3464 = vlog2.f32 %v585_v58  ;;  %v638_v51 = vsel %vm4309_vm8, %v630_v19, %v3327_v15  ;;  %v1111_v54 = vadd.f32 %v1100_v27, %v4121_v35  ;;  %v1139_v55 = vsel %vm4305_vm4, %v4208_v28, 0.0 }
  0xd6   : > { %v1102_v17 = vmul.f32 0.6931472, %v3463_v1  ;;  %3466 = vlog2.f32 %v586_v18  ;;  %655 = vst [vmem:[#allocation1 + $0x30] ss:$2 sm:$0xff] %v638_v51  ;;  %v1302_v30 = vsel %vm1286_vm9, 1, %v5700_v3  ;;  %v1183_v4 = vrot.slane %v1140_v14, 4 }
  0xd7   : > { %3468 = vpow2.f32 %v1023_v31  ;;  %v1303_v21 = vsel %vm1287_vm10, 1, %v5700_v3  ;;  %vm1284_vm11 = vcmp.ge.s32.totalorder %v4246_v11, %v4316_v44  ;;  %v1177_v63 = vrot.slane %v1139_v55, 4 }
  0xd8   : > { %v1112_v57 = vadd.f32 %v1102_v17, %v4144_v16  ;;  %3470 = vpow2.f32 %v1025_v36  ;;  %v4334_v7 = vadd.s32 %v1303_v21, %v1302_v30  ;;  %vm1285_vm13 = vcmp.ge.s32.totalorder %v4258_v33, %v4316_v44 }
  0xd9   : > { %v1300_v28 = vsel %vm1284_vm11, 1, %v5700_v3  ;;  %v4341_v48 = vsub.f32 %v1111_v54, %v1170_v62  ;;  %v1301_v9 = vsel %vm1285_vm13, 1, %v5700_v3  ;;  %vm1282_vm14 = vcmp.ge.s32.totalorder %v4246_v11, %v4289_v53 }
  0xda   : > { %v1194_v35 = vsub.f32 %v1112_v57, %v1176_v34  ;;  %v1342_v16 = vshrl.u32 %v4334_v7, 16  ;;  %v4351_v42 = vadd.f32 %v1183_v4, %v1140_v14  ;;  %v1327_v20 = vadd.s32 %v1301_v9, %v1300_v28 }
  0xdb   : > { %5766 = vst [vmem:[#allocation22_spill] sm:$0xff] %v4341_v48  ;;  %v3465_v49 = vpop.eup %3464  ;;  %vm1283_vm2 = vcmp.ge.s32.totalorder %v4258_v33, %v4289_v53  ;;  %v1298_v6 = vsel %vm1282_vm14, 1, %v5700_v3  ;;  %v4357_v15 = vadd.f32 %v1177_v63, %v1139_v55  ;;  %vm1288_vm3 = vcmp.ge.s32.totalorder %v4276_v43, %v4316_v44 }
  0xdc   : > { %v4349_v12 = vsel %vm415_vm6, %v1194_v35, 0.0  ;;  %v3467_v62 = vpop.eup %3466  ;;  %v600_v23 = vmul.f32 0.6931472, %v3465_v49  ;;  %v1344_v27 = vcvt.s32.f32 %v1342_v16  ;;  %v1329_v31 = vshrl.u32 %v1327_v20, 16 }
  0xdd   : > { %5767 = vst [vmem:[#allocation23_spill] sm:$0xff] %v4349_v12  ;;  %v1215_v19 = vrot.slane %v4349_v12, 7  ;;  %v3469_v45 = vpop.eup %3468  ;;  %v602_v5 = vmul.f32 0.6931472, %v3467_v62  ;;  %v1299_v1 = vsel %vm1283_vm2, 1, %v5700_v3  ;;  %v1328_v28 = vand.u32 65535, %v1327_v20 }
  0xde   : > { %v3471_v14 = vpop.eup %3470  ;;  %v609_v18 = vmul.f32 5.0, %v600_v23  ;;  %v1033_v36 = vpack.c.bf16 %v3469_v45, %v3469_v45  ;;  %1347 = vadd.xlane.f32.xlu1 %v1344_v27  ;;  %v1314_v17 = vadd.s32 %v1299_v1, %v1298_v6  ;;  %v1331_v30 = vcvt.s32.f32 %v1329_v31 }
  0xdf   : > { %v1219_v58 = vsel %vm436_vm1, %v4341_v48, %v1215_v19  ;;  %v610_v51 = vmul.f32 5.0, %v602_v5  ;;  %v1034_v54 = vpack.c.bf16 %v3471_v14, %v3471_v14  ;;  %v1330_v27 = vcvt.s32.f32 %v1328_v28 }
  0xe0   : > { %v1227_v34 = vsel %vm418_vm12, 0.0, %v1219_v58  ;;  %v1041_v4 = vunpack.c.l.bf16 %v1033_v36  ;;  %v1316_v21 = vshrl.u32 %v1314_v17, 16  ;;  %1334 = vadd.xlane.f32.xlu0 %v1331_v30  ;;  %vm1289_vm4 = vcmp.ge.s32.totalorder %v4283_v13, %v4316_v44 }
  0xe1   : > { %v1237_v57 = vperm.slane %v1227_v34, 0  ;;  %v1238_v55 = vperm.slane %v1227_v34, 1  ;;  %v734_v35 = vrot.slane %v610_v51, 4  ;;  %v1042_v63 = vunpack.c.l.bf16 %v1034_v54 }
  0xe2   : > { %v1079_v49 = vrot.slane %v1041_v4, 4  ;;  %v1318_v62 = vcvt.s32.f32 %v1316_v21  ;;  %v1304_v1 = vsel %vm1288_vm3, 1, %v5700_v3  ;;  %v1305_v14 = vsel %vm1289_vm4, 1, %v5700_v3 }
  0xe3   : > { %v1245_v16 = vand.u32 4294967040, %v1237_v57  ;;  %v1246_v9 = vand.u32 4294967040, %v1238_v55  ;;  %v739_v19 = vsel %vm735_vm15, %v609_v18, %v734_v35  ;;  %v1085_v23 = vrot.slane %v1042_v63, 4 }
  0xe4   : > { %v743_v20 = vrot.slane %v739_v19, 6  ;;  %v1080_v5 = vadd.f32 %v1079_v49, %v1041_v4  ;;  %1321 = vadd.xlane.f32.xlu2 %v1318_v62  ;;  %v1315_v58 = vand.u32 65535, %v1314_v17  ;;  %v1353_v30 = vadd.s32 %v1305_v14, %v1304_v1 }
  0xe5   : > { %v4370_v6 = vor.u32 %v4225_v29, %v1245_v16  ;;  %v4373_v45 = vor.u32 %v4232_v22, %v1246_v9  ;;  %v1086_v31 = vadd.f32 %v1085_v23, %v1042_v63  ;;  %v1341_v55 = vand.u32 65535, %v4334_v7 }
  0xe6   : > { %v4384_v34 = vsub.f32 %v4264_v40, %v743_v20  ;;  %v1081_v51 = vrot.slane %v1080_v5, 2  ;;  %1332 = vadd.xlane.f32.xlu1 %v1330_v27  ;;  %v1317_v57 = vcvt.s32.f32 %v1315_v58  ;;  %v1355_v21 = vshrl.u32 %v1353_v30, 16 }
  0xe7   : > { %5768 = vst [vmem:[#allocation24_spill] sm:$0xff] %v4370_v6  ;;  %v4378_v18 = vperm.slane %v4370_v6, 0  ;;  %v4381_v36 = vperm.slane %v4373_v45, 0  ;;  %v1087_v54 = vrot.slane %v1086_v31, 2  ;;  %v1179_v40 = vrot.slane %v4357_v15, 2 }
  0xe8   : > { %5769 = vst [vmem:[#allocation25_spill] sm:$0xff] %v4373_v45  ;;  %v1082_v4 = vadd.f32 %v1081_v51, %v1080_v5  ;;  %1319 = vadd.xlane.f32.xlu0 %v1317_v57  ;;  %v1185_v63 = vrot.slane %v4351_v42, 2  ;;  %v1343_v28 = vcvt.s32.f32 %v1341_v55  ;;  %v1357_v9 = vcvt.s32.f32 %v1355_v21 }
  0xe9   : > { %vm1290_vm15 = vcmp.ge.s32.totalorder %v4378_v18, %v4289_v53  ;;  %v1088_v17 = vadd.f32 %v1087_v54, %v1086_v31  ;;  %vm1291_vm8 = vcmp.ge.s32.totalorder %v4381_v36, %v4289_v53  ;;  %vm1292_vm9 = vcmp.ge.s32.totalorder %v4378_v18, %v4316_v44 }
  0xea   : > { %v1083_v35 = vrot.slane %v1082_v4, 1  ;;  %v1306_v7 = vsel %vm1290_vm15, 1, %v5700_v3  ;;  %v1307_v49 = vsel %vm1291_vm8, 1, %v5700_v3  ;;  %vm1293_vm10 = vcmp.ge.s32.totalorder %v4381_v36, %v4316_v44 }
  0xeb   : > { %v1089_v16 = vrot.slane %v1088_v17, 1  ;;  %v1366_v19 = vadd.s32 %v1307_v49, %v1306_v7  ;;  %v1308_v27 = vsel %vm1292_vm9, 1, %v5700_v3  ;;  %v1186_v20 = vadd.f32 %v1185_v63, %v4351_v42 }
  0xec   : > { %v1084_v62 = vadd.f32 %v1083_v35, %v1082_v4  ;;  %1360 = vadd.xlane.f32.xlu2 %v1357_v9  ;;  %v1309_v31 = vsel %vm1293_vm10, 1, %v5700_v3  ;;  %v1180_v1 = vadd.f32 %v1179_v40, %v4357_v15  ;;  %v1354_v35 = vand.u32 65535, %v1353_v30 }
  0xed   : > { %v1090_v23 = vadd.f32 %v1089_v16, %v1088_v17  ;;  %v1368_v5 = vshrl.u32 %v1366_v19, 16  ;;  %v1379_v14 = vadd.s32 %v1309_v31, %v1308_v27  ;;  %v1187_v54 = vrot.slane %v1186_v20, 1 }
  0xee   : > { %3472 = vlog2.f32 %v1084_v62  ;;  %1345 = vadd.xlane.f32.xlu1 %v1343_v28  ;;  %v1181_v57 = vrot.slane %v1180_v1, 1  ;;  %v1356_v15 = vcvt.s32.f32 %v1354_v35  ;;  %vm1431_vm3 = vcmp.gt.s32.totalorder %v4316_v44, 0 }
  0xef   : > { %3474 = vlog2.f32 %v1090_v23  ;;  %v1370_v58 = vcvt.s32.f32 %v1368_v5  ;;  %v1381_v51 = vshrl.u32 %v1379_v14, 16  ;;  %v1188_v63 = vadd.f32 %v1187_v54, %v1186_v20 }
  0xf0   : > { %v1182_v16 = vadd.f32 %v1181_v57, %v1180_v1  ;;  %v1367_v23 = vand.u32 65535, %v1366_v19  ;;  %vm1430_vm8 = vcmp.gt.s32.totalorder %v4289_v53, 0 }
  0xf1   : > { %v1383_v55 = vcvt.s32.f32 %v1381_v51 }
  0xf2   : > { %v1369_v20 = vcvt.s32.f32 %v1367_v23 }
  0xf3   : > { %1386 = vadd.xlane.f32.xlu0 %v1383_v55 }
  0xf4   : > { %v3473_v4 = vpop.eup %3472  ;;  %1373 = vadd.xlane.f32.xlu2 %v1370_v58 }
  0xf5   : > { %v3475_v17 = vpop.eup %3474  ;;  %v1104_v21 = vmul.f32 0.6931472, %v3473_v4 }
  0xf6   : > { %v1106_v42 = vmul.f32 0.6931472, %v3475_v17 }
  0xf7   : > { %v1113_v28 = vadd.f32 %v1104_v21, %v4266_v25 }
  0xf8   : > { %v1114_v9 = vadd.f32 %v1106_v42, %v4270_v32 }
  0xf9   : > { %v4405_v7 = vsub.f32 %v1113_v28, %v1182_v16  ;;  %v1380_v16 = vand.u32 65535, %v1379_v14 }
  0xfa   : > { %v1196_v40 = vsub.f32 %v1114_v9, %v1188_v63 }
  0xfb   : > { %5770 = vst [vmem:[#allocation26_spill] sm:$0xff] %v4405_v7 }
  0xfc   : > { %v4409_v49 = vsel %vm415_vm6, %v1196_v40, 0.0  ;;  %1358 = vadd.xlane.f32.xlu2 %v1356_v15  ;;  %v1382_v15 = vcvt.s32.f32 %v1380_v16  ;;  %v445_v40 = vpop.xlane.xlu1 %444 }
  0xfd   : > { %5771 = vst [vmem:[#allocation27_spill] sm:$0xff] %v4409_v49  ;;  %v1216_v62 = vrot.slane %v4409_v49, 7 }
  0xff   : > { %v1220_v30 = vsel %vm436_vm1, %v4405_v7, %v1216_v62  ;;  %v447_v62 = vpop.xlane.xlu0 %446 }
 0x100   : > { %v1228_v25 = vsel %vm419_vm7, 0.0, %v1220_v30 }
 0x101   : > { %v1239_v27 = vperm.slane %v1228_v25, 0  ;;  %v1240_v32 = vperm.slane %v1228_v25, 1 }
 0x103   : > { %v1247_v5 = vand.u32 4294967040, %v1239_v27  ;;  %v1248_v31 = vand.u32 4294967040, %v1240_v32  ;;  %v460_v25 = vpop.xlane.xlu2 %459  ;;  %v449_v27 = vcvt.f32.s32 %v447_v62 }
 0x104   : > { %1371 = vadd.xlane.f32.xlu2 %v1369_v20 }
 0x105   : > { %v4417_v1 = vor.u32 %v4225_v29, %v1247_v5  ;;  %v4420_v37 = vor.u32 %v4232_v22, %v1248_v31  ;;  %v450_v20 = vshll.u32 %v449_v27, 16  ;;  %v448_v5 = vcvt.f32.s32 %v445_v40 }
 0x106   : > { %v463_v40 = vcvt.f32.s32 %v460_v25 }
 0x107   : > { %5772 = vst [vmem:[#allocation28_spill] sm:$0xff] %v4417_v1  ;;  %v4423_v19 = vperm.slane %v4417_v1, 0  ;;  %v4426_v58 = vperm.slane %v4420_v37, 0  ;;  %v462_v30 = vpop.xlane.xlu0 %461  ;;  %v4448_v14 = vadd.s32 %v450_v20, %v448_v5 }
 0x108   : > { %5773 = vst [vmem:[#allocation29_spill] sm:$0xff] %v4420_v37 }
 0x109   : > { %vm1296_vm6 = vcmp.ge.s32.totalorder %v4423_v19, %v4316_v44  ;;  %vm1297_vm11 = vcmp.ge.s32.totalorder %v4426_v58, %v4316_v44  ;;  %vm1294_vm13 = vcmp.ge.s32.totalorder %v4423_v19, %v4289_v53  ;;  %vm1295_vm14 = vcmp.ge.s32.totalorder %v4426_v58, %v4289_v53  ;;  %5774 = vst [vmem:[#allocation30_spill] sm:$0xff] %v4448_v14 }
 0x10a   : > { %v1312_v29 = vsel %vm1296_vm6, 1, %v5700_v3  ;;  %v1313_v22 = vsel %vm1297_vm11, 1, %v5700_v3  ;;  %v1310_v51 = vsel %vm1294_vm13, 1, %v5700_v3  ;;  %v1311_v54 = vsel %vm1295_vm14, 1, %v5700_v3 }
 0x10b   : > { %v1405_v57 = vadd.s32 %v1313_v22, %v1312_v29  ;;  %v1392_v55 = vadd.s32 %v1311_v54, %v1310_v51  ;;  %v1259_v51 = vmul.u32 3, %v4448_v14 }
 0x10d   : > { %v1407_v4 = vshrl.u32 %v1405_v57, 16  ;;  %v1394_v17 = vshrl.u32 %v1392_v55, 16  ;;  %v1406_v21 = vand.u32 65535, %v1405_v57  ;;  %v1393_v28 = vand.u32 65535, %v1392_v55 }
 0x10e   : > { %vm1263_vm2 = vcmp.lt.s32.totalorder %v1259_v51, 200 }
 0x10f   : > { %v1409_v35 = vcvt.s32.f32 %v1407_v4  ;;  %v1396_v42 = vcvt.s32.f32 %v1394_v17  ;;  %v1408_v63 = vcvt.s32.f32 %v1406_v21  ;;  %v1395_v9 = vcvt.s32.f32 %v1393_v28 }
 0x110   : > { %v1264_v4 = vsel %vm1263_vm2, %v1259_v51, 200  ;;  %v464_v17 = vcvt.f32.s32 %v462_v30 }
 0x111   : > { %1412 = vadd.xlane.f32.xlu1 %v1409_v35  ;;  %1399 = vadd.xlane.f32.xlu0 %v1396_v42  ;;  %v4440_v23 = vpop.xlane.xlu1 %476  ;;  %v4451_v28 = vperm.slane %v1264_v4, 0 }
 0x112   : > { %1410 = vadd.xlane.f32.xlu2 %v1408_v63 }
 0x119   : > { %1397 = vadd.xlane.f32.xlu1 %v1395_v9  ;;  %1384 = vadd.xlane.f32.xlu0 %v1382_v15  ;;  %v465_v15 = vshll.u32 %v464_v17, 16 }
 0x11b   : > { %v4458_v5 = vadd.s32 %v465_v15, %v463_v40 }
 0x11d   : > { %5775 = vst [vmem:[#allocation31_spill] sm:$0xff] %v4458_v5  ;;  %v1260_v25 = vmul.u32 3, %v4458_v5 }
 0x11f   : > { %vm1265_vm6 = vcmp.lt.s32.totalorder %v1260_v25, 200 }
 0x134   : > { %v4446_v29 = vpop.xlane.xlu2 %491 }
 0x139   : > { %v4444_v31 = vpop.xlane.xlu0 %474 }
 0x13a   : > { %v4442_v32 = vpop.xlane.xlu1 %489 }
 0x151   : > { %v1348_v22 = vpop.xlane.xlu1 %1347 }
 0x152   : > { %v1350_v4 = vcvt.f32.s32 %v1348_v22  ;;  %v4472_v22 = vmul.u32 16777216, %v4286_v61 }
 0x153   : > { %v1335_v54 = vpop.xlane.xlu0 %1334 }
 0x154   : > { %v1337_v57 = vcvt.f32.s32 %v1335_v54 }
 0x156   : > { %v1338_v42 = vshll.u32 %v1337_v57, 16 }
 0x157   : > { %v1322_v55 = vpop.xlane.xlu2 %1321 }
 0x158   : > { %v1324_v21 = vcvt.f32.s32 %v1322_v55 }
 0x159   : > { %v1333_v35 = vpop.xlane.xlu1 %1332 }
 0x15a   : > { %v1336_v63 = vcvt.f32.s32 %v1333_v35  ;;  %v1325_v62 = vshll.u32 %v1324_v21, 16 }
 0x15b   : > { %v1320_v9 = vpop.xlane.xlu0 %1319 }
 0x15c   : > { %v1339_v16 = vadd.s32 %v1338_v42, %v1336_v63  ;;  %v1323_v27 = vcvt.f32.s32 %v1320_v9  ;;  %v1351_v63 = vshll.u32 %v1350_v4, 16 }
 0x15e   : > { %vm1423_vm4 = vcmp.ge.s32.totalorder %v1339_v16, %v4451_v28  ;;  %v1326_v30 = vadd.s32 %v1325_v62, %v1323_v27  ;;  %v1266_v16 = vsel %vm1265_vm6, %v1260_v25, 200 }
 0x15f   : > { %vm1433_vm15 = vmand %vm1423_vm4, %vm1431_vm3  ;;  %v1361_v20 = vpop.xlane.xlu2 %1360  ;;  %v4468_v62 = vperm.slane %v1266_v16, 0  ;;  %v494_v16 = vcvt.f32.s32 %v4446_v29 }
 0x160   : > { %v1441_v51 = vsel %vm1433_vm15, 1, %v5700_v3  ;;  %vm1422_vm9 = vcmp.ge.s32.totalorder %v1326_v30, %v4451_v28  ;;  %v1363_v27 = vcvt.f32.s32 %v1361_v20 }
 0x161   : > { %vm1432_vm10 = vmand %vm1422_vm9, %vm1430_vm8  ;;  %v1346_v55 = vpop.xlane.xlu1 %1345 }
 0x162   : > { %v1440_v54 = vsel %vm1432_vm10, 1, %v5700_v3  ;;  %v1349_v21 = vcvt.f32.s32 %v1346_v55  ;;  %v479_v55 = vcvt.f32.s32 %v4440_v23  ;;  %v1364_v25 = vshll.u32 %v1363_v27, 16 }
 0x163   : > { %v1448_v57 = vadd.s32 %v1441_v51, %v1440_v54  ;;  %v478_v27 = vcvt.f32.s32 %v4444_v31 }
 0x164   : > { %v1352_v15 = vadd.s32 %v1351_v63, %v1349_v21  ;;  %v480_v63 = vshll.u32 %v479_v55, 16  ;;  %v495_v55 = vshll.u32 %v494_v16, 16 }
 0x165   : > { %v1449_v17 = vrot.slane %v1448_v57, 4 }
 0x166   : > { %vm1424_vm11 = vcmp.ge.s32.totalorder %v1352_v15, %v4468_v62  ;;  %v4513_v12 = vadd.s32 %v480_v63, %v478_v27 }
 0x167   : > { %v1450_v35 = vadd.s32 %v1449_v17, %v1448_v57  ;;  %v4466_v42 = vpop.xlane.xlu2 %1373  ;;  %v4475_v57 = vmul.u32 16777216, %v3967_v50  ;;  %vm1434_vm13 = vmand %vm1424_vm11, %vm1430_vm8 }
 0x168   : > { %v1442_v23 = vsel %vm1434_vm13, 1, %v5700_v3  ;;  %5776 = vst [vmem:[#allocation32_spill] sm:$0xff] %v4513_v12 }
 0x169   : > { %v1451_v9 = vrot.slane %v1450_v35, 2 }
 0x16b   : > { %v1452_v40 = vadd.s32 %v1451_v9, %v1450_v35 }
 0x16d   : > { %v1453_v30 = vrot.slane %v1452_v40, 1 }
 0x16f   : > { %v1454_v51 = vadd.s32 %v1453_v30, %v1452_v40  ;;  %v1359_v54 = vpop.xlane.xlu2 %1358 }
 0x170   : > { %v1362_v4 = vcvt.f32.s32 %v1359_v54 }
 0x171   : > { %v4478_v17 = vmul.u32 268435456, %v1454_v51 }
 0x172   : > { %v1365_v20 = vadd.s32 %v1364_v25, %v1362_v4  ;;  %v493_v25 = vcvt.f32.s32 %v4442_v32 }
 0x173   : > { %v4484_v21 = vadd.s32 %v4472_v22, %v4478_v17  ;;  %v4488_v35 = vadd.s32 %v4475_v57, %v4478_v17 }
 0x174   : > { %vm1425_vm14 = vcmp.ge.s32.totalorder %v1365_v20, %v4468_v62  ;;  %v1387_v20 = vpop.xlane.xlu0 %1386  ;;  %v4515_v31 = vadd.s32 %v495_v55, %v493_v25 }
 0x175   : > { %vm1435_vm2 = vmand %vm1425_vm14, %vm1431_vm3  ;;  %vm1492_vm4 = vcmp.ge.s32.totalorder %v4246_v11, %v4484_v21  ;;  %vm1493_vm15 = vcmp.ge.s32.totalorder %v4258_v33, %v4484_v21  ;;  %vm1490_vm9 = vcmp.ge.s32.totalorder %v4246_v11, %v4488_v35  ;;  %vm1491_vm10 = vcmp.ge.s32.totalorder %v4258_v33, %v4488_v35 }
 0x176   : > { %v1443_v29 = vsel %vm1435_vm2, 1, %v5700_v3  ;;  %v1508_v9 = vsel %vm1492_vm4, 1, %v5700_v3  ;;  %v1509_v15 = vsel %vm1493_vm15, 1, %v5700_v3  ;;  %v1506_v40 = vsel %vm1490_vm9, 1, %v5700_v3  ;;  %5777 = vst [vmem:[#allocation33_spill] sm:$0xff] %v4515_v31 }
 0x177   : > { %v1455_v30 = vadd.s32 %v1443_v29, %v1442_v23  ;;  %v4508_v51 = vadd.s32 %v1509_v15, %v1508_v9  ;;  %v1507_v54 = vsel %vm1491_vm10, 1, %v5700_v3  ;;  %v1372_v49 = vpop.xlane.xlu2 %1371  ;;  %v1261_v29 = vmul.u32 3, %v4513_v12 }
 0x178   : > { %v1522_v4 = vadd.s32 %v1507_v54, %v1506_v40  ;;  %v1262_v32 = vmul.u32 3, %v4515_v31  ;;  %v1376_v40 = vcvt.f32.s32 %v4466_v42  ;;  %v1375_v27 = vcvt.f32.s32 %v1372_v49 }
 0x179   : > { %v1456_v5 = vrot.slane %v1455_v30, 4  ;;  %v1537_v14 = vshrl.u32 %v4508_v51, 16  ;;  %vm1267_vm6 = vcmp.lt.s32.totalorder %v1261_v29, 200 }
 0x17a   : > { %v1524_v7 = vshrl.u32 %v1522_v4, 16  ;;  %v1523_v15 = vand.u32 65535, %v1522_v4  ;;  %vm1269_vm11 = vcmp.lt.s32.totalorder %v1262_v32, 200  ;;  %v1389_v4 = vcvt.f32.s32 %v1387_v20 }
 0x17b   : > { %v1457_v48 = vadd.s32 %v1456_v5, %v1455_v30  ;;  %v1539_v37 = vcvt.s32.f32 %v1537_v14  ;;  %v1270_v3 = vsel %vm1269_vm11, %v1262_v32, 200  ;;  %v5778_v20 = vmov 0  }
 0x17c   : > { %v1526_v23 = vcvt.s32.f32 %v1524_v7  ;;  %v1525_v30 = vcvt.s32.f32 %v1523_v15  ;;  %v1268_v7 = vsel %vm1267_vm6, %v1261_v29, 200 }
 0x17d   : > { %v1458_v9 = vrot.slane %v1457_v48, 2  ;;  %1542 = vadd.xlane.f32.xlu1 %v1539_v37  ;;  %v1377_v37 = vshll.u32 %v1376_v40, 16  ;;  %v4530_v29 = vperm.slane %v1268_v7, 0 }
 0x17e   : > { %1529 = vadd.xlane.f32.xlu0 %v1526_v23 }
 0x17f   : > { %v1459_v16 = vadd.s32 %v1458_v9, %v1457_v48  ;;  %v1378_v9 = vadd.s32 %v1377_v37, %v1375_v27 }
 0x181   : > { %v1460_v54 = vrot.slane %v1459_v16, 1  ;;  %vm1426_vm9 = vcmp.ge.s32.totalorder %v1378_v9, %v4530_v29 }
 0x182   : > { %vm1436_vm6 = vmand %vm1426_vm9, %vm1430_vm8 }
 0x183   : > { %v1461_v5 = vadd.s32 %v1460_v54, %v1459_v16  ;;  %v4532_v16 = vperm.slane %v1270_v3, 0 }
 0x184   : > { %v1413_v63 = vpop.xlane.xlu1 %1412  ;;  %v1400_v14 = vpop.xlane.xlu0 %1399 }
 0x185   : > { %v1415_v55 = vcvt.f32.s32 %v1413_v63  ;;  %v1411_v25 = vpop.xlane.xlu2 %1410  ;;  %v4520_v12 = vmul.u32 268435456, %v1461_v5  ;;  %1527 = vadd.xlane.f32.xlu1 %v1525_v30  ;;  %v1402_v32 = vcvt.f32.s32 %v1400_v14  ;;  %v1390_v63 = vshll.u32 %v1389_v4, 16 }
 0x186   : > { %v1414_v23 = vcvt.f32.s32 %v1411_v25 }
 0x187   : > { %v1416_v48 = vshll.u32 %v1415_v55, 16  ;;  %v4524_v42 = vadd.s32 %v4475_v57, %v4520_v12  ;;  %v4528_v49 = vadd.s32 %v4472_v22, %v4520_v12  ;;  %v1403_v7 = vshll.u32 %v1402_v32, 16 }
 0x189   : > { %v1417_v15 = vadd.s32 %v1416_v48, %v1414_v23  ;;  %vm1494_vm13 = vcmp.ge.s32.totalorder %v4276_v43, %v4524_v42  ;;  %vm1495_vm14 = vcmp.ge.s32.totalorder %v4283_v13, %v4524_v42  ;;  %vm1496_vm2 = vcmp.ge.s32.totalorder %v4276_v43, %v4528_v49 }
 0x18a   : > { %vm1497_vm4 = vcmp.ge.s32.totalorder %v4283_v13, %v4528_v49  ;;  %v1510_v40 = vsel %vm1494_vm13, 1, %v5778_v20  ;;  %v1511_v3 = vsel %vm1495_vm14, 1, %v5778_v20  ;;  %v1512_v54 = vsel %vm1496_vm2, 1, %v5778_v20 }
 0x18b   : > { %vm1429_vm15 = vcmp.ge.s32.totalorder %v1417_v15, %v4532_v16  ;;  %v1548_v27 = vadd.s32 %v1511_v3, %v1510_v40  ;;  %v1513_v30 = vsel %vm1497_vm4, 1, %v5778_v20  ;;  %v1444_v3 = vsel %vm1436_vm6, 1, %v5778_v20 }
 0x18c   : > { %v1398_v5 = vpop.xlane.xlu1 %1397  ;;  %v1385_v14 = vpop.xlane.xlu0 %1384  ;;  %v4548_v37 = vadd.s32 %v1513_v30, %v1512_v54  ;;  %vm1439_vm10 = vmand %vm1429_vm15, %vm1431_vm3 }
 0x18d   : > { %v1401_v55 = vcvt.f32.s32 %v1398_v5  ;;  %v1388_v25 = vcvt.f32.s32 %v1385_v14  ;;  %v1550_v23 = vshrl.u32 %v1548_v27, 16  ;;  %v1447_v32 = vsel %vm1439_vm10, 1, %v5778_v20 }
 0x18e   : > { %v1563_v9 = vshrl.u32 %v4548_v37, 16  ;;  %v1536_v14 = vand.u32 65535, %v4508_v51 }
 0x18f   : > { %v1404_v48 = vadd.s32 %v1403_v7, %v1401_v55  ;;  %v1391_v4 = vadd.s32 %v1390_v63, %v1388_v25  ;;  %v1552_v15 = vcvt.s32.f32 %v1550_v23 }
 0x190   : > { %v1565_v40 = vcvt.s32.f32 %v1563_v9  ;;  %v1538_v53 = vcvt.s32.f32 %v1536_v14 }
 0x191   : > { %vm1428_vm11 = vcmp.ge.s32.totalorder %v1404_v48, %v4532_v16  ;;  %vm1427_vm13 = vcmp.ge.s32.totalorder %v1391_v4, %v4530_v29  ;;  %1555 = vadd.xlane.f32.xlu2 %v1552_v15  ;;  %v1549_v15 = vand.u32 65535, %v1548_v27 }
 0x192   : > { %vm1438_vm14 = vmand %vm1428_vm11, %vm1430_vm8  ;;  %1568 = vadd.xlane.f32.xlu0 %v1565_v40 }
 0x193   : > { %v1446_v54 = vsel %vm1438_vm14, 1, %v5778_v20  ;;  %vm1437_vm2 = vmand %vm1427_vm13, %vm1431_vm3  ;;  %v1551_v56 = vcvt.s32.f32 %v1549_v15  ;;  %vm1634_vm14 = vcmp.gt.s32.totalorder %v4488_v35, %v4478_v17 }
 0x194   : > { %v1445_v63 = vsel %vm1437_vm2, 1, %v5778_v20  ;;  %v1469_v5 = vadd.s32 %v1447_v32, %v1446_v54 }
 0x195   : > { %v1462_v30 = vadd.s32 %v1445_v63, %v1444_v3 }
 0x196   : > { %v1470_v7 = vrot.slane %v1469_v5, 4 }
 0x197   : > { %v1463_v55 = vrot.slane %v1462_v30, 4 }
 0x198   : > { %v1471_v25 = vadd.s32 %v1470_v7, %v1469_v5 }
 0x199   : > { %v1464_v23 = vadd.s32 %v1463_v55, %v1462_v30  ;;  %1540 = vadd.xlane.f32.xlu2 %v1538_v53 }
 0x19a   : > { %v1472_v48 = vrot.slane %v1471_v25, 2 }
 0x19b   : > { %v1465_v4 = vrot.slane %v1464_v23, 2 }
 0x19c   : > { %v1473_v9 = vadd.s32 %v1472_v48, %v1471_v25 }
 0x19d   : > { %v1466_v31 = vadd.s32 %v1465_v4, %v1464_v23 }
 0x19e   : > { %v1474_v44 = vrot.slane %v1473_v9, 1 }
 0x19f   : > { %v1467_v1 = vrot.slane %v1466_v31, 1 }
 0x1a0   : > { %v1475_v40 = vadd.s32 %v1474_v44, %v1473_v9 }
 0x1a1   : > { %v1468_v6 = vadd.s32 %v1467_v1, %v1466_v31  ;;  %1553 = vadd.xlane.f32.xlu2 %v1551_v56 }
 0x1a2   : > { %v4566_v32 = vmul.u32 268435456, %v1475_v40  ;;  %v1562_v40 = vand.u32 65535, %v4548_v37 }
 0x1a3   : > { %v4568_v51 = vmul.u32 268435456, %v1468_v6 }
 0x1a4   : > { %v4572_v3 = vadd.s32 %v4475_v57, %v4566_v32  ;;  %v4576_v54 = vadd.s32 %v4472_v22, %v4566_v32 }
 0x1a5   : > { %v4580_v27 = vadd.s32 %v4472_v22, %v4568_v51  ;;  %v4584_v1 = vadd.s32 %v4475_v57, %v4568_v51 }
 0x1a6   : > { %vm1502_vm3 = vcmp.ge.s32.totalorder %v4423_v19, %v4572_v3  ;;  %vm1503_vm8 = vcmp.ge.s32.totalorder %v4426_v58, %v4572_v3  ;;  %vm1504_vm4 = vcmp.ge.s32.totalorder %v4423_v19, %v4576_v54  ;;  %vm1505_vm15 = vcmp.ge.s32.totalorder %v4426_v58, %v4576_v54 }
 0x1a7   : > { %vm1500_vm9 = vcmp.ge.s32.totalorder %v4378_v18, %v4580_v27  ;;  %vm1501_vm10 = vcmp.ge.s32.totalorder %v4381_v36, %v4580_v27  ;;  %vm1498_vm6 = vcmp.ge.s32.totalorder %v4378_v18, %v4584_v1  ;;  %vm1499_vm11 = vcmp.ge.s32.totalorder %v4381_v36, %v4584_v1 }
 0x1a8   : > { %v1516_v56 = vsel %vm1500_vm9, 1, %v5778_v20  ;;  %v1517_v6 = vsel %vm1501_vm10, 1, %v5778_v20  ;;  %v1514_v22 = vsel %vm1498_vm6, 1, %v5778_v20  ;;  %v1515_v57 = vsel %vm1499_vm11, 1, %v5778_v20 }
 0x1a9   : > { %v1587_v31 = vadd.s32 %v1517_v6, %v1516_v56  ;;  %v1574_v63 = vadd.s32 %v1515_v57, %v1514_v22  ;;  %v1518_v5 = vsel %vm1502_vm3, 1, %v5778_v20  ;;  %v1519_v14 = vsel %vm1503_vm8, 1, %v5778_v20 }
 0x1aa   : > { %v1520_v30 = vsel %vm1504_vm4, 1, %v5778_v20  ;;  %v1521_v7 = vsel %vm1505_vm15, 1, %v5778_v20  ;;  %v1600_v53 = vadd.s32 %v1519_v14, %v1518_v5  ;;  %v1564_v22 = vcvt.s32.f32 %v1562_v40 }
 0x1ab   : > { %v1589_v55 = vshrl.u32 %v1587_v31, 16  ;;  %v1576_v25 = vshrl.u32 %v1574_v63, 16  ;;  %v1613_v23 = vadd.s32 %v1521_v7, %v1520_v30  ;;  %v1588_v38 = vand.u32 65535, %v1587_v31 }
 0x1ac   : > { %v1602_v15 = vshrl.u32 %v1600_v53, 16  ;;  %v1601_v6 = vand.u32 65535, %v1600_v53  ;;  %v1575_v39 = vand.u32 65535, %v1574_v63  ;;  %vm1635_vm3 = vcmp.gt.s32.totalorder %v4484_v21, %v4478_v17 }
 0x1ad   : > { %v1591_v48 = vcvt.s32.f32 %v1589_v55  ;;  %v1578_v4 = vcvt.s32.f32 %v1576_v25  ;;  %v1615_v9 = vshrl.u32 %v1613_v23, 16  ;;  %v1590_v5 = vcvt.s32.f32 %v1588_v38 }
 0x1ae   : > { %v1604_v56 = vcvt.s32.f32 %v1602_v15  ;;  %v1603_v57 = vcvt.s32.f32 %v1601_v6  ;;  %v1577_v14 = vcvt.s32.f32 %v1575_v39  ;;  %v1614_v30 = vand.u32 65535, %v1613_v23 }
 0x1af   : > { %1594 = vadd.xlane.f32.xlu1 %v1591_v48  ;;  %1581 = vadd.xlane.f32.xlu0 %v1578_v4  ;;  %v1617_v44 = vcvt.s32.f32 %v1615_v9  ;;  %vm1636_vm15 = vcmp.gt.s32.totalorder %v4524_v42, %v4520_v12 }
 0x1b0   : > { %v1616_v7 = vcvt.s32.f32 %v1614_v30 }
 0x1b1   : > { %1620 = vadd.xlane.f32.xlu2 %v1617_v44 }
 0x1b7   : > { %1607 = vadd.xlane.f32.xlu1 %v1604_v56  ;;  %1566 = vadd.xlane.f32.xlu0 %v1564_v22 }
 0x1b9   : > { %1605 = vadd.xlane.f32.xlu2 %v1603_v57 }
 0x1bf   : > { %1592 = vadd.xlane.f32.xlu1 %v1590_v5  ;;  %1579 = vadd.xlane.f32.xlu0 %v1577_v14 }
 0x1c7   : > { %1618 = vadd.xlane.f32.xlu0 %v1616_v7 }
 0x1f0   : > { %v1543_v55 = vpop.xlane.xlu1 %1542 }
 0x1f1   : > { %v1530_v25 = vpop.xlane.xlu0 %1529  ;;  %v1545_v15 = vcvt.f32.s32 %v1543_v55 }
 0x1f2   : > { %v1532_v48 = vcvt.f32.s32 %v1530_v25 }
 0x1f3   : > { %v1546_v31 = vshll.u32 %v1545_v15, 16  ;;  %v4623_v15 = vmul.u32 1048576, %v3967_v50 }
 0x1f4   : > { %v1533_v9 = vshll.u32 %v1532_v48, 16 }
 0x1f8   : > { %v1528_v37 = vpop.xlane.xlu1 %1527 }
 0x1f9   : > { %v1531_v53 = vcvt.f32.s32 %v1528_v37 }
 0x1fb   : > { %v1534_v44 = vadd.s32 %v1533_v9, %v1531_v53  ;;  %v4620_v9 = vmul.u32 1048576, %v4286_v61 }
 0x1fd   : > { %vm1626_vm13 = vcmp.ge.s32.totalorder %v1534_v44, %v4451_v28 }
 0x1fe   : > { %vm1642_vm2 = vmand %vm1626_vm13, %vm1634_vm14 }
 0x1ff   : > { %v1650_v63 = vsel %vm1642_vm2, 1, %v5778_v20  ;;  %vm1637_vm2 = vcmp.gt.s32.totalorder %v4528_v49, %v4520_v12 }
 0x204   : > { %v1556_v4 = vpop.xlane.xlu2 %1555 }
 0x205   : > { %v1569_v22 = vpop.xlane.xlu0 %1568  ;;  %v1558_v35 = vcvt.f32.s32 %v1556_v4 }
 0x206   : > { %v1571_v4 = vcvt.f32.s32 %v1569_v22 }
 0x207   : > { %v1559_v37 = vshll.u32 %v1558_v35, 16 }
 0x20c   : > { %v1541_v40 = vpop.xlane.xlu2 %1540 }
 0x20d   : > { %v1544_v38 = vcvt.f32.s32 %v1541_v40 }
 0x20f   : > { %v1547_v39 = vadd.s32 %v1546_v31, %v1544_v38 }
 0x211   : > { %vm1627_vm8 = vcmp.ge.s32.totalorder %v1547_v39, %v4451_v28 }
 0x212   : > { %vm1643_vm4 = vmand %vm1627_vm8, %vm1635_vm3 }
 0x213   : > { %v1651_v23 = vsel %vm1643_vm4, 1, %v5778_v20  ;;  %vm1639_vm4 = vcmp.gt.s32.totalorder %v4580_v27, %v4568_v51 }
 0x214   : > { %v1658_v56 = vadd.s32 %v1651_v23, %v1650_v63  ;;  %v1554_v5 = vpop.xlane.xlu2 %1553 }
 0x215   : > { %v1557_v55 = vcvt.f32.s32 %v1554_v5 }
 0x216   : > { %v1659_v6 = vrot.slane %v1658_v56, 4 }
 0x217   : > { %v1560_v44 = vadd.s32 %v1559_v37, %v1557_v55 }
 0x218   : > { %v1660_v57 = vadd.s32 %v1659_v6, %v1658_v56 }
 0x219   : > { %vm1628_vm9 = vcmp.ge.s32.totalorder %v1560_v44, %v4468_v62 }
 0x21a   : > { %v1661_v14 = vrot.slane %v1660_v57, 2  ;;  %vm1644_vm14 = vmand %vm1628_vm9, %vm1636_vm15 }
 0x21c   : > { %v1662_v30 = vadd.s32 %v1661_v14, %v1660_v57  ;;  %v1572_v57 = vshll.u32 %v1571_v4, 16  ;;  %v1652_v4 = vsel %vm1644_vm14, 1, %v5778_v20  ;;  %vm1640_vm14 = vcmp.gt.s32.totalorder %v4572_v3, %v4566_v32 }
 0x21e   : > { %v1663_v7 = vrot.slane %v1662_v30, 1 }
 0x220   : > { %v1664_v25 = vadd.s32 %v1663_v7, %v1662_v30 }
 0x222   : > { %v1595_v21 = vpop.xlane.xlu1 %1594  ;;  %v1582_v48 = vpop.xlane.xlu0 %1581  ;;  %v1686_v53 = vmul.u32 16777216, %v1664_v25 }
 0x223   : > { %v1597_v55 = vcvt.f32.s32 %v1595_v21  ;;  %v1584_v25 = vcvt.f32.s32 %v1582_v48 }
 0x224   : > { %v4625_v40 = vpop.xlane.xlu2 %1620  ;;  %v4628_v31 = vadd.s32 %v1686_v53, %v4478_v17 }
 0x225   : > { %v1585_v21 = vshll.u32 %v1584_v25, 16 }
 0x226   : > { %v4632_v38 = vadd.s32 %v4620_v9, %v4628_v31  ;;  %v4636_v39 = vadd.s32 %v4623_v15, %v4628_v31 }
 0x228   : > { %vm1706_vm10 = vcmp.ge.s32.totalorder %v4246_v11, %v4632_v38  ;;  %vm1707_vm6 = vcmp.ge.s32.totalorder %v4258_v33, %v4632_v38  ;;  %vm1704_vm11 = vcmp.ge.s32.totalorder %v4246_v11, %v4636_v39  ;;  %vm1705_vm13 = vcmp.ge.s32.totalorder %v4258_v33, %v4636_v39 }
 0x229   : > { %v1722_v23 = vsel %vm1706_vm10, 1, %v5778_v20  ;;  %v1723_v56 = vsel %vm1707_vm6, 1, %v5778_v20  ;;  %v1720_v6 = vsel %vm1704_vm11, 1, %v5778_v20  ;;  %v1721_v22 = vsel %vm1705_vm13, 1, %v5778_v20 }
 0x22a   : > { %v1608_v17 = vpop.xlane.xlu1 %1607  ;;  %v1567_v63 = vpop.xlane.xlu0 %1566  ;;  %v4653_v14 = vadd.s32 %v1723_v56, %v1722_v23  ;;  %v1736_v30 = vadd.s32 %v1721_v22, %v1720_v6  ;;  %v1598_v6 = vshll.u32 %v1597_v55, 16  ;;  %vm1638_vm6 = vcmp.gt.s32.totalorder %v4584_v1, %v4568_v51 }
 0x22b   : > { %v1570_v5 = vcvt.f32.s32 %v1567_v63  ;;  %v1610_v63 = vcvt.f32.s32 %v1608_v17 }
 0x22c   : > { %v1751_v7 = vshrl.u32 %v4653_v14, 16  ;;  %v1606_v37 = vpop.xlane.xlu2 %1605  ;;  %v1738_v53 = vshrl.u32 %v1736_v30, 16  ;;  %v1737_v8 = vand.u32 65535, %v1736_v30 }
 0x22d   : > { %v1573_v35 = vadd.s32 %v1572_v57, %v1570_v5  ;;  %v1609_v56 = vcvt.f32.s32 %v1606_v37  ;;  %v1611_v49 = vshll.u32 %v1610_v63, 16  ;;  %v1623_v37 = vcvt.f32.s32 %v4625_v40 }
 0x22e   : > { %v1753_v23 = vcvt.s32.f32 %v1751_v7  ;;  %v1740_v42 = vcvt.s32.f32 %v1738_v53  ;;  %v1739_v55 = vcvt.s32.f32 %v1737_v8 }
 0x22f   : > { %vm1629_vm3 = vcmp.ge.s32.totalorder %v1573_v35, %v4468_v62  ;;  %v1612_v7 = vadd.s32 %v1611_v49, %v1609_v56  ;;  %v1624_v53 = vshll.u32 %v1623_v37, 16 }
 0x230   : > { %vm1645_vm8 = vmand %vm1629_vm3, %vm1637_vm2  ;;  %1756 = vadd.xlane.f32.xlu2 %v1753_v23  ;;  %1743 = vadd.xlane.f32.xlu1 %v1740_v42  ;;  %vm1641_vm3 = vcmp.gt.s32.totalorder %v4576_v54, %v4566_v32 }
 0x231   : > { %v1653_v44 = vsel %vm1645_vm8, 1, %v5778_v20  ;;  %vm1632_vm13 = vcmp.ge.s32.totalorder %v1612_v7, %v4532_v16 }
 0x232   : > { %v1665_v48 = vadd.s32 %v1653_v44, %v1652_v4  ;;  %v1593_v22 = vpop.xlane.xlu1 %1592  ;;  %v1580_v57 = vpop.xlane.xlu0 %1579  ;;  %vm1648_vm2 = vmand %vm1632_vm13, %vm1640_vm14 }
 0x233   : > { %v1596_v5 = vcvt.f32.s32 %v1593_v22  ;;  %v1583_v45 = vcvt.f32.s32 %v1580_v57  ;;  %v1656_v44 = vsel %vm1648_vm2, 1, %v5778_v20 }
 0x234   : > { %v1666_v17 = vrot.slane %v1665_v48, 4 }
 0x235   : > { %v1599_v60 = vadd.s32 %v1598_v6, %v1596_v5  ;;  %v1586_v35 = vadd.s32 %v1585_v21, %v1583_v45 }
 0x236   : > { %v1667_v41 = vadd.s32 %v1666_v17, %v1665_v48 }
 0x237   : > { %vm1631_vm15 = vcmp.ge.s32.totalorder %v1599_v60, %v4530_v29  ;;  %vm1630_vm9 = vcmp.ge.s32.totalorder %v1586_v35, %v4530_v29 }
 0x238   : > { %v1668_v25 = vrot.slane %v1667_v41, 2  ;;  %vm1647_vm10 = vmand %vm1631_vm15, %vm1639_vm4  ;;  %1741 = vadd.xlane.f32.xlu2 %v1739_v55 }
 0x239   : > { %v1655_v30 = vsel %vm1647_vm10, 1, %v5778_v20  ;;  %vm1646_vm11 = vmand %vm1630_vm9, %vm1638_vm6 }
 0x23a   : > { %v1669_v45 = vadd.s32 %v1668_v25, %v1667_v41  ;;  %v1654_v27 = vsel %vm1646_vm11, 1, %v5778_v20  ;;  %v1619_v40 = vpop.xlane.xlu0 %1618 }
 0x23b   : > { %v1672_v60 = vadd.s32 %v1655_v30, %v1654_v27  ;;  %v1622_v8 = vcvt.f32.s32 %v1619_v40 }
 0x23c   : > { %v1670_v4 = vrot.slane %v1669_v45, 1 }
 0x23d   : > { %v1673_v63 = vrot.slane %v1672_v60, 4  ;;  %v1625_v1 = vadd.s32 %v1624_v53, %v1622_v8 }
 0x23e   : > { %v1671_v23 = vadd.s32 %v1670_v4, %v1669_v45 }
 0x23f   : > { %v1674_v42 = vadd.s32 %v1673_v63, %v1672_v60  ;;  %vm1633_vm8 = vcmp.ge.s32.totalorder %v1625_v1, %v4532_v16 }
 0x240   : > { %v1687_v41 = vmul.u32 16777216, %v1671_v23  ;;  %vm1649_vm4 = vmand %vm1633_vm8, %vm1641_vm3 }
 0x241   : > { %v1675_v56 = vrot.slane %v1674_v42, 2  ;;  %v1657_v6 = vsel %vm1649_vm4, 1, %v5778_v20 }
 0x242   : > { %v4684_v3 = vadd.s32 %v1687_v41, %v4520_v12  ;;  %v1679_v21 = vadd.s32 %v1657_v6, %v1656_v44  ;;  %v1750_v6 = vand.u32 65535, %v4653_v14 }
 0x243   : > { %v1676_v48 = vadd.s32 %v1675_v56, %v1674_v42 }
 0x244   : > { %v1680_v22 = vrot.slane %v1679_v21, 4  ;;  %v4688_v57 = vadd.s32 %v4620_v9, %v4684_v3  ;;  %v4692_v54 = vadd.s32 %v4623_v15, %v4684_v3 }
 0x245   : > { %v1677_v49 = vrot.slane %v1676_v48, 1 }
 0x246   : > { %v1681_v5 = vadd.s32 %v1680_v22, %v1679_v21  ;;  %vm1710_vm15 = vcmp.ge.s32.totalorder %v4276_v43, %v4688_v57  ;;  %vm1711_vm9 = vcmp.ge.s32.totalorder %v4283_v13, %v4688_v57  ;;  %vm1708_vm10 = vcmp.ge.s32.totalorder %v4276_v43, %v4692_v54 }
 0x247   : > { %v1678_v12 = vadd.s32 %v1677_v49, %v1676_v48  ;;  %v1726_v17 = vsel %vm1710_vm15, 1, %v5778_v20  ;;  %v1727_v35 = vsel %vm1711_vm9, 1, %v5778_v20  ;;  %vm1709_vm6 = vcmp.ge.s32.totalorder %v4283_v13, %v4692_v54 }
 0x248   : > { %v1682_v7 = vrot.slane %v1681_v5, 2  ;;  %v1775_v37 = vadd.s32 %v1727_v35, %v1726_v17  ;;  %v1724_v55 = vsel %vm1708_vm10, 1, %v5778_v20  ;;  %v1725_v25 = vsel %vm1709_vm6, 1, %v5778_v20 }
 0x249   : > { %v1688_v30 = vmul.u32 16777216, %v1678_v12  ;;  %v1762_v45 = vadd.s32 %v1725_v25, %v1724_v55  ;;  %vm1848_vm10 = vcmp.gt.s32.totalorder %v4636_v39, %v4628_v31 }
 0x24a   : > { %v1683_v27 = vadd.s32 %v1682_v7, %v1681_v5  ;;  %v1777_v40 = vshrl.u32 %v1775_v37, 16  ;;  %v1752_v7 = vcvt.s32.f32 %v1750_v6 }
 0x24b   : > { %v4707_v53 = vadd.s32 %v1688_v30, %v4568_v51  ;;  %v1764_v60 = vshrl.u32 %v1762_v45, 16  ;;  %v1763_v25 = vand.u32 65535, %v1762_v45  ;;  %v1776_v30 = vand.u32 65535, %v1775_v37 }
 0x24c   : > { %v1684_v8 = vrot.slane %v1683_v27, 1  ;;  %v1779_v4 = vcvt.s32.f32 %v1777_v40 }
 0x24d   : > { %v1766_v63 = vcvt.s32.f32 %v1764_v60  ;;  %v4711_v1 = vadd.s32 %v4620_v9, %v4707_v53  ;;  %v4715_v23 = vadd.s32 %v4623_v15, %v4707_v53 }
 0x24e   : > { %v1685_v42 = vadd.s32 %v1684_v8, %v1683_v27  ;;  %1782 = vadd.xlane.f32.xlu1 %v1779_v4  ;;  %v1765_v4 = vcvt.s32.f32 %v1763_v25 }
 0x24f   : > { %1769 = vadd.xlane.f32.xlu0 %v1766_v63  ;;  %vm1714_vm11 = vcmp.ge.s32.totalorder %v4378_v18, %v4711_v1  ;;  %vm1715_vm13 = vcmp.ge.s32.totalorder %v4381_v36, %v4711_v1  ;;  %vm1712_vm14 = vcmp.ge.s32.totalorder %v4378_v18, %v4715_v23  ;;  %vm1713_vm2 = vcmp.ge.s32.totalorder %v4381_v36, %v4715_v23 }
 0x250   : > { %v1689_v51 = vmul.u32 16777216, %v1685_v42  ;;  %v1730_v44 = vsel %vm1714_vm11, 1, %v5778_v20  ;;  %v1731_v41 = vsel %vm1715_vm13, 1, %v5778_v20  ;;  %v1728_v56 = vsel %vm1712_vm14, 1, %v5778_v20 }
 0x251   : > { %v1801_v21 = vadd.s32 %v1731_v41, %v1730_v44  ;;  %v1729_v48 = vsel %vm1713_vm2, 1, %v5778_v20  ;;  %v1778_v42 = vcvt.s32.f32 %v1776_v30  ;;  %vm1849_vm11 = vcmp.gt.s32.totalorder %v4632_v38, %v4628_v31 }
 0x252   : > { %v4731_v22 = vadd.s32 %v1689_v51, %v4566_v32  ;;  %v1788_v49 = vadd.s32 %v1729_v48, %v1728_v56  ;;  %vm1850_vm2 = vcmp.gt.s32.totalorder %v4692_v54, %v4684_v3 }
 0x253   : > { %v1803_v5 = vshrl.u32 %v1801_v21, 16  ;;  %v1802_v44 = vand.u32 65535, %v1801_v21 }
 0x254   : > { %v1790_v12 = vshrl.u32 %v1788_v49, 16  ;;  %v4735_v17 = vadd.s32 %v4623_v15, %v4731_v22  ;;  %v4739_v35 = vadd.s32 %v4620_v9, %v4731_v22  ;;  %v1789_v41 = vand.u32 65535, %v1788_v49 }
 0x255   : > { %v1805_v55 = vcvt.s32.f32 %v1803_v5  ;;  %v1804_v6 = vcvt.s32.f32 %v1802_v44 }
 0x256   : > { %v1792_v14 = vcvt.s32.f32 %v1790_v12  ;;  %vm1716_vm3 = vcmp.ge.s32.totalorder %v4423_v19, %v4735_v17  ;;  %vm1717_vm8 = vcmp.ge.s32.totalorder %v4426_v58, %v4735_v17  ;;  %vm1718_vm4 = vcmp.ge.s32.totalorder %v4423_v19, %v4739_v35 }
 0x257   : > { %1754 = vadd.xlane.f32.xlu0 %v1752_v7  ;;  %1808 = vadd.xlane.f32.xlu2 %v1805_v55  ;;  %v1732_v32 = vsel %vm1716_vm3, 1, %v5778_v20  ;;  %v1733_v15 = vsel %vm1717_vm8, 1, %v5778_v20  ;;  %vm1719_vm15 = vcmp.ge.s32.totalorder %v4426_v58, %v4739_v35  ;;  %v1734_v40 = vsel %vm1718_vm4, 1, %v5778_v20 }
 0x258   : > { %1795 = vadd.xlane.f32.xlu1 %v1792_v14  ;;  %v1814_v9 = vadd.s32 %v1733_v15, %v1732_v32  ;;  %v1735_v60 = vsel %vm1719_vm15, 1, %v5778_v20  ;;  %v1791_v48 = vcvt.s32.f32 %v1789_v41  ;;  %vm1851_vm8 = vcmp.gt.s32.totalorder %v4688_v57, %v4684_v3 }
 0x259   : > { %v1827_v63 = vadd.s32 %v1735_v60, %v1734_v40 }
 0x25a   : > { %v1816_v27 = vshrl.u32 %v1814_v9, 16  ;;  %v1815_v37 = vand.u32 65535, %v1814_v9 }
 0x25b   : > { %v1829_v51 = vshrl.u32 %v1827_v63, 16  ;;  %v1828_v45 = vand.u32 65535, %v1827_v63 }
 0x25c   : > { %v1818_v8 = vcvt.s32.f32 %v1816_v27  ;;  %v1817_v5 = vcvt.s32.f32 %v1815_v37 }
 0x25d   : > { %v1831_v56 = vcvt.s32.f32 %v1829_v51  ;;  %v1830_v12 = vcvt.s32.f32 %v1828_v45 }
 0x25f   : > { %1767 = vadd.xlane.f32.xlu0 %v1765_v4  ;;  %1821 = vadd.xlane.f32.xlu2 %v1818_v8 }
 0x260   : > { %1780 = vadd.xlane.f32.xlu1 %v1778_v42 }
 0x267   : > { %1834 = vadd.xlane.f32.xlu0 %v1831_v56  ;;  %1806 = vadd.xlane.f32.xlu2 %v1804_v6 }
 0x268   : > { %1793 = vadd.xlane.f32.xlu1 %v1791_v48 }
 0x26f   : > { %1819 = vadd.xlane.f32.xlu0 %v1817_v5 }
 0x270   : > { %1832 = vadd.xlane.f32.xlu1 %v1830_v12 }
 0x2a3   : > { %v1757_v7 = vpop.xlane.xlu2 %1756  ;;  %v1744_v55 = vpop.xlane.xlu1 %1743 }
 0x2a4   : > { %v1746_v32 = vcvt.f32.s32 %v1744_v55  ;;  %v1759_v30 = vcvt.f32.s32 %v1757_v7 }
 0x2a6   : > { %v1747_v49 = vshll.u32 %v1746_v32, 16  ;;  %v1760_v8 = vshll.u32 %v1759_v30, 16 }
 0x2ab   : > { %v1742_v14 = vpop.xlane.xlu2 %1741 }
 0x2ac   : > { %v1745_v21 = vcvt.f32.s32 %v1742_v14 }
 0x2ae   : > { %v1748_v27 = vadd.s32 %v1747_v49, %v1745_v21 }
 0x2b0   : > { %vm1840_vm9 = vcmp.ge.s32.totalorder %v1748_v27, %v4451_v28 }
 0x2b1   : > { %vm1856_vm6 = vmand %vm1840_vm9, %vm1848_vm10  ;;  %vm1852_vm10 = vcmp.gt.s32.totalorder %v4715_v23, %v4707_v53 }
 0x2b2   : > { %v1864_v44 = vsel %vm1856_vm6, 1, %v5778_v20  ;;  %vm1853_vm6 = vcmp.gt.s32.totalorder %v4711_v1, %v4707_v53 }
 0x2c1   : > { %v1783_v15 = vpop.xlane.xlu1 %1782 }
 0x2c2   : > { %v1770_v25 = vpop.xlane.xlu0 %1769  ;;  %v1785_v51 = vcvt.f32.s32 %v1783_v15 }
 0x2c3   : > { %v1772_v42 = vcvt.f32.s32 %v1770_v25 }
 0x2c4   : > { %v1786_v5 = vshll.u32 %v1785_v51, 16 }
 0x2c5   : > { %v1773_v37 = vshll.u32 %v1772_v42, 16 }
 0x2ca   : > { %v1809_v40 = vpop.xlane.xlu2 %1808  ;;  %v1755_v60 = vpop.xlane.xlu0 %1754 }
 0x2cb   : > { %v1796_v9 = vpop.xlane.xlu1 %1795  ;;  %v1758_v4 = vcvt.f32.s32 %v1755_v60  ;;  %v1811_v32 = vcvt.f32.s32 %v1809_v40 }
 0x2cc   : > { %v1798_v15 = vcvt.f32.s32 %v1796_v9 }
 0x2cd   : > { %v1761_v63 = vadd.s32 %v1760_v8, %v1758_v4  ;;  %v1812_v60 = vshll.u32 %v1811_v32, 16 }
 0x2ce   : > { %v1799_v9 = vshll.u32 %v1798_v15, 16 }
 0x2cf   : > { %vm1841_vm13 = vcmp.ge.s32.totalorder %v1761_v63, %v4451_v28 }
 0x2d0   : > { %vm1857_vm14 = vmand %vm1841_vm13, %vm1849_vm11 }
 0x2d1   : > { %v1865_v41 = vsel %vm1857_vm14, 1, %v5778_v20 }
 0x2d2   : > { %v1872_v56 = vadd.s32 %v1865_v41, %v1864_v44  ;;  %v1822_v6 = vpop.xlane.xlu2 %1821  ;;  %v1768_v48 = vpop.xlane.xlu0 %1767 }
 0x2d3   : > { %v1781_v45 = vpop.xlane.xlu1 %1780  ;;  %v1771_v39 = vcvt.f32.s32 %v1768_v48 }
 0x2d4   : > { %v1873_v12 = vrot.slane %v1872_v56, 4  ;;  %v1784_v7 = vcvt.f32.s32 %v1781_v45 }
 0x2d5   : > { %v1774_v55 = vadd.s32 %v1773_v37, %v1771_v39  ;;  %v4775_v37 = vmul.u32 65536, %v4286_v61 }
 0x2d6   : > { %v1874_v14 = vadd.s32 %v1873_v12, %v1872_v56  ;;  %v1787_v38 = vadd.s32 %v1786_v5, %v1784_v7  ;;  %v1824_v56 = vcvt.f32.s32 %v1822_v6  ;;  %v4779_v5 = vmul.u32 65536, %v3967_v50 }
 0x2d7   : > { %vm1842_vm3 = vcmp.ge.s32.totalorder %v1774_v55, %v4468_v62 }
 0x2d8   : > { %v1875_v25 = vrot.slane %v1874_v14, 2  ;;  %vm1843_vm4 = vcmp.ge.s32.totalorder %v1787_v38, %v4468_v62  ;;  %vm1858_vm15 = vmand %vm1842_vm3, %vm1850_vm2  ;;  %vm1855_vm3 = vcmp.gt.s32.totalorder %v4739_v35, %v4731_v22  ;;  %v1825_v55 = vshll.u32 %v1824_v56, 16 }
 0x2d9   : > { %vm1859_vm9 = vmand %vm1843_vm4, %vm1851_vm8  ;;  %v1866_v21 = vsel %vm1858_vm15, 1, %v5778_v20  ;;  %vm1854_vm8 = vcmp.gt.s32.totalorder %v4735_v17, %v4731_v22 }
 0x2da   : > { %v1876_v49 = vadd.s32 %v1875_v25, %v1874_v14  ;;  %v1867_v30 = vsel %vm1859_vm9, 1, %v5778_v20  ;;  %v1807_v27 = vpop.xlane.xlu2 %1806  ;;  %v1835_v40 = vpop.xlane.xlu0 %1834 }
 0x2db   : > { %v1879_v54 = vadd.s32 %v1867_v30, %v1866_v21  ;;  %v1794_v8 = vpop.xlane.xlu1 %1793  ;;  %v1810_v4 = vcvt.f32.s32 %v1807_v27  ;;  %v1837_v39 = vcvt.f32.s32 %v1835_v40 }
 0x2dc   : > { %v1877_v63 = vrot.slane %v1876_v49, 1  ;;  %v1797_v42 = vcvt.f32.s32 %v1794_v8 }
 0x2dd   : > { %v1880_v51 = vrot.slane %v1879_v54, 4  ;;  %v1813_v57 = vadd.s32 %v1812_v60, %v1810_v4  ;;  %v1838_v25 = vshll.u32 %v1837_v39, 16 }
 0x2de   : > { %v1878_v44 = vadd.s32 %v1877_v63, %v1876_v49  ;;  %v1800_v41 = vadd.s32 %v1799_v9, %v1797_v42 }
 0x2df   : > { %v1881_v48 = vadd.s32 %v1880_v51, %v1879_v54  ;;  %vm1845_vm11 = vcmp.ge.s32.totalorder %v1813_v57, %v4530_v29 }
 0x2e0   : > { %v1900_v45 = vmul.u32 1048576, %v1878_v44  ;;  %vm1844_vm13 = vcmp.ge.s32.totalorder %v1800_v41, %v4530_v29  ;;  %vm1861_vm14 = vmand %vm1845_vm11, %vm1853_vm6 }
 0x2e1   : > { %v1882_v23 = vrot.slane %v1881_v48, 2  ;;  %vm1860_vm2 = vmand %vm1844_vm13, %vm1852_vm10  ;;  %v1869_v12 = vsel %vm1861_vm14, 1, %v5778_v20 }
 0x2e2   : > { %v4783_v1 = vadd.s32 %v1900_v45, %v4628_v31  ;;  %v1868_v6 = vsel %vm1860_vm2, 1, %v5778_v20  ;;  %v1820_v7 = vpop.xlane.xlu0 %1819 }
 0x2e3   : > { %v1883_v14 = vadd.s32 %v1882_v23, %v1881_v48  ;;  %v1886_v38 = vadd.s32 %v1869_v12, %v1868_v6  ;;  %v1833_v32 = vpop.xlane.xlu1 %1832  ;;  %v1823_v15 = vcvt.f32.s32 %v1820_v7 }
 0x2e4   : > { %v1836_v21 = vcvt.f32.s32 %v1833_v32  ;;  %v4790_v49 = vadd.s32 %v4775_v37, %v4783_v1  ;;  %v4794_v31 = vadd.s32 %v4779_v5, %v4783_v1 }
 0x2e5   : > { %v1884_v30 = vrot.slane %v1883_v14, 1  ;;  %v1887_v27 = vrot.slane %v1886_v38, 4  ;;  %v1826_v40 = vadd.s32 %v1825_v55, %v1823_v15 }
 0x2e6   : > { %v1839_v60 = vadd.s32 %v1838_v25, %v1836_v21  ;;  %vm1920_vm4 = vcmp.ge.s32.totalorder %v4246_v11, %v4790_v49  ;;  %vm1921_vm15 = vcmp.ge.s32.totalorder %v4258_v33, %v4790_v49  ;;  %vm1918_vm9 = vcmp.ge.s32.totalorder %v4246_v11, %v4794_v31 }
 0x2e7   : > { %v1885_v54 = vadd.s32 %v1884_v30, %v1883_v14  ;;  %v1888_v8 = vadd.s32 %v1887_v27, %v1886_v38  ;;  %vm1846_vm10 = vcmp.ge.s32.totalorder %v1826_v40, %v4532_v16  ;;  %v1936_v4 = vsel %vm1920_vm4, 1, %v5778_v20 }
 0x2e8   : > { %vm1847_vm6 = vcmp.ge.s32.totalorder %v1839_v60, %v4532_v16  ;;  %vm1862_vm11 = vmand %vm1846_vm10, %vm1854_vm8  ;;  %v1937_v17 = vsel %vm1921_vm15, 1, %v5778_v20  ;;  %vm1919_vm13 = vcmp.ge.s32.totalorder %v4258_v33, %v4794_v31  ;;  %v1934_v9 = vsel %vm1918_vm9, 1, %v5778_v20 }
 0x2e9   : > { %v1901_v63 = vmul.u32 1048576, %v1885_v54  ;;  %v1889_v42 = vrot.slane %v1888_v8, 2  ;;  %vm1863_vm14 = vmand %vm1847_vm6, %vm1855_vm3  ;;  %v1870_v51 = vsel %vm1862_vm11, 1, %v5778_v20  ;;  %v4815_v57 = vadd.s32 %v1937_v17, %v1936_v4 }
 0x2ea   : > { %v1871_v44 = vsel %vm1863_vm14, 1, %v5778_v20  ;;  %v1935_v41 = vsel %vm1919_vm13, 1, %v5778_v20 }
 0x2eb   : > { %v4820_v56 = vadd.s32 %v1901_v63, %v4684_v3  ;;  %v1890_v48 = vadd.s32 %v1889_v42, %v1888_v8  ;;  %v1893_v45 = vadd.s32 %v1871_v44, %v1870_v51  ;;  %v1965_v39 = vshrl.u32 %v4815_v57, 16 }
 0x2ec   : > { %v1950_v23 = vadd.s32 %v1935_v41, %v1934_v9 }
 0x2ed   : > { %v1891_v12 = vrot.slane %v1890_v48, 1  ;;  %v1894_v6 = vrot.slane %v1893_v45, 4  ;;  %v1967_v35 = vcvt.s32.f32 %v1965_v39  ;;  %v4825_v7 = vadd.s32 %v4775_v37, %v4820_v56 }
 0x2ee   : > { %v1952_v55 = vshrl.u32 %v1950_v23, 16  ;;  %v4829_v14 = vadd.s32 %v4779_v5, %v4820_v56  ;;  %v1951_v15 = vand.u32 65535, %v1950_v23 }
 0x2ef   : > { %v1892_v38 = vadd.s32 %v1891_v12, %v1890_v48  ;;  %v1895_v3 = vadd.s32 %v1894_v6, %v1893_v45  ;;  %1970 = vadd.xlane.f32.xlu0 %v1967_v35  ;;  %vm1924_vm2 = vcmp.ge.s32.totalorder %v4276_v43, %v4825_v7  ;;  %vm1925_vm3 = vcmp.ge.s32.totalorder %v4283_v13, %v4825_v7 }
 0x2f0   : > { %v1954_v32 = vcvt.s32.f32 %v1952_v55  ;;  %v1940_v25 = vsel %vm1924_vm2, 1, %v5778_v20  ;;  %v1941_v21 = vsel %vm1925_vm3, 1, %v5778_v20  ;;  %vm1922_vm8 = vcmp.ge.s32.totalorder %v4276_v43, %v4829_v14 }
 0x2f1   : > { %v1902_v30 = vmul.u32 1048576, %v1892_v38  ;;  %v1896_v27 = vrot.slane %v1895_v3, 2  ;;  %v1989_v40 = vadd.s32 %v1941_v21, %v1940_v25  ;;  %vm1923_vm4 = vcmp.ge.s32.totalorder %v4283_v13, %v4829_v14 }
 0x2f2   : > { %1957 = vadd.xlane.f32.xlu2 %v1954_v32  ;;  %v1938_v60 = vsel %vm1922_vm8, 1, %v5778_v20  ;;  %v1939_v17 = vsel %vm1923_vm4, 1, %v5778_v20  ;;  %v1953_v42 = vcvt.s32.f32 %v1951_v15  ;;  %v1964_v25 = vand.u32 65535, %v4815_v57 }
 0x2f3   : > { %v4843_v54 = vadd.s32 %v1902_v30, %v4707_v53  ;;  %v1897_v8 = vadd.s32 %v1896_v27, %v1895_v3  ;;  %v1991_v4 = vshrl.u32 %v1989_v40, 16  ;;  %v1976_v9 = vadd.s32 %v1939_v17, %v1938_v60 }
 0x2f4   : > { %vm2062_vm8 = vcmp.gt.s32.totalorder %v4794_v31, %v4783_v1 }
 0x2f5   : > { %v1898_v63 = vrot.slane %v1897_v8, 1  ;;  %v4848_v51 = vadd.s32 %v4775_v37, %v4843_v54  ;;  %v4852_v44 = vadd.s32 %v4779_v5, %v4843_v54  ;;  %v1993_v41 = vcvt.s32.f32 %v1991_v4 }
 0x2f6   : > { %v1978_v48 = vshrl.u32 %v1976_v9, 16  ;;  %v1977_v17 = vand.u32 65535, %v1976_v9 }
 0x2f7   : > { %v1899_v45 = vadd.s32 %v1898_v63, %v1897_v8  ;;  %1955 = vadd.xlane.f32.xlu0 %v1953_v42  ;;  %vm1928_vm15 = vcmp.ge.s32.totalorder %v4378_v18, %v4848_v51  ;;  %vm1929_vm9 = vcmp.ge.s32.totalorder %v4381_v36, %v4848_v51  ;;  %vm1926_vm10 = vcmp.ge.s32.totalorder %v4378_v18, %v4852_v44 }
 0x2f8   : > { %v1980_v53 = vcvt.s32.f32 %v1978_v48  ;;  %v1944_v39 = vsel %vm1928_vm15, 1, %v5778_v20  ;;  %v1945_v23 = vsel %vm1929_vm9, 1, %v5778_v20  ;;  %vm1927_vm6 = vcmp.ge.s32.totalorder %v4381_v36, %v4852_v44 }
 0x2f9   : > { %v1903_v12 = vmul.u32 1048576, %v1899_v45  ;;  %v2015_v6 = vadd.s32 %v1945_v23, %v1944_v39  ;;  %v1942_v35 = vsel %vm1926_vm10, 1, %v5778_v20  ;;  %v1943_v55 = vsel %vm1927_vm6, 1, %v5778_v20 }
 0x2fa   : > { %1996 = vadd.xlane.f32.xlu2 %v1993_v41  ;;  %1983 = vadd.xlane.f32.xlu1 %v1980_v53  ;;  %v2002_v38 = vadd.s32 %v1943_v55, %v1942_v35  ;;  %v1979_v45 = vcvt.s32.f32 %v1977_v17  ;;  %vm2063_vm15 = vcmp.gt.s32.totalorder %v4790_v49, %v4783_v1  ;;  %vm2065_vm6 = vcmp.gt.s32.totalorder %v4825_v7, %v4820_v56 }
 0x2fb   : > { %v4867_v3 = vadd.s32 %v1903_v12, %v4731_v22  ;;  %v2017_v32 = vshrl.u32 %v2015_v6, 16  ;;  %v1966_v22 = vcvt.s32.f32 %v1964_v25  ;;  %v2016_v39 = vand.u32 65535, %v2015_v6 }
 0x2fc   : > { %v2004_v15 = vshrl.u32 %v2002_v38, 16  ;;  %v2003_v23 = vand.u32 65535, %v2002_v38 }
 0x2fd   : > { %v2019_v21 = vcvt.s32.f32 %v2017_v32  ;;  %v4872_v30 = vadd.s32 %v4779_v5, %v4867_v3  ;;  %v4876_v60 = vadd.s32 %v4775_v37, %v4867_v3  ;;  %v1990_v5 = vand.u32 65535, %v1989_v40 }
 0x2fe   : > { %v2006_v27 = vcvt.s32.f32 %v2004_v15  ;;  %v2018_v35 = vcvt.s32.f32 %v2016_v39  ;;  %v2005_v55 = vcvt.s32.f32 %v2003_v23 }
 0x2ff   : > { %2022 = vadd.xlane.f32.xlu0 %v2019_v21  ;;  %vm1930_vm11 = vcmp.ge.s32.totalorder %v4423_v19, %v4872_v30  ;;  %vm1931_vm13 = vcmp.ge.s32.totalorder %v4426_v58, %v4872_v30  ;;  %vm1932_vm14 = vcmp.ge.s32.totalorder %v4423_v19, %v4876_v60  ;;  %vm1933_vm2 = vcmp.ge.s32.totalorder %v4426_v58, %v4876_v60 }
 0x300   : > { %v1946_v57 = vsel %vm1930_vm11, 1, %v5778_v20  ;;  %v1947_v8 = vsel %vm1931_vm13, 1, %v5778_v20  ;;  %v1948_v42 = vsel %vm1932_vm14, 1, %v5778_v20  ;;  %v1949_v41 = vsel %vm1933_vm2, 1, %v5778_v20 }
 0x301   : > { %v2028_v4 = vadd.s32 %v1947_v8, %v1946_v57  ;;  %v1992_v48 = vcvt.s32.f32 %v1990_v5  ;;  %v2041_v53 = vadd.s32 %v1949_v41, %v1948_v42  ;;  %vm2064_vm2 = vcmp.gt.s32.totalorder %v4829_v14, %v4820_v56 }
 0x302   : > { %2009 = vadd.xlane.f32.xlu2 %v2006_v27  ;;  %1968 = vadd.xlane.f32.xlu1 %v1966_v22 }
 0x303   : > { %v2030_v37 = vshrl.u32 %v2028_v4, 16  ;;  %v2043_v12 = vshrl.u32 %v2041_v53, 16  ;;  %v2042_v40 = vand.u32 65535, %v2041_v53  ;;  %v2029_v9 = vand.u32 65535, %v2028_v4 }
 0x305   : > { %v2032_v63 = vcvt.s32.f32 %v2030_v37  ;;  %v2045_v32 = vcvt.s32.f32 %v2043_v12  ;;  %v2044_v15 = vcvt.s32.f32 %v2042_v40  ;;  %v2031_v25 = vcvt.s32.f32 %v2029_v9 }
 0x307   : > { %2035 = vadd.xlane.f32.xlu0 %v2032_v63 }
 0x30a   : > { %1994 = vadd.xlane.f32.xlu2 %v1992_v48  ;;  %1981 = vadd.xlane.f32.xlu1 %v1979_v45 }
 0x30f   : > { %2020 = vadd.xlane.f32.xlu0 %v2018_v35 }
 0x312   : > { %2007 = vadd.xlane.f32.xlu2 %v2005_v55  ;;  %2048 = vadd.xlane.f32.xlu1 %v2045_v32 }
 0x31a   : > { %2046 = vadd.xlane.f32.xlu2 %v2044_v15  ;;  %2033 = vadd.xlane.f32.xlu1 %v2031_v25 }
 0x362   : > { %v1971_v21 = vpop.xlane.xlu0 %1970 }
 0x363   : > { %v1973_v5 = vcvt.f32.s32 %v1971_v21 }
 0x365   : > { %v1958_v27 = vpop.xlane.xlu2 %1957  ;;  %v1974_v48 = vshll.u32 %v1973_v5, 16 }
 0x366   : > { %v1960_v6 = vcvt.f32.s32 %v1958_v27 }
 0x368   : > { %v1961_v37 = vshll.u32 %v1960_v6, 16 }
 0x36a   : > { %v1956_v22 = vpop.xlane.xlu0 %1955 }
 0x36b   : > { %v1959_v38 = vcvt.f32.s32 %v1956_v22 }
 0x36d   : > { %v1997_v57 = vpop.xlane.xlu2 %1996  ;;  %v1984_v8 = vpop.xlane.xlu1 %1983  ;;  %v1962_v17 = vadd.s32 %v1961_v37, %v1959_v38 }
 0x36e   : > { %v1999_v53 = vcvt.f32.s32 %v1997_v57  ;;  %v1986_v39 = vcvt.f32.s32 %v1984_v8 }
 0x36f   : > { %vm2054_vm3 = vcmp.ge.s32.totalorder %v1962_v17, %v4451_v28 }
 0x370   : > { %vm2070_vm4 = vmand %vm2054_vm3, %vm2062_vm8  ;;  %v2000_v9 = vshll.u32 %v1999_v53, 16  ;;  %v1987_v31 = vshll.u32 %v1986_v39, 16  ;;  %vm2067_vm8 = vcmp.gt.s32.totalorder %v4848_v51, %v4843_v54  ;;  %v4914_v51 = vmul.u32 4096, %v4286_v61 }
 0x371   : > { %v2078_v12 = vsel %vm2070_vm4, 1, %v5778_v20 }
 0x372   : > { %v2023_v63 = vpop.xlane.xlu0 %2022 }
 0x373   : > { %v2025_v27 = vcvt.f32.s32 %v2023_v63 }
 0x375   : > { %v2010_v42 = vpop.xlane.xlu2 %2009  ;;  %v1969_v41 = vpop.xlane.xlu1 %1968  ;;  %v2026_v37 = vshll.u32 %v2025_v27, 16 }
 0x376   : > { %v1972_v4 = vcvt.f32.s32 %v1969_v41  ;;  %v2012_v57 = vcvt.f32.s32 %v2010_v42 }
 0x378   : > { %v1975_v45 = vadd.s32 %v1974_v48, %v1972_v4  ;;  %v2013_v4 = vshll.u32 %v2012_v57, 16 }
 0x37a   : > { %vm2055_vm9 = vcmp.ge.s32.totalorder %v1975_v45, %v4451_v28  ;;  %v2036_v23 = vpop.xlane.xlu0 %2035 }
 0x37b   : > { %vm2071_vm10 = vmand %vm2055_vm9, %vm2063_vm15  ;;  %vm2066_vm9 = vcmp.gt.s32.totalorder %v4852_v44, %v4843_v54 }
 0x37c   : > { %v2079_v35 = vsel %vm2071_vm10, 1, %v5778_v20 }
 0x37d   : > { %v2086_v55 = vadd.s32 %v2079_v35, %v2078_v12  ;;  %v1995_v32 = vpop.xlane.xlu2 %1994  ;;  %v1982_v40 = vpop.xlane.xlu1 %1981 }
 0x37e   : > { %v1998_v15 = vcvt.f32.s32 %v1995_v32  ;;  %v1985_v25 = vcvt.f32.s32 %v1982_v40 }
 0x37f   : > { %v2087_v21 = vrot.slane %v2086_v55, 4 }
 0x380   : > { %v2001_v22 = vadd.s32 %v2000_v9, %v1998_v15  ;;  %v1988_v6 = vadd.s32 %v1987_v31, %v1985_v25  ;;  %v4917_v15 = vmul.u32 4096, %v3967_v50 }
 0x381   : > { %v2088_v49 = vadd.s32 %v2087_v21, %v2086_v55  ;;  %v2038_v55 = vcvt.f32.s32 %v2036_v23 }
 0x382   : > { %vm2057_vm11 = vcmp.ge.s32.totalorder %v2001_v22, %v4468_v62  ;;  %vm2056_vm13 = vcmp.ge.s32.totalorder %v1988_v6, %v4468_v62  ;;  %v2021_v8 = vpop.xlane.xlu0 %2020 }
 0x383   : > { %v2089_v38 = vrot.slane %v2088_v49, 2  ;;  %vm2073_vm14 = vmand %vm2057_vm11, %vm2065_vm6  ;;  %v2024_v5 = vcvt.f32.s32 %v2021_v8  ;;  %v2039_v44 = vshll.u32 %v2038_v55, 16  ;;  %vm2069_vm11 = vcmp.gt.s32.totalorder %v4876_v60, %v4867_v3 }
 0x384   : > { %v2081_v17 = vsel %vm2073_vm14, 1, %v5778_v20  ;;  %vm2072_vm3 = vmand %vm2056_vm13, %vm2064_vm2  ;;  %vm2068_vm13 = vcmp.gt.s32.totalorder %v4872_v30, %v4867_v3 }
 0x385   : > { %v2090_v63 = vadd.s32 %v2089_v38, %v2088_v49  ;;  %v2080_v42 = vsel %vm2072_vm3, 1, %v5778_v20  ;;  %v2008_v41 = vpop.xlane.xlu2 %2007  ;;  %v2049_v7 = vpop.xlane.xlu1 %2048  ;;  %v2027_v48 = vadd.s32 %v2026_v37, %v2024_v5 }
 0x386   : > { %v2093_v45 = vadd.s32 %v2081_v17, %v2080_v42  ;;  %v2011_v53 = vcvt.f32.s32 %v2008_v41  ;;  %v2051_v40 = vcvt.f32.s32 %v2049_v7 }
 0x387   : > { %v2091_v39 = vrot.slane %v2090_v63, 1  ;;  %vm2059_vm4 = vcmp.ge.s32.totalorder %v2027_v48, %v4530_v29 }
 0x388   : > { %v2094_v14 = vrot.slane %v2093_v45, 4  ;;  %v2014_v12 = vadd.s32 %v2013_v4, %v2011_v53  ;;  %vm2075_vm15 = vmand %vm2059_vm4, %vm2067_vm8  ;;  %v2052_v57 = vshll.u32 %v2051_v40, 16 }
 0x389   : > { %v2092_v35 = vadd.s32 %v2091_v39, %v2090_v63  ;;  %v2083_v9 = vsel %vm2075_vm15, 1, %v5778_v20 }
 0x38a   : > { %v2095_v32 = vadd.s32 %v2094_v14, %v2093_v45  ;;  %vm2058_vm10 = vcmp.ge.s32.totalorder %v2014_v12, %v4530_v29 }
 0x38b   : > { %v2114_v31 = vmul.u32 65536, %v2092_v35  ;;  %vm2074_vm6 = vmand %vm2058_vm10, %vm2066_vm9 }
 0x38c   : > { %v2096_v25 = vrot.slane %v2095_v32, 2  ;;  %v2082_v23 = vsel %vm2074_vm6, 1, %v5778_v20 }
 0x38d   : > { %v4921_v21 = vadd.s32 %v2114_v31, %v4783_v1  ;;  %v2100_v27 = vadd.s32 %v2083_v9, %v2082_v23  ;;  %v2047_v22 = vpop.xlane.xlu2 %2046  ;;  %v2034_v6 = vpop.xlane.xlu1 %2033 }
 0x38e   : > { %v2097_v49 = vadd.s32 %v2096_v25, %v2095_v32  ;;  %v2050_v8 = vcvt.f32.s32 %v2047_v22  ;;  %v2037_v38 = vcvt.f32.s32 %v2034_v6 }
 0x38f   : > { %v2101_v37 = vrot.slane %v2100_v27, 4  ;;  %v4927_v5 = vadd.s32 %v4914_v51, %v4921_v21  ;;  %v4931_v1 = vadd.s32 %v4917_v15, %v4921_v21 }
 0x390   : > { %v2098_v17 = vrot.slane %v2097_v49, 1  ;;  %v2053_v63 = vadd.s32 %v2052_v57, %v2050_v8  ;;  %v2040_v42 = vadd.s32 %v2039_v44, %v2037_v38 }
 0x391   : > { %v2102_v41 = vadd.s32 %v2101_v37, %v2100_v27  ;;  %vm2134_vm14 = vcmp.ge.s32.totalorder %v4246_v11, %v4927_v5  ;;  %vm2135_vm2 = vcmp.ge.s32.totalorder %v4258_v33, %v4927_v5  ;;  %vm2132_vm3 = vcmp.ge.s32.totalorder %v4246_v11, %v4931_v1 }
 0x392   : > { %v2099_v7 = vadd.s32 %v2098_v17, %v2097_v49  ;;  %vm2061_vm8 = vcmp.ge.s32.totalorder %v2053_v63, %v4532_v16  ;;  %vm2060_vm4 = vcmp.ge.s32.totalorder %v2040_v42, %v4532_v16  ;;  %v2150_v48 = vsel %vm2134_vm14, 1, %v5778_v20 }
 0x393   : > { %v2103_v4 = vrot.slane %v2102_v41, 2  ;;  %vm2077_vm15 = vmand %vm2061_vm8, %vm2069_vm11  ;;  %v2151_v45 = vsel %vm2135_vm2, 1, %v5778_v20  ;;  %vm2133_vm9 = vcmp.ge.s32.totalorder %v4258_v33, %v4931_v1  ;;  %v2148_v53 = vsel %vm2132_vm3, 1, %v5778_v20 }
 0x394   : > { %v2115_v39 = vmul.u32 65536, %v2099_v7  ;;  %v2085_v14 = vsel %vm2077_vm15, 1, %v5778_v20  ;;  %vm2076_vm10 = vmand %vm2060_vm4, %vm2068_vm13  ;;  %v2177_v12 = vadd.s32 %v2151_v45, %v2150_v48  ;;  %v2149_v35 = vsel %vm2133_vm9, 1, %v5778_v20 }
 0x395   : > { %v2104_v55 = vadd.s32 %v2103_v4, %v2102_v41  ;;  %v2084_v60 = vsel %vm2076_vm10, 1, %v5778_v20  ;;  %v2164_v32 = vadd.s32 %v2149_v35, %v2148_v53 }
 0x396   : > { %v4958_v40 = vadd.s32 %v2115_v39, %v4820_v56  ;;  %v2107_v9 = vadd.s32 %v2085_v14, %v2084_v60  ;;  %v2179_v31 = vshrl.u32 %v2177_v12, 16 }
 0x397   : > { %v2105_v25 = vrot.slane %v2104_v55, 1  ;;  %v2166_v23 = vshrl.u32 %v2164_v32, 16  ;;  %v2165_v57 = vand.u32 65535, %v2164_v32 }
 0x398   : > { %v2108_v44 = vrot.slane %v2107_v9, 4  ;;  %v2181_v27 = vcvt.s32.f32 %v2179_v31  ;;  %v4962_v30 = vadd.s32 %v4917_v15, %v4958_v40  ;;  %v4966_v22 = vadd.s32 %v4914_v51, %v4958_v40 }
 0x399   : > { %v2106_v6 = vadd.s32 %v2105_v25, %v2104_v55  ;;  %v2168_v49 = vcvt.s32.f32 %v2166_v23  ;;  %v2167_v60 = vcvt.s32.f32 %v2165_v57 }
 0x39a   : > { %v2109_v8 = vadd.s32 %v2108_v44, %v2107_v9  ;;  %2184 = vadd.xlane.f32.xlu1 %v2181_v27  ;;  %vm2136_vm6 = vcmp.ge.s32.totalorder %v4276_v43, %v4962_v30  ;;  %vm2137_vm11 = vcmp.ge.s32.totalorder %v4283_v13, %v4962_v30  ;;  %vm2138_vm13 = vcmp.ge.s32.totalorder %v4276_v43, %v4966_v22 }
 0x39b   : > { %v2116_v56 = vmul.u32 65536, %v2106_v6  ;;  %2171 = vadd.xlane.f32.xlu0 %v2168_v49  ;;  %v2152_v38 = vsel %vm2136_vm6, 1, %v5778_v20  ;;  %v2153_v37 = vsel %vm2137_vm11, 1, %v5778_v20  ;;  %vm2139_vm14 = vcmp.ge.s32.totalorder %v4283_v13, %v4966_v22 }
 0x39c   : > { %v2110_v17 = vrot.slane %v2109_v8, 2  ;;  %v2190_v63 = vadd.s32 %v2153_v37, %v2152_v38  ;;  %v2154_v42 = vsel %vm2138_vm13, 1, %v5778_v20  ;;  %v2155_v41 = vsel %vm2139_vm14, 1, %v5778_v20 }
 0x39d   : > { %v4981_v7 = vadd.s32 %v2116_v56, %v4843_v54  ;;  %v2203_v48 = vadd.s32 %v2155_v41, %v2154_v42  ;;  %v2178_v6 = vand.u32 65535, %v2177_v12  ;;  %vm2276_vm13 = vcmp.gt.s32.totalorder %v4931_v1, %v4921_v21 }
 0x39e   : > { %v2111_v4 = vadd.s32 %v2110_v17, %v2109_v8  ;;  %v2192_v45 = vshrl.u32 %v2190_v63, 16 }
 0x39f   : > { %v2205_v53 = vshrl.u32 %v2203_v48, 16  ;;  %v4985_v39 = vadd.s32 %v4914_v51, %v4981_v7  ;;  %v4989_v14 = vadd.s32 %v4917_v15, %v4981_v7  ;;  %v2180_v37 = vcvt.s32.f32 %v2178_v6 }
 0x3a0   : > { %v2112_v35 = vrot.slane %v2111_v4, 1  ;;  %v2194_v55 = vcvt.s32.f32 %v2192_v45 }
 0x3a1   : > { %v2207_v32 = vcvt.s32.f32 %v2205_v53  ;;  %vm2142_vm2 = vcmp.ge.s32.totalorder %v4378_v18, %v4985_v39  ;;  %vm2143_vm3 = vcmp.ge.s32.totalorder %v4381_v36, %v4985_v39  ;;  %vm2140_vm8 = vcmp.ge.s32.totalorder %v4378_v18, %v4989_v14 }
 0x3a2   : > { %v2113_v54 = vadd.s32 %v2112_v35, %v2111_v4  ;;  %2197 = vadd.xlane.f32.xlu2 %v2194_v55  ;;  %2169 = vadd.xlane.f32.xlu1 %v2167_v60  ;;  %v2158_v9 = vsel %vm2142_vm2, 1, %v5778_v20  ;;  %v2159_v31 = vsel %vm2143_vm3, 1, %v5778_v20  ;;  %vm2141_vm4 = vcmp.ge.s32.totalorder %v4381_v36, %v4989_v14 }
 0x3a3   : > { %2210 = vadd.xlane.f32.xlu0 %v2207_v32  ;;  %v2229_v25 = vadd.s32 %v2159_v31, %v2158_v9  ;;  %v2156_v23 = vsel %vm2140_vm8, 1, %v5778_v20  ;;  %v2157_v44 = vsel %vm2141_vm4, 1, %v5778_v20  ;;  %v2204_v4 = vand.u32 65535, %v2203_v48 }
 0x3a4   : > { %v2117_v27 = vmul.u32 65536, %v2113_v54  ;;  %v2216_v49 = vadd.s32 %v2157_v44, %v2156_v23  ;;  %vm2277_vm2 = vcmp.gt.s32.totalorder %v4927_v5, %v4921_v21  ;;  %vm2278_vm4 = vcmp.gt.s32.totalorder %v4962_v30, %v4958_v40 }
 0x3a5   : > { %v2231_v57 = vshrl.u32 %v2229_v25, 16  ;;  %v2206_v54 = vcvt.s32.f32 %v2204_v4  ;;  %v2230_v31 = vand.u32 65535, %v2229_v25 }
 0x3a6   : > { %v5004_v8 = vadd.s32 %v2117_v27, %v4867_v3  ;;  %v2218_v56 = vshrl.u32 %v2216_v49, 16  ;;  %v2217_v23 = vand.u32 65535, %v2216_v49 }
 0x3a7   : > { %v2233_v38 = vcvt.s32.f32 %v2231_v57  ;;  %v2232_v27 = vcvt.s32.f32 %v2230_v31 }
 0x3a8   : > { %v2220_v17 = vcvt.s32.f32 %v2218_v56  ;;  %v5008_v42 = vadd.s32 %v4917_v15, %v5004_v8  ;;  %v5012_v41 = vadd.s32 %v4914_v51, %v5004_v8  ;;  %v2191_v51 = vand.u32 65535, %v2190_v63 }
 0x3a9   : > { %v2219_v63 = vcvt.s32.f32 %v2217_v23 }
 0x3aa   : > { %2182 = vadd.xlane.f32.xlu2 %v2180_v37  ;;  %2236 = vadd.xlane.f32.xlu1 %v2233_v38  ;;  %vm2144_vm15 = vcmp.ge.s32.totalorder %v4423_v19, %v5008_v42  ;;  %vm2145_vm9 = vcmp.ge.s32.totalorder %v4426_v58, %v5008_v42  ;;  %vm2146_vm10 = vcmp.ge.s32.totalorder %v4423_v19, %v5012_v41  ;;  %v2193_v55 = vcvt.s32.f32 %v2191_v51 }
 0x3ab   : > { %2223 = vadd.xlane.f32.xlu0 %v2220_v17  ;;  %v2160_v3 = vsel %vm2144_vm15, 1, %v5778_v20  ;;  %v2161_v15 = vsel %vm2145_vm9, 1, %v5778_v20  ;;  %vm2147_vm6 = vcmp.ge.s32.totalorder %v4426_v58, %v5012_v41  ;;  %v2162_v45 = vsel %vm2146_vm10, 1, %v5778_v20 }
 0x3ac   : > { %v2242_v12 = vadd.s32 %v2161_v15, %v2160_v3  ;;  %v2163_v53 = vsel %vm2147_vm6, 1, %v5778_v20  ;;  %vm2279_vm10 = vcmp.gt.s32.totalorder %v4966_v22, %v4958_v40 }
 0x3ad   : > { %v2255_v32 = vadd.s32 %v2163_v53, %v2162_v45 }
 0x3ae   : > { %v2244_v35 = vshrl.u32 %v2242_v12, 16  ;;  %v2243_v48 = vand.u32 65535, %v2242_v12 }
 0x3af   : > { %v2257_v9 = vshrl.u32 %v2255_v32, 16  ;;  %v2256_v6 = vand.u32 65535, %v2255_v32 }
 0x3b0   : > { %v2246_v60 = vcvt.s32.f32 %v2244_v35  ;;  %v2245_v57 = vcvt.s32.f32 %v2243_v48 }
 0x3b1   : > { %v2259_v44 = vcvt.s32.f32 %v2257_v9  ;;  %v2258_v56 = vcvt.s32.f32 %v2256_v6 }
 0x3b2   : > { %2195 = vadd.xlane.f32.xlu2 %v2193_v55  ;;  %2249 = vadd.xlane.f32.xlu1 %v2246_v60 }
 0x3b3   : > { %2208 = vadd.xlane.f32.xlu0 %v2206_v54 }
 0x3ba   : > { %2262 = vadd.xlane.f32.xlu2 %v2259_v44  ;;  %2234 = vadd.xlane.f32.xlu1 %v2232_v27 }
 0x3bb   : > { %2221 = vadd.xlane.f32.xlu0 %v2219_v63 }
 0x3c2   : > { %2247 = vadd.xlane.f32.xlu2 %v2245_v57 }
 0x3c3   : > { %2260 = vadd.xlane.f32.xlu0 %v2258_v56 }
 0x40d   : > { %v2185_v38 = vpop.xlane.xlu1 %2184 }
 0x40e   : > { %v2172_v37 = vpop.xlane.xlu0 %2171  ;;  %v2187_v4 = vcvt.f32.s32 %v2185_v38 }
 0x40f   : > { %v2174_v17 = vcvt.f32.s32 %v2172_v37 }
 0x410   : > { %v2188_v55 = vshll.u32 %v2187_v4, 16 }
 0x411   : > { %v2175_v49 = vshll.u32 %v2174_v17, 16 }
 0x415   : > { %v2198_v3 = vpop.xlane.xlu2 %2197  ;;  %v2170_v15 = vpop.xlane.xlu1 %2169 }
 0x416   : > { %v2173_v51 = vcvt.f32.s32 %v2170_v15  ;;  %v2211_v25 = vpop.xlane.xlu0 %2210  ;;  %v2200_v54 = vcvt.f32.s32 %v2198_v3 }
 0x417   : > { %v2213_v9 = vcvt.f32.s32 %v2211_v25 }
 0x418   : > { %v2176_v45 = vadd.s32 %v2175_v49, %v2173_v51  ;;  %v2201_v48 = vshll.u32 %v2200_v54, 16 }
 0x419   : > { %v2214_v57 = vshll.u32 %v2213_v9, 16 }
 0x41a   : > { %vm2268_vm11 = vcmp.ge.s32.totalorder %v2176_v45, %v4451_v28 }
 0x41b   : > { %vm2284_vm14 = vmand %vm2268_vm11, %vm2276_vm13  ;;  %vm2281_vm13 = vcmp.gt.s32.totalorder %v4985_v39, %v4981_v7 }
 0x41c   : > { %v2292_v31 = vsel %vm2284_vm14, 1, %v5778_v20  ;;  %vm2280_vm14 = vcmp.gt.s32.totalorder %v4989_v14, %v4981_v7 }
 0x41d   : > { %v2183_v53 = vpop.xlane.xlu2 %2182  ;;  %v2237_v35 = vpop.xlane.xlu1 %2236 }
 0x41e   : > { %v2186_v12 = vcvt.f32.s32 %v2183_v53  ;;  %v2224_v60 = vpop.xlane.xlu0 %2223  ;;  %v2239_v3 = vcvt.f32.s32 %v2237_v35 }
 0x41f   : > { %v2226_v51 = vcvt.f32.s32 %v2224_v60 }
 0x420   : > { %v2189_v32 = vadd.s32 %v2188_v55, %v2186_v12  ;;  %v2240_v35 = vshll.u32 %v2239_v3, 16 }
 0x421   : > { %v2227_v60 = vshll.u32 %v2226_v51, 16 }
 0x422   : > { %vm2269_vm3 = vcmp.ge.s32.totalorder %v2189_v32, %v4451_v28 }
 0x423   : > { %vm2285_vm8 = vmand %vm2269_vm3, %vm2277_vm2 }
 0x424   : > { %v2293_v23 = vsel %vm2285_vm8, 1, %v5778_v20 }
 0x425   : > { %v2300_v44 = vadd.s32 %v2293_v23, %v2292_v31  ;;  %v2196_v27 = vpop.xlane.xlu2 %2195  ;;  %v2250_v63 = vpop.xlane.xlu1 %2249 }
 0x426   : > { %v2199_v6 = vcvt.f32.s32 %v2196_v27  ;;  %v2209_v1 = vpop.xlane.xlu0 %2208 }
 0x427   : > { %v2301_v56 = vrot.slane %v2300_v44, 4  ;;  %v2212_v38 = vcvt.f32.s32 %v2209_v1 }
 0x428   : > { %v2202_v37 = vadd.s32 %v2201_v48, %v2199_v6  ;;  %v5048_v48 = vmul.u32 256, %v4286_v61 }
 0x429   : > { %v2302_v17 = vadd.s32 %v2301_v56, %v2300_v44  ;;  %v2215_v5 = vadd.s32 %v2214_v57, %v2212_v38  ;;  %v2252_v44 = vcvt.f32.s32 %v2250_v63  ;;  %v5052_v57 = vmul.u32 256, %v3967_v50 }
 0x42a   : > { %vm2270_vm15 = vcmp.ge.s32.totalorder %v2202_v37, %v4468_v62 }
 0x42b   : > { %v2303_v15 = vrot.slane %v2302_v17, 2  ;;  %vm2286_vm9 = vmand %vm2270_vm15, %vm2278_vm4  ;;  %vm2271_vm6 = vcmp.ge.s32.totalorder %v2215_v5, %v4468_v62  ;;  %vm2282_vm15 = vcmp.gt.s32.totalorder %v5008_v42, %v5004_v8  ;;  %v2253_v37 = vshll.u32 %v2252_v44, 16 }
 0x42c   : > { %v2294_v25 = vsel %vm2286_vm9, 1, %v5778_v20  ;;  %vm2287_vm11 = vmand %vm2271_vm6, %vm2279_vm10  ;;  %vm2283_vm9 = vcmp.gt.s32.totalorder %v5012_v41, %v5004_v8 }
 0x42d   : > { %v2304_v49 = vadd.s32 %v2303_v15, %v2302_v17  ;;  %v2295_v4 = vsel %vm2287_vm11, 1, %v5778_v20  ;;  %v2263_v45 = vpop.xlane.xlu2 %2262  ;;  %v2235_v53 = vpop.xlane.xlu1 %2234 }
 0x42e   : > { %v2307_v30 = vadd.s32 %v2295_v4, %v2294_v25  ;;  %v2238_v55 = vcvt.f32.s32 %v2235_v53  ;;  %v2222_v12 = vpop.xlane.xlu0 %2221  ;;  %v2265_v1 = vcvt.f32.s32 %v2263_v45 }
 0x42f   : > { %v2305_v32 = vrot.slane %v2304_v49, 1  ;;  %v2225_v54 = vcvt.f32.s32 %v2222_v12 }
 0x430   : > { %v2308_v9 = vrot.slane %v2307_v30, 4  ;;  %v2241_v31 = vadd.s32 %v2240_v35, %v2238_v55  ;;  %v2266_v51 = vshll.u32 %v2265_v1, 16 }
 0x431   : > { %v2306_v22 = vadd.s32 %v2305_v32, %v2304_v49  ;;  %v2228_v23 = vadd.s32 %v2227_v60, %v2225_v54 }
 0x432   : > { %v2309_v27 = vadd.s32 %v2308_v9, %v2307_v30  ;;  %vm2273_vm2 = vcmp.ge.s32.totalorder %v2241_v31, %v4530_v29 }
 0x433   : > { %v2328_v6 = vmul.u32 4096, %v2306_v22  ;;  %vm2289_vm3 = vmand %vm2273_vm2, %vm2281_vm13  ;;  %vm2272_vm8 = vcmp.ge.s32.totalorder %v2228_v23, %v4530_v29 }
 0x434   : > { %v2310_v39 = vrot.slane %v2309_v27, 2  ;;  %v2297_v56 = vsel %vm2289_vm3, 1, %v5778_v20  ;;  %vm2288_vm4 = vmand %vm2272_vm8, %vm2280_vm14 }
 0x435   : > { %v5056_v14 = vadd.s32 %v2328_v6, %v4921_v21  ;;  %v2296_v63 = vsel %vm2288_vm4, 1, %v5778_v20  ;;  %v2248_v38 = vpop.xlane.xlu2 %2247 }
 0x436   : > { %v2311_v17 = vadd.s32 %v2310_v39, %v2309_v27  ;;  %v2314_v5 = vadd.s32 %v2297_v56, %v2296_v63  ;;  %v2251_v3 = vcvt.f32.s32 %v2248_v38  ;;  %v2261_v15 = vpop.xlane.xlu0 %2260 }
 0x437   : > { %v2264_v25 = vcvt.f32.s32 %v2261_v15  ;;  %v5063_v49 = vadd.s32 %v5048_v48, %v5056_v14  ;;  %v5067_v21 = vadd.s32 %v5052_v57, %v5056_v14 }
 0x438   : > { %v2312_v4 = vrot.slane %v2311_v17, 1  ;;  %v2315_v45 = vrot.slane %v2314_v5, 4  ;;  %v2254_v53 = vadd.s32 %v2253_v37, %v2251_v3 }
 0x439   : > { %v2267_v35 = vadd.s32 %v2266_v51, %v2264_v25  ;;  %vm2348_vm10 = vcmp.ge.s32.totalorder %v4246_v11, %v5063_v49  ;;  %vm2349_vm6 = vcmp.ge.s32.totalorder %v4258_v33, %v5063_v49  ;;  %vm2346_vm11 = vcmp.ge.s32.totalorder %v4246_v11, %v5067_v21 }
 0x43a   : > { %v2313_v30 = vadd.s32 %v2312_v4, %v2311_v17  ;;  %v2316_v55 = vadd.s32 %v2315_v45, %v2314_v5  ;;  %vm2274_vm13 = vcmp.ge.s32.totalorder %v2254_v53, %v4532_v16  ;;  %v2364_v12 = vsel %vm2348_vm10, 1, %v5778_v20 }
 0x43b   : > { %vm2290_vm14 = vmand %vm2274_vm13, %vm2282_vm15  ;;  %vm2275_vm2 = vcmp.ge.s32.totalorder %v2267_v35, %v4532_v16  ;;  %v2365_v32 = vsel %vm2349_vm6, 1, %v5778_v20  ;;  %vm2347_vm3 = vcmp.ge.s32.totalorder %v4258_v33, %v5067_v21  ;;  %v2362_v60 = vsel %vm2346_vm11, 1, %v5778_v20 }
 0x43c   : > { %v2329_v54 = vmul.u32 4096, %v2313_v30  ;;  %v2317_v9 = vrot.slane %v2316_v55, 2  ;;  %v2298_v31 = vsel %vm2290_vm14, 1, %v5778_v20  ;;  %vm2291_vm8 = vmand %vm2275_vm2, %vm2283_vm9  ;;  %v5091_v22 = vadd.s32 %v2365_v32, %v2364_v12 }
 0x43d   : > { %v2299_v42 = vsel %vm2291_vm8, 1, %v5778_v20  ;;  %v2363_v23 = vsel %vm2347_vm3, 1, %v5778_v20 }
 0x43e   : > { %v5096_v44 = vadd.s32 %v2329_v54, %v4958_v40  ;;  %v2318_v27 = vadd.s32 %v2317_v9, %v2316_v55  ;;  %v2321_v6 = vadd.s32 %v2299_v42, %v2298_v31  ;;  %v2393_v1 = vshrl.u32 %v5091_v22, 16 }
 0x43f   : > { %v2378_v39 = vadd.s32 %v2363_v23, %v2362_v60 }
 0x440   : > { %v2319_v56 = vrot.slane %v2318_v27, 1  ;;  %v2322_v63 = vrot.slane %v2321_v6, 4  ;;  %v2395_v38 = vcvt.s32.f32 %v2393_v1  ;;  %v5101_v41 = vadd.s32 %v5048_v48, %v5096_v44 }
 0x441   : > { %v2380_v37 = vshrl.u32 %v2378_v39, 16  ;;  %v5105_v17 = vadd.s32 %v5052_v57, %v5096_v44  ;;  %v2379_v15 = vand.u32 65535, %v2378_v39 }
 0x442   : > { %v2320_v5 = vadd.s32 %v2319_v56, %v2318_v27  ;;  %v2323_v40 = vadd.s32 %v2322_v63, %v2321_v6  ;;  %2398 = vadd.xlane.f32.xlu2 %v2395_v38  ;;  %vm2352_vm4 = vcmp.ge.s32.totalorder %v4276_v43, %v5101_v41  ;;  %vm2353_vm15 = vcmp.ge.s32.totalorder %v4283_v13, %v5101_v41 }
 0x443   : > { %v2382_v3 = vcvt.s32.f32 %v2380_v37  ;;  %v2368_v51 = vsel %vm2352_vm4, 1, %v5778_v20  ;;  %v2369_v25 = vsel %vm2353_vm15, 1, %v5778_v20  ;;  %vm2350_vm9 = vcmp.ge.s32.totalorder %v4276_v43, %v5105_v17 }
 0x444   : > { %v2330_v4 = vmul.u32 4096, %v2320_v5  ;;  %v2324_v45 = vrot.slane %v2323_v40, 2  ;;  %v2417_v53 = vadd.s32 %v2369_v25, %v2368_v51  ;;  %vm2351_vm10 = vcmp.ge.s32.totalorder %v4283_v13, %v5105_v17 }
 0x445   : > { %2385 = vadd.xlane.f32.xlu1 %v2382_v3  ;;  %v2366_v35 = vsel %vm2350_vm9, 1, %v5778_v20  ;;  %v2367_v32 = vsel %vm2351_vm10, 1, %v5778_v20  ;;  %v2381_v9 = vcvt.s32.f32 %v2379_v15  ;;  %v2392_v15 = vand.u32 65535, %v5091_v22 }
 0x446   : > { %v5119_v30 = vadd.s32 %v2330_v4, %v4981_v7  ;;  %v2325_v55 = vadd.s32 %v2324_v45, %v2323_v40  ;;  %v2419_v12 = vshrl.u32 %v2417_v53, 16  ;;  %v2404_v60 = vadd.s32 %v2367_v32, %v2366_v35 }
 0x447   : > { %v2418_v32 = vand.u32 65535, %v2417_v53  ;;  %vm2490_vm9 = vcmp.gt.s32.totalorder %v5067_v21, %v5056_v14 }
 0x448   : > { %v2326_v54 = vrot.slane %v2325_v55, 1  ;;  %v5124_v31 = vadd.s32 %v5048_v48, %v5119_v30  ;;  %v5128_v42 = vadd.s32 %v5052_v57, %v5119_v30  ;;  %v2421_v23 = vcvt.s32.f32 %v2419_v12 }
 0x449   : > { %v2406_v27 = vshrl.u32 %v2404_v60, 16 }
 0x44a   : > { %v2327_v6 = vadd.s32 %v2326_v54, %v2325_v55  ;;  %2383 = vadd.xlane.f32.xlu2 %v2381_v9  ;;  %vm2356_vm6 = vcmp.ge.s32.totalorder %v4378_v18, %v5124_v31  ;;  %vm2357_vm11 = vcmp.ge.s32.totalorder %v4381_v36, %v5124_v31  ;;  %vm2354_vm13 = vcmp.ge.s32.totalorder %v4378_v18, %v5128_v42 }
 0x44b   : > { %v2408_v7 = vcvt.s32.f32 %v2406_v27  ;;  %v2372_v1 = vsel %vm2356_vm6, 1, %v5778_v20  ;;  %v2373_v39 = vsel %vm2357_vm11, 1, %v5778_v20  ;;  %vm2355_vm14 = vcmp.ge.s32.totalorder %v4381_v36, %v5128_v42 }
 0x44c   : > { %v2331_v56 = vmul.u32 4096, %v2327_v6  ;;  %v2443_v63 = vadd.s32 %v2373_v39, %v2372_v1  ;;  %v2370_v38 = vsel %vm2354_vm13, 1, %v5778_v20  ;;  %v2371_v37 = vsel %vm2355_vm14, 1, %v5778_v20 }
 0x44d   : > { %2424 = vadd.xlane.f32.xlu1 %v2421_v23  ;;  %2411 = vadd.xlane.f32.xlu0 %v2408_v7  ;;  %v2430_v5 = vadd.s32 %v2371_v37, %v2370_v38  ;;  %v2420_v6 = vcvt.s32.f32 %v2418_v32  ;;  %vm2491_vm6 = vcmp.gt.s32.totalorder %v5063_v49, %v5056_v14  ;;  %vm2493_vm14 = vcmp.gt.s32.totalorder %v5101_v41, %v5096_v44 }
 0x44e   : > { %v5143_v40 = vadd.s32 %v2331_v56, %v5004_v8  ;;  %v2445_v3 = vshrl.u32 %v2443_v63, 16  ;;  %v2394_v8 = vcvt.s32.f32 %v2392_v15  ;;  %v2444_v1 = vand.u32 65535, %v2443_v63 }
 0x44f   : > { %v2432_v51 = vshrl.u32 %v2430_v5, 16  ;;  %v2431_v39 = vand.u32 65535, %v2430_v5 }
 0x450   : > { %v2447_v25 = vcvt.s32.f32 %v2445_v3  ;;  %v5148_v4 = vadd.s32 %v5052_v57, %v5143_v40  ;;  %v5152_v35 = vadd.s32 %v5048_v48, %v5143_v40  ;;  %v2405_v57 = vand.u32 65535, %v2404_v60 }
 0x451   : > { %v2434_v45 = vcvt.s32.f32 %v2432_v51  ;;  %v2446_v38 = vcvt.s32.f32 %v2444_v1  ;;  %v2433_v37 = vcvt.s32.f32 %v2431_v39 }
 0x452   : > { %2450 = vadd.xlane.f32.xlu2 %v2447_v25  ;;  %vm2358_vm2 = vcmp.ge.s32.totalorder %v4423_v19, %v5148_v4  ;;  %vm2359_vm3 = vcmp.ge.s32.totalorder %v4426_v58, %v5148_v4  ;;  %vm2360_vm8 = vcmp.ge.s32.totalorder %v4423_v19, %v5152_v35  ;;  %vm2361_vm4 = vcmp.ge.s32.totalorder %v4426_v58, %v5152_v35 }
 0x453   : > { %v2374_v22 = vsel %vm2358_vm2, 1, %v5778_v20  ;;  %v2375_v55 = vsel %vm2359_vm3, 1, %v5778_v20  ;;  %v2376_v9 = vsel %vm2360_vm8, 1, %v5778_v20  ;;  %v2377_v23 = vsel %vm2361_vm4, 1, %v5778_v20 }
 0x454   : > { %v2456_v12 = vadd.s32 %v2375_v55, %v2374_v22  ;;  %v2407_v27 = vcvt.s32.f32 %v2405_v57  ;;  %v2469_v7 = vadd.s32 %v2377_v23, %v2376_v9  ;;  %vm2492_vm4 = vcmp.gt.s32.totalorder %v5105_v17, %v5096_v44 }
 0x455   : > { %2396 = vadd.xlane.f32.xlu0 %v2394_v8  ;;  %2437 = vadd.xlane.f32.xlu1 %v2434_v45 }
 0x456   : > { %v2458_v48 = vshrl.u32 %v2456_v12, 16  ;;  %v2471_v56 = vshrl.u32 %v2469_v7, 16  ;;  %v2470_v53 = vand.u32 65535, %v2469_v7  ;;  %v2457_v60 = vand.u32 65535, %v2456_v12 }
 0x458   : > { %v2460_v54 = vcvt.s32.f32 %v2458_v48  ;;  %v2473_v3 = vcvt.s32.f32 %v2471_v56  ;;  %v2472_v15 = vcvt.s32.f32 %v2470_v53  ;;  %v2459_v51 = vcvt.s32.f32 %v2457_v60 }
 0x45a   : > { %2463 = vadd.xlane.f32.xlu2 %v2460_v54 }
 0x45d   : > { %2409 = vadd.xlane.f32.xlu0 %v2407_v27  ;;  %2422 = vadd.xlane.f32.xlu1 %v2420_v6 }
 0x462   : > { %2448 = vadd.xlane.f32.xlu2 %v2446_v38 }
 0x465   : > { %2435 = vadd.xlane.f32.xlu1 %v2433_v37  ;;  %2476 = vadd.xlane.f32.xlu0 %v2473_v3 }
 0x46d   : > { %2474 = vadd.xlane.f32.xlu1 %v2472_v15  ;;  %2461 = vadd.xlane.f32.xlu0 %v2459_v51 }
 0x4b5   : > { %v2399_v25 = vpop.xlane.xlu2 %2398 }
 0x4b6   : > { %v2401_v57 = vcvt.f32.s32 %v2399_v25 }
 0x4b8   : > { %v2386_v45 = vpop.xlane.xlu1 %2385  ;;  %v2402_v27 = vshll.u32 %v2401_v57, 16 }
 0x4b9   : > { %v2388_v63 = vcvt.f32.s32 %v2386_v45 }
 0x4bb   : > { %v2389_v48 = vshll.u32 %v2388_v63, 16 }
 0x4bd   : > { %v2384_v8 = vpop.xlane.xlu2 %2383 }
 0x4be   : > { %v2387_v5 = vcvt.f32.s32 %v2384_v8 }
 0x4c0   : > { %v2425_v22 = vpop.xlane.xlu1 %2424  ;;  %v2412_v55 = vpop.xlane.xlu0 %2411  ;;  %v2390_v32 = vadd.s32 %v2389_v48, %v2387_v5 }
 0x4c1   : > { %v2427_v7 = vcvt.f32.s32 %v2425_v22  ;;  %v2414_v1 = vcvt.f32.s32 %v2412_v55 }
 0x4c2   : > { %vm2482_vm15 = vcmp.ge.s32.totalorder %v2390_v32, %v4451_v28 }
 0x4c3   : > { %vm2498_vm10 = vmand %vm2482_vm15, %vm2490_vm9  ;;  %v2428_v60 = vshll.u32 %v2427_v7, 16  ;;  %v2415_v21 = vshll.u32 %v2414_v1, 16  ;;  %vm2495_vm9 = vcmp.gt.s32.totalorder %v5124_v31, %v5119_v30  ;;  %v5190_v31 = vmul.u32 16, %v4286_v61 }
 0x4c4   : > { %v2506_v56 = vsel %vm2498_vm10, 1, %v5778_v20 }
 0x4c5   : > { %v2451_v54 = vpop.xlane.xlu2 %2450 }
 0x4c6   : > { %v2453_v25 = vcvt.f32.s32 %v2451_v54 }
 0x4c8   : > { %v2438_v9 = vpop.xlane.xlu1 %2437  ;;  %v2397_v23 = vpop.xlane.xlu0 %2396  ;;  %v2454_v5 = vshll.u32 %v2453_v25, 16 }
 0x4c9   : > { %v2400_v12 = vcvt.f32.s32 %v2397_v23  ;;  %v2440_v22 = vcvt.f32.s32 %v2438_v9 }
 0x4cb   : > { %v2403_v6 = vadd.s32 %v2402_v27, %v2400_v12  ;;  %v2441_v12 = vshll.u32 %v2440_v22, 16 }
 0x4cd   : > { %vm2483_vm11 = vcmp.ge.s32.totalorder %v2403_v6, %v4451_v28  ;;  %v2464_v39 = vpop.xlane.xlu2 %2463 }
 0x4ce   : > { %vm2499_vm13 = vmand %vm2483_vm11, %vm2491_vm6  ;;  %vm2494_vm11 = vcmp.gt.s32.totalorder %v5128_v42, %v5119_v30 }
 0x4cf   : > { %v2507_v38 = vsel %vm2499_vm13, 1, %v5778_v20 }
 0x4d0   : > { %v2514_v37 = vadd.s32 %v2507_v38, %v2506_v56  ;;  %v2423_v3 = vpop.xlane.xlu1 %2422  ;;  %v2410_v53 = vpop.xlane.xlu0 %2409 }
 0x4d1   : > { %v2426_v15 = vcvt.f32.s32 %v2423_v3  ;;  %v2413_v51 = vcvt.f32.s32 %v2410_v53 }
 0x4d2   : > { %v2515_v45 = vrot.slane %v2514_v37, 4 }
 0x4d3   : > { %v2429_v8 = vadd.s32 %v2428_v60, %v2426_v15  ;;  %v2416_v63 = vadd.s32 %v2415_v21, %v2413_v51  ;;  %v5193_v15 = vmul.u32 16, %v3967_v50 }
 0x4d4   : > { %v2516_v49 = vadd.s32 %v2515_v45, %v2514_v37  ;;  %v2466_v37 = vcvt.f32.s32 %v2464_v39 }
 0x4d5   : > { %vm2485_vm2 = vcmp.ge.s32.totalorder %v2429_v8, %v4468_v62  ;;  %vm2484_vm3 = vcmp.ge.s32.totalorder %v2416_v63, %v4468_v62  ;;  %v2449_v55 = vpop.xlane.xlu2 %2448 }
 0x4d6   : > { %v2517_v48 = vrot.slane %v2516_v49, 2  ;;  %vm2501_vm8 = vmand %vm2485_vm2, %vm2493_vm14  ;;  %v2452_v57 = vcvt.f32.s32 %v2449_v55  ;;  %v2467_v42 = vshll.u32 %v2466_v37, 16  ;;  %vm2497_vm2 = vcmp.gt.s32.totalorder %v5152_v35, %v5143_v40 }
 0x4d7   : > { %v2509_v32 = vsel %vm2501_vm8, 1, %v5778_v20  ;;  %vm2500_vm15 = vmand %vm2484_vm3, %vm2492_vm4  ;;  %vm2496_vm3 = vcmp.gt.s32.totalorder %v5148_v4, %v5143_v40 }
 0x4d8   : > { %v2518_v54 = vadd.s32 %v2517_v48, %v2516_v49  ;;  %v2508_v9 = vsel %vm2500_vm15, 1, %v5778_v20  ;;  %v2436_v23 = vpop.xlane.xlu1 %2435  ;;  %v2455_v41 = vadd.s32 %v2454_v5, %v2452_v57  ;;  %v2477_v27 = vpop.xlane.xlu0 %2476 }
 0x4d9   : > { %v2521_v6 = vadd.s32 %v2509_v32, %v2508_v9  ;;  %v2439_v7 = vcvt.f32.s32 %v2436_v23  ;;  %v2479_v60 = vcvt.f32.s32 %v2477_v27 }
 0x4da   : > { %v2519_v1 = vrot.slane %v2518_v54, 1  ;;  %vm2487_vm10 = vcmp.ge.s32.totalorder %v2455_v41, %v4530_v29 }
 0x4db   : > { %v2522_v17 = vrot.slane %v2521_v6, 4  ;;  %v2442_v56 = vadd.s32 %v2441_v12, %v2439_v7  ;;  %vm2503_vm6 = vmand %vm2487_vm10, %vm2495_vm9  ;;  %v2480_v22 = vshll.u32 %v2479_v60, 16 }
 0x4dc   : > { %v2520_v38 = vadd.s32 %v2519_v1, %v2518_v54  ;;  %v2511_v53 = vsel %vm2503_vm6, 1, %v5778_v20 }
 0x4dd   : > { %v2523_v3 = vadd.s32 %v2522_v17, %v2521_v6  ;;  %vm2486_vm13 = vcmp.ge.s32.totalorder %v2442_v56, %v4530_v29 }
 0x4de   : > { %v2542_v21 = vmul.u32 256, %v2520_v38  ;;  %vm2502_vm14 = vmand %vm2486_vm13, %vm2494_vm11 }
 0x4df   : > { %v2524_v51 = vrot.slane %v2523_v3, 2  ;;  %v2510_v39 = vsel %vm2502_vm14, 1, %v5778_v20 }
 0x4e0   : > { %v5197_v25 = vadd.s32 %v2542_v21, %v5056_v14  ;;  %v2528_v45 = vadd.s32 %v2511_v53, %v2510_v39  ;;  %v2475_v8 = vpop.xlane.xlu1 %2474  ;;  %v2462_v63 = vpop.xlane.xlu0 %2461 }
 0x4e1   : > { %v2525_v49 = vadd.s32 %v2524_v51, %v2523_v3  ;;  %v2478_v55 = vcvt.f32.s32 %v2475_v8  ;;  %v2465_v5 = vcvt.f32.s32 %v2462_v63 }
 0x4e2   : > { %v2529_v48 = vrot.slane %v2528_v45, 4  ;;  %v5203_v57 = vadd.s32 %v5190_v31, %v5197_v25  ;;  %v5207_v14 = vadd.s32 %v5193_v15, %v5197_v25 }
 0x4e3   : > { %v2526_v32 = vrot.slane %v2525_v49, 1  ;;  %v2481_v54 = vadd.s32 %v2480_v22, %v2478_v55  ;;  %v2468_v9 = vadd.s32 %v2467_v42, %v2465_v5 }
 0x4e4   : > { %v2530_v23 = vadd.s32 %v2529_v48, %v2528_v45  ;;  %vm2562_vm8 = vcmp.ge.s32.totalorder %v4246_v11, %v5203_v57  ;;  %vm2563_vm4 = vcmp.ge.s32.totalorder %v4258_v33, %v5203_v57  ;;  %vm2560_vm15 = vcmp.ge.s32.totalorder %v4246_v11, %v5207_v14 }
 0x4e5   : > { %v2527_v41 = vadd.s32 %v2526_v32, %v2525_v49  ;;  %vm2489_vm9 = vcmp.ge.s32.totalorder %v2481_v54, %v4532_v16  ;;  %vm2488_vm10 = vcmp.ge.s32.totalorder %v2468_v9, %v4532_v16  ;;  %v2578_v27 = vsel %vm2562_vm8, 1, %v5778_v20 }
 0x4e6   : > { %v2531_v12 = vrot.slane %v2530_v23, 2  ;;  %vm2505_vm6 = vmand %vm2489_vm9, %vm2497_vm2  ;;  %v2579_v6 = vsel %vm2563_vm4, 1, %v5778_v20  ;;  %vm2561_vm11 = vcmp.ge.s32.totalorder %v4258_v33, %v5207_v14  ;;  %v2576_v7 = vsel %vm2560_vm15, 1, %v5778_v20 }
 0x4e7   : > { %v2543_v1 = vmul.u32 256, %v2527_v41  ;;  %v2513_v17 = vsel %vm2505_vm6, 1, %v5778_v20  ;;  %vm2504_vm13 = vmand %vm2488_vm10, %vm2496_vm3  ;;  %v5231_v56 = vadd.s32 %v2579_v6, %v2578_v27  ;;  %v2577_v38 = vsel %vm2561_vm11, 1, %v5778_v20 }
 0x4e8   : > { %v2532_v35 = vadd.s32 %v2531_v12, %v2530_v23  ;;  %v2512_v37 = vsel %vm2504_vm13, 1, %v5778_v20  ;;  %v2592_v3 = vadd.s32 %v2577_v38, %v2576_v7 }
 0x4e9   : > { %v5236_v53 = vadd.s32 %v2543_v1, %v5096_v44  ;;  %v2535_v60 = vadd.s32 %v2513_v17, %v2512_v37  ;;  %v2607_v21 = vshrl.u32 %v5231_v56, 16 }
 0x4ea   : > { %v2533_v51 = vrot.slane %v2532_v35, 1  ;;  %v2594_v39 = vshrl.u32 %v2592_v3, 16  ;;  %v2593_v22 = vand.u32 65535, %v2592_v3 }
 0x4eb   : > { %v2536_v42 = vrot.slane %v2535_v60, 4  ;;  %v2609_v45 = vcvt.s32.f32 %v2607_v21  ;;  %v5241_v4 = vadd.s32 %v5190_v31, %v5236_v53  ;;  %v5245_v8 = vadd.s32 %v5193_v15, %v5236_v53 }
 0x4ec   : > { %v2534_v63 = vadd.s32 %v2533_v51, %v2532_v35  ;;  %v2596_v49 = vcvt.s32.f32 %v2594_v39  ;;  %v2595_v35 = vcvt.s32.f32 %v2593_v22  ;;  %v2606_v22 = vand.u32 65535, %v5231_v56 }
 0x4ed   : > { %v2537_v44 = vadd.s32 %v2536_v42, %v2535_v60  ;;  %2612 = vadd.xlane.f32.xlu0 %v2609_v45  ;;  %vm2566_vm14 = vcmp.ge.s32.totalorder %v4276_v43, %v5241_v4  ;;  %vm2567_vm2 = vcmp.ge.s32.totalorder %v4283_v13, %v5241_v4  ;;  %vm2564_vm3 = vcmp.ge.s32.totalorder %v4276_v43, %v5245_v8 }
 0x4ee   : > { %v2544_v55 = vmul.u32 256, %v2534_v63  ;;  %2599 = vadd.xlane.f32.xlu2 %v2596_v49  ;;  %v2582_v5 = vsel %vm2566_vm14, 1, %v5778_v20  ;;  %v2583_v48 = vsel %vm2567_vm2, 1, %v5778_v20  ;;  %vm2565_vm8 = vcmp.ge.s32.totalorder %v4283_v13, %v5245_v8 }
 0x4ef   : > { %v2538_v32 = vrot.slane %v2537_v44, 2  ;;  %v2631_v54 = vadd.s32 %v2583_v48, %v2582_v5  ;;  %v2580_v9 = vsel %vm2564_vm3, 1, %v5778_v20  ;;  %v2581_v23 = vsel %vm2565_vm8, 1, %v5778_v20 }
 0x4f0   : > { %v5260_v41 = vadd.s32 %v2544_v55, %v5119_v30  ;;  %v2618_v27 = vadd.s32 %v2581_v23, %v2580_v9  ;;  %v2608_v23 = vcvt.s32.f32 %v2606_v22  ;;  %vm2704_vm3 = vcmp.gt.s32.totalorder %v5207_v14, %v5197_v25 }
 0x4f1   : > { %v2539_v12 = vadd.s32 %v2538_v32, %v2537_v44  ;;  %v2633_v6 = vshrl.u32 %v2631_v54, 16 }
 0x4f2   : > { %v2620_v7 = vshrl.u32 %v2618_v27, 16  ;;  %v5264_v1 = vadd.s32 %v5190_v31, %v5260_v41  ;;  %v5268_v17 = vadd.s32 %v5193_v15, %v5260_v41 }
 0x4f3   : > { %v2540_v38 = vrot.slane %v2539_v12, 1  ;;  %v2635_v37 = vcvt.s32.f32 %v2633_v6 }
 0x4f4   : > { %v2622_v3 = vcvt.s32.f32 %v2620_v7  ;;  %vm2570_vm4 = vcmp.ge.s32.totalorder %v4378_v18, %v5264_v1  ;;  %vm2571_vm15 = vcmp.ge.s32.totalorder %v4381_v36, %v5264_v1  ;;  %vm2568_vm9 = vcmp.ge.s32.totalorder %v4378_v18, %v5268_v17 }
 0x4f5   : > { %v2541_v30 = vadd.s32 %v2540_v38, %v2539_v12  ;;  %2597 = vadd.xlane.f32.xlu0 %v2595_v35  ;;  %v2586_v60 = vsel %vm2570_vm4, 1, %v5778_v20  ;;  %v2587_v21 = vsel %vm2571_vm15, 1, %v5778_v20  ;;  %vm2569_vm10 = vcmp.ge.s32.totalorder %v4381_v36, %v5268_v17 }
 0x4f6   : > { %2638 = vadd.xlane.f32.xlu2 %v2635_v37  ;;  %2625 = vadd.xlane.f32.xlu1 %v2622_v3  ;;  %v2657_v51 = vadd.s32 %v2587_v21, %v2586_v60  ;;  %v2584_v39 = vsel %vm2568_vm9, 1, %v5778_v20  ;;  %v2585_v42 = vsel %vm2569_vm10, 1, %v5778_v20  ;;  %v2619_v12 = vand.u32 65535, %v2618_v27 }
 0x4f7   : > { %v2545_v45 = vmul.u32 256, %v2541_v30  ;;  %v2644_v63 = vadd.s32 %v2585_v42, %v2584_v39  ;;  %vm2705_vm4 = vcmp.gt.s32.totalorder %v5203_v57, %v5197_v25  ;;  %vm2707_vm10 = vcmp.gt.s32.totalorder %v5241_v4, %v5236_v53 }
 0x4f8   : > { %v2659_v49 = vshrl.u32 %v2657_v51, 16  ;;  %v2621_v3 = vcvt.s32.f32 %v2619_v12  ;;  %v2658_v60 = vand.u32 65535, %v2657_v51 }
 0x4f9   : > { %v5284_v44 = vadd.s32 %v2545_v45, %v5143_v40  ;;  %v2646_v55 = vshrl.u32 %v2644_v63, 16  ;;  %v2645_v21 = vand.u32 65535, %v2644_v63 }
 0x4fa   : > { %v2661_v5 = vcvt.s32.f32 %v2659_v49  ;;  %v2660_v42 = vcvt.s32.f32 %v2658_v60 }
 0x4fb   : > { %v2648_v48 = vcvt.s32.f32 %v2646_v55  ;;  %v5288_v32 = vadd.s32 %v5193_v15, %v5284_v44  ;;  %v5292_v9 = vadd.s32 %v5190_v31, %v5284_v44  ;;  %v2632_v15 = vand.u32 65535, %v2631_v54 }
 0x4fc   : > { %v2647_v45 = vcvt.s32.f32 %v2645_v21 }
 0x4fd   : > { %2664 = vadd.xlane.f32.xlu0 %v2661_v5  ;;  %vm2572_vm6 = vcmp.ge.s32.totalorder %v4423_v19, %v5288_v32  ;;  %vm2573_vm11 = vcmp.ge.s32.totalorder %v4426_v58, %v5288_v32  ;;  %vm2574_vm13 = vcmp.ge.s32.totalorder %v4423_v19, %v5292_v9  ;;  %vm2575_vm14 = vcmp.ge.s32.totalorder %v4426_v58, %v5292_v9 }
 0x4fe   : > { %2651 = vadd.xlane.f32.xlu2 %v2648_v48  ;;  %2610 = vadd.xlane.f32.xlu1 %v2608_v23  ;;  %v2588_v40 = vsel %vm2572_vm6, 1, %v5778_v20  ;;  %v2589_v56 = vsel %vm2573_vm11, 1, %v5778_v20  ;;  %v2590_v7 = vsel %vm2574_vm13, 1, %v5778_v20  ;;  %v2591_v38 = vsel %vm2575_vm14, 1, %v5778_v20 }
 0x4ff   : > { %v2670_v31 = vadd.s32 %v2589_v56, %v2588_v40  ;;  %v2634_v37 = vcvt.s32.f32 %v2632_v15  ;;  %v2683_v30 = vadd.s32 %v2591_v38, %v2590_v7  ;;  %vm2706_vm14 = vcmp.gt.s32.totalorder %v5245_v8, %v5236_v53 }
 0x501   : > { %v2672_v6 = vshrl.u32 %v2670_v31, 16  ;;  %v2685_v39 = vshrl.u32 %v2683_v30, 16  ;;  %v2684_v54 = vand.u32 65535, %v2683_v30  ;;  %v2671_v27 = vand.u32 65535, %v2670_v31 }
 0x503   : > { %v2674_v35 = vcvt.s32.f32 %v2672_v6  ;;  %v2687_v49 = vcvt.s32.f32 %v2685_v39  ;;  %v2686_v22 = vcvt.s32.f32 %v2684_v54  ;;  %v2673_v55 = vcvt.s32.f32 %v2671_v27 }
 0x505   : > { %2677 = vadd.xlane.f32.xlu0 %v2674_v35 }
 0x506   : > { %2636 = vadd.xlane.f32.xlu2 %v2634_v37  ;;  %2623 = vadd.xlane.f32.xlu1 %v2621_v3 }
 0x50d   : > { %2662 = vadd.xlane.f32.xlu0 %v2660_v42 }
 0x50e   : > { %2649 = vadd.xlane.f32.xlu2 %v2647_v45  ;;  %2690 = vadd.xlane.f32.xlu1 %v2687_v49 }
 0x516   : > { %2688 = vadd.xlane.f32.xlu2 %v2686_v22  ;;  %2675 = vadd.xlane.f32.xlu1 %v2673_v55 }
 0x560   : > { %v2613_v5 = vpop.xlane.xlu0 %2612 }
 0x561   : > { %v2600_v48 = vpop.xlane.xlu2 %2599  ;;  %v2615_v12 = vcvt.f32.s32 %v2613_v5 }
 0x562   : > { %v2602_v23 = vcvt.f32.s32 %v2600_v48 }
 0x563   : > { %v2616_v37 = vshll.u32 %v2615_v12, 16 }
 0x564   : > { %v2603_v15 = vshll.u32 %v2602_v23, 16 }
 0x568   : > { %v2598_v40 = vpop.xlane.xlu0 %2597 }
 0x569   : > { %v2639_v56 = vpop.xlane.xlu2 %2638  ;;  %v2626_v51 = vpop.xlane.xlu1 %2625  ;;  %v2601_v63 = vcvt.f32.s32 %v2598_v40 }
 0x56a   : > { %v2641_v30 = vcvt.f32.s32 %v2639_v56  ;;  %v2628_v60 = vcvt.f32.s32 %v2626_v51 }
 0x56b   : > { %v2604_v6 = vadd.s32 %v2603_v15, %v2601_v63 }
 0x56c   : > { %v2642_v27 = vshll.u32 %v2641_v30, 16  ;;  %v2629_v14 = vshll.u32 %v2628_v60, 16 }
 0x56d   : > { %vm2696_vm2 = vcmp.ge.s32.totalorder %v2604_v6, %v4451_v28 }
 0x56e   : > { %vm2712_vm8 = vmand %vm2696_vm2, %vm2704_vm3  ;;  %vm2709_vm3 = vcmp.gt.s32.totalorder %v5264_v1, %v5260_v41 }
 0x56f   : > { %v2720_v21 = vsel %vm2712_vm8, 1, %v5778_v20 }
 0x570   : > { %v2665_v7 = vpop.xlane.xlu0 %2664 }
 0x571   : > { %v2652_v38 = vpop.xlane.xlu2 %2651  ;;  %v2611_v35 = vpop.xlane.xlu1 %2610  ;;  %v2667_v57 = vcvt.f32.s32 %v2665_v7 }
 0x572   : > { %v2614_v31 = vcvt.f32.s32 %v2611_v35  ;;  %v2654_v56 = vcvt.f32.s32 %v2652_v38 }
 0x573   : > { %v2668_v6 = vshll.u32 %v2667_v57, 16 }
 0x574   : > { %v2617_v3 = vadd.s32 %v2616_v37, %v2614_v31  ;;  %v2655_v37 = vshll.u32 %v2654_v56, 16 }
 0x576   : > { %vm2697_vm15 = vcmp.ge.s32.totalorder %v2617_v3, %v4451_v28 }
 0x577   : > { %vm2713_vm9 = vmand %vm2697_vm15, %vm2705_vm4  ;;  %vm2708_vm4 = vcmp.gt.s32.totalorder %v5268_v17, %v5260_v41 }
 0x578   : > { %v2721_v39 = vsel %vm2713_vm9, 1, %v5778_v20  ;;  %v2678_v42 = vpop.xlane.xlu0 %2677 }
 0x579   : > { %v2728_v45 = vadd.s32 %v2721_v39, %v2720_v21  ;;  %v2637_v49 = vpop.xlane.xlu2 %2636  ;;  %v2624_v54 = vpop.xlane.xlu1 %2623  ;;  %v2680_v8 = vcvt.f32.s32 %v2678_v42 }
 0x57a   : > { %v2640_v22 = vcvt.f32.s32 %v2637_v49  ;;  %v2627_v55 = vcvt.f32.s32 %v2624_v54 }
 0x57b   : > { %v2729_v5 = vrot.slane %v2728_v45, 4  ;;  %v2681_v1 = vshll.u32 %v2680_v8, 16 }
 0x57c   : > { %v2643_v48 = vadd.s32 %v2642_v27, %v2640_v22  ;;  %v2630_v23 = vadd.s32 %v2629_v14, %v2627_v55 }
 0x57d   : > { %v2730_v40 = vadd.s32 %v2729_v5, %v2728_v45 }
 0x57e   : > { %vm2699_vm6 = vcmp.ge.s32.totalorder %v2643_v48, %v4468_v62  ;;  %vm2698_vm11 = vcmp.ge.s32.totalorder %v2630_v23, %v4468_v62 }
 0x57f   : > { %v2731_v51 = vrot.slane %v2730_v40, 2  ;;  %vm2715_vm13 = vmand %vm2699_vm6, %vm2707_vm10  ;;  %vm2711_vm6 = vcmp.gt.s32.totalorder %v5292_v9, %v5284_v44 }
 0x580   : > { %v2723_v63 = vsel %vm2715_vm13, 1, %v5778_v20  ;;  %vm2714_vm2 = vmand %vm2698_vm11, %vm2706_vm14  ;;  %v2663_v15 = vpop.xlane.xlu0 %2662  ;;  %vm2710_vm11 = vcmp.gt.s32.totalorder %v5288_v32, %v5284_v44 }
 0x581   : > { %v2732_v12 = vadd.s32 %v2731_v51, %v2730_v40  ;;  %v2722_v7 = vsel %vm2714_vm2, 1, %v5778_v20  ;;  %v2650_v38 = vpop.xlane.xlu2 %2649  ;;  %v2691_v35 = vpop.xlane.xlu1 %2690  ;;  %v2666_v4 = vcvt.f32.s32 %v2663_v15 }
 0x582   : > { %v2735_v31 = vadd.s32 %v2723_v63, %v2722_v7  ;;  %v2653_v3 = vcvt.f32.s32 %v2650_v38  ;;  %v2693_v54 = vcvt.f32.s32 %v2691_v35 }
 0x583   : > { %v2733_v30 = vrot.slane %v2732_v12, 1  ;;  %v2669_v60 = vadd.s32 %v2668_v6, %v2666_v4 }
 0x584   : > { %v2736_v21 = vrot.slane %v2735_v31, 4  ;;  %v2656_v39 = vadd.s32 %v2655_v37, %v2653_v3  ;;  %v2694_v17 = vshll.u32 %v2693_v54, 16 }
 0x585   : > { %v2734_v45 = vadd.s32 %v2733_v30, %v2732_v12  ;;  %vm2701_vm8 = vcmp.ge.s32.totalorder %v2669_v60, %v4530_v29 }
 0x586   : > { %v2737_v49 = vadd.s32 %v2736_v21, %v2735_v31  ;;  %vm2700_vm15 = vcmp.ge.s32.totalorder %v2656_v39, %v4530_v29  ;;  %vm2717_vm9 = vmand %vm2701_vm8, %vm2709_vm3 }
 0x587   : > { %v2756_v27 = vmul.u32 16, %v2734_v45  ;;  %vm2716_vm10 = vmand %vm2700_vm15, %vm2708_vm4  ;;  %v2725_v14 = vsel %vm2717_vm9, 1, %v5778_v20 }
 0x588   : > { %v2738_v22 = vrot.slane %v2737_v49, 2  ;;  %v2724_v42 = vsel %vm2716_vm10, 1, %v5778_v20 }
 0x589   : > { %v5331_v55 = vadd.s32 %v2756_v27, %v5197_v25  ;;  %v2742_v5 = vadd.s32 %v2725_v14, %v2724_v42  ;;  %v2689_v48 = vpop.xlane.xlu2 %2688  ;;  %v2676_v23 = vpop.xlane.xlu1 %2675 }
 0x58a   : > { %v2739_v40 = vadd.s32 %v2738_v22, %v2737_v49  ;;  %v2692_v57 = vcvt.f32.s32 %v2689_v48  ;;  %v2679_v56 = vcvt.f32.s32 %v2676_v23 }
 0x58b   : > { %v2743_v51 = vrot.slane %v2742_v5, 4  ;;  %v5337_v63 = vadd.s32 %v5331_v55, %v4286_v61  ;;  %v5341_v25 = vadd.s32 %v5331_v55, %v3967_v50 }
 0x58c   : > { %v2740_v15 = vrot.slane %v2739_v40, 1  ;;  %v2695_v12 = vadd.s32 %v2694_v17, %v2692_v57  ;;  %v2682_v6 = vadd.s32 %v2681_v1, %v2679_v56 }
 0x58d   : > { %v2744_v7 = vadd.s32 %v2743_v51, %v2742_v5  ;;  %vm2774_vm13 = vcmp.ge.s32.totalorder %v4246_v11, %v5337_v63  ;;  %vm2775_vm14 = vcmp.ge.s32.totalorder %v4258_v33, %v5337_v63  ;;  %vm2772_vm2 = vcmp.ge.s32.totalorder %v4246_v11, %v5341_v25 }
 0x58e   : > { %v2741_v38 = vadd.s32 %v2740_v15, %v2739_v40  ;;  %vm2703_vm3 = vcmp.ge.s32.totalorder %v2695_v12, %v4532_v16  ;;  %vm2702_vm8 = vcmp.ge.s32.totalorder %v2682_v6, %v4532_v16  ;;  %v2790_v35 = vsel %vm2774_vm13, 1, %v5778_v20 }
 0x58f   : > { %v2745_v4 = vrot.slane %v2744_v7, 2  ;;  %vm2719_vm4 = vmand %vm2703_vm3, %vm2711_vm6  ;;  %v2791_v37 = vsel %vm2775_vm14, 1, %v5778_v20  ;;  %vm2773_vm15 = vcmp.ge.s32.totalorder %v4258_v33, %v5341_v25  ;;  %v2788_v31 = vsel %vm2772_vm2, 1, %v5778_v20 }
 0x590   : > { %v2757_v11 = vmul.u32 16, %v2741_v38  ;;  %v2727_v3 = vsel %vm2719_vm4, 1, %v5778_v20  ;;  %vm2718_vm9 = vmand %vm2702_vm8, %vm2710_vm11  ;;  %v2817_v30 = vadd.s32 %v2791_v37, %v2790_v35  ;;  %v2789_v60 = vsel %vm2773_vm15, 1, %v5778_v20 }
 0x591   : > { %v2746_v21 = vadd.s32 %v2745_v4, %v2744_v7  ;;  %v2726_v9 = vsel %vm2718_vm9, 1, %v5778_v20  ;;  %v2804_v39 = vadd.s32 %v2789_v60, %v2788_v31 }
 0x592   : > { %v5368_v45 = vadd.s32 %v2757_v11, %v5236_v53  ;;  %v2749_v33 = vadd.s32 %v2727_v3, %v2726_v9  ;;  %v2819_v8 = vshrl.u32 %v2817_v30, 16 }
 0x593   : > { %v2747_v49 = vrot.slane %v2746_v21, 1  ;;  %v2806_v54 = vshrl.u32 %v2804_v39, 16  ;;  %v2805_v5 = vand.u32 65535, %v2804_v39 }
 0x594   : > { %v2750_v27 = vrot.slane %v2749_v33, 4  ;;  %v2821_v14 = vcvt.s32.f32 %v2819_v8  ;;  %v5372_v32 = vadd.s32 %v5368_v45, %v3967_v50  ;;  %v5376_v22 = vadd.s32 %v5368_v45, %v4286_v61 }
 0x595   : > { %v2748_v42 = vadd.s32 %v2747_v49, %v2746_v21  ;;  %v2808_v1 = vcvt.s32.f32 %v2806_v54  ;;  %v2807_v37 = vcvt.s32.f32 %v2805_v5 }
 0x596   : > { %v2751_v48 = vadd.s32 %v2750_v27, %v2749_v33  ;;  %2824 = vadd.xlane.f32.xlu1 %v2821_v14  ;;  %vm2776_vm10 = vcmp.ge.s32.totalorder %v4276_v43, %v5372_v32  ;;  %vm2777_vm6 = vcmp.ge.s32.totalorder %v4283_v13, %v5372_v32  ;;  %vm2778_vm11 = vcmp.ge.s32.totalorder %v4276_v43, %v5376_v22 }
 0x597   : > { %v2758_v53 = vmul.u32 16, %v2748_v42  ;;  %2811 = vadd.xlane.f32.xlu0 %v2808_v1  ;;  %v2792_v23 = vsel %vm2776_vm10, 1, %v5778_v20  ;;  %v2793_v40 = vsel %vm2777_vm6, 1, %v5778_v20  ;;  %vm2779_vm13 = vcmp.ge.s32.totalorder %v4283_v13, %v5376_v22 }
 0x598   : > { %v2752_v17 = vrot.slane %v2751_v48, 2  ;;  %v2830_v57 = vadd.s32 %v2793_v40, %v2792_v23  ;;  %v2794_v56 = vsel %vm2778_vm11, 1, %v5778_v20  ;;  %v2795_v51 = vsel %vm2779_vm13, 1, %v5778_v20 }
 0x599   : > { %v5391_v15 = vadd.s32 %v2758_v53, %v5260_v41  ;;  %v2843_v12 = vadd.s32 %v2795_v51, %v2794_v56  ;;  %v2818_v33 = vand.u32 65535, %v2817_v30  ;;  %vm666_vm13 = vcmask 1041408  }
 0x59a   : > { %v2753_v43 = vadd.s32 %v2752_v17, %v2751_v48  ;;  %v2832_v6 = vshrl.u32 %v2830_v57, 16 }
 0x59b   : > { %v2845_v7 = vshrl.u32 %v2843_v12, 16  ;;  %v5395_v38 = vadd.s32 %v5391_v15, %v4286_v61  ;;  %v5399_v13 = vadd.s32 %v5391_v15, %v3967_v50  ;;  %v2820_v14 = vcvt.s32.f32 %v2818_v33  ;;  %v653_v33 = vld.sshfl [vmem:[#allocation1 + $0x28] sm:$0xff pattern:$0x75316420] }
 0x59c   : > { %v2754_v35 = vrot.slane %v2753_v43, 1  ;;  %v2834_v4 = vcvt.s32.f32 %v2832_v6  ;;  %v2844_v5 = vand.u32 65535, %v2843_v12 }
 0x59d   : > { %v2847_v31 = vcvt.s32.f32 %v2845_v7  ;;  %vm2782_vm14 = vcmp.ge.s32.totalorder %v4378_v18, %v5395_v38  ;;  %vm2783_vm2 = vcmp.ge.s32.totalorder %v4381_v36, %v5395_v38  ;;  %vm2780_vm3 = vcmp.ge.s32.totalorder %v4378_v18, %v5399_v13 }
 0x59e   : > { %v2755_v41 = vadd.s32 %v2754_v35, %v2753_v43  ;;  %2837 = vadd.xlane.f32.xlu2 %v2834_v4  ;;  %2809 = vadd.xlane.f32.xlu1 %v2807_v37  ;;  %v2798_v11 = vsel %vm2782_vm14, 1, %v5778_v20  ;;  %v2799_v3 = vsel %vm2783_vm2, 1, %v5778_v20  ;;  %vm2781_vm8 = vcmp.ge.s32.totalorder %v4381_v36, %v5399_v13 }
 0x59f   : > { %2850 = vadd.xlane.f32.xlu0 %v2847_v31  ;;  %v2869_v60 = vadd.s32 %v2799_v3, %v2798_v11  ;;  %v2796_v21 = vsel %vm2780_vm3, 1, %v5778_v20  ;;  %v2797_v9 = vsel %vm2781_vm8, 1, %v5778_v20  ;;  %v754_v31 = vand.u32 2147483647, %v4239_v47 }
 0x5a0   : > { %v2759_v39 = vmul.u32 16, %v2755_v41  ;;  %v2856_v8 = vadd.s32 %v2797_v9, %v2796_v21  ;;  %v762_v41 = vmul.f32 0.5, %v4239_v47  ;;  %v752_v21 = vand.u32 2147483647, %v4100_v10 }
 0x5a1   : > { %v2871_v18 = vshrl.u32 %v2869_v60, 16  ;;  %v2870_v43 = vand.u32 65535, %v2869_v60  ;;  %v3330_v3 = vadd.f32 -0.5, %v754_v31  ;;  %vm758_vm6 = vcmp.lt.f32.partialorder %v754_v31, 1.0 }
 0x5a2   : > { %v5414_v49 = vadd.s32 %v2759_v39, %v5284_v44  ;;  %v2858_v54 = vshrl.u32 %v2856_v8, 16  ;;  %v2857_v6 = vand.u32 65535, %v2856_v8  ;;  %v766_v11 = vmul.f32 %v762_v41, %v4239_v47  ;;  %v652_v39 = vld.sshfl [vmem:[#allocation1 + $0x20] sm:$0xff pattern:$0x75316420] }
 0x5a3   : > { %v2873_v27 = vcvt.s32.f32 %v2871_v18  ;;  %v760_v9 = vmul.f32 0.5, %v4100_v10  ;;  %v3328_v18 = vadd.f32 -0.5, %v752_v21  ;;  %vm756_vm11 = vcmp.lt.f32.partialorder %v752_v21, 1.0  ;;  %v648_v31 = vld.sshfl [vmem:[#allocation1 + $0x10] sm:$0xff pattern:$0x75316420] }
 0x5a4   : > { %v2860_v42 = vcvt.s32.f32 %v2858_v54  ;;  %v5418_v36 = vadd.s32 %v5414_v49, %v3967_v50  ;;  %v5422_v1 = vadd.s32 %v5414_v49, %v4286_v61  ;;  %v2831_v61 = vand.u32 65535, %v2830_v57 }
 0x5a5   : > { %v2859_v57 = vcvt.s32.f32 %v2857_v6  ;;  %v774_v60 = vsel %vm758_vm6, %v766_v11, %v3330_v3  ;;  %v764_v8 = vmul.f32 %v760_v9, %v4100_v10  ;;  %v761_v54 = vmul.f32 0.5, %v4189_v2  ;;  %v649_v11 = vld.sshfl [vmem:[#allocation1 + $0x18] sm:$0xff pattern:$0x75316420] }
 0x5a6   : > { %2822 = vadd.xlane.f32.xlu2 %v2820_v14  ;;  %2876 = vadd.xlane.f32.xlu1 %v2873_v27  ;;  %vm2784_vm4 = vcmp.ge.s32.totalorder %v4423_v19, %v5418_v36  ;;  %vm2785_vm15 = vcmp.ge.s32.totalorder %v4426_v58, %v5418_v36  ;;  %vm2786_vm9 = vcmp.ge.s32.totalorder %v4423_v19, %v5422_v1  ;;  %v2833_v40 = vcvt.s32.f32 %v2831_v61 }
 0x5a7   : > { %2863 = vadd.xlane.f32.xlu0 %v2860_v42  ;;  %v2800_v44 = vsel %vm2784_vm4, 1, %v5778_v20  ;;  %v2801_v50 = vsel %vm2785_vm15, 1, %v5778_v20  ;;  %vm2787_vm10 = vcmp.ge.s32.totalorder %v4426_v58, %v5422_v1  ;;  %v2802_v48 = vsel %vm2786_vm9, 1, %v5778_v20  ;;  %788 = vst [vmem:[#allocation1 + $0x20] ss:$2 sm:$0xff] %v774_v60 }
 0x5a8   : > { %v2882_v30 = vadd.s32 %v2801_v50, %v2800_v44  ;;  %v2803_v53 = vsel %vm2787_vm10, 1, %v5778_v20  ;;  %v2846_v19 = vcvt.s32.f32 %v2844_v5  ;;  %v2872_v58 = vcvt.s32.f32 %v2870_v43  ;;  %v644_v42 = vld.sshfl [vmem:[#allocation1] sm:$0xff pattern:$0x75316420] }
 0x5a9   : > { %v2895_v56 = vadd.s32 %v2803_v53, %v2802_v48  ;;  %v772_v27 = vsel %vm756_vm11, %v764_v8, %v3328_v18  ;;  %v753_v14 = vand.u32 2147483647, %v4189_v2  ;;  %v645_v50 = vld.sshfl [vmem:[#allocation1 + $0x8] sm:$0xff pattern:$0x75316420]  ;;  %v765_v61 = vmul.f32 %v761_v54, %v4189_v2 }
 0x5aa   : > { %v2884_v23 = vshrl.u32 %v2882_v30, 16  ;;  %v2883_v12 = vand.u32 65535, %v2882_v30  ;;  %780 = vst [vmem:[#allocation1] ss:$2 sm:$0xff] %v772_v27  ;;  %v702_v48 = vsel %vm666_vm13, %v653_v33, 0.0  ;;  %v674_v18 = vsel %vm666_vm13, %v645_v50, 0.0 }
 0x5ab   : > { %v2897_v51 = vshrl.u32 %v2895_v56, 16  ;;  %v2896_v35 = vand.u32 65535, %v2895_v56  ;;  %v3329_v5 = vadd.f32 -0.5, %v753_v14  ;;  %vm5447_vm14 = vcmp.lt.f32.partialorder %v753_v14, 1.0 }
 0x5ac   : > { %v2886_v17 = vcvt.s32.f32 %v2884_v23  ;;  %v2885_v4 = vcvt.s32.f32 %v2883_v12  ;;  %v695_v56 = vsel %vm666_vm13, %v652_v39, 0.0  ;;  %v688_v52 = vsel %vm666_vm13, %v649_v11, 0.0 }
 0x5ad   : > { %v2899_v7 = vcvt.s32.f32 %v2897_v51  ;;  %v2898_v37 = vcvt.s32.f32 %v2896_v35  ;;  %v696_v2 = vrot.slane %v695_v56, 4  ;;  %vm2916_vm3 = vcmp.gt.s32.totalorder %v5341_v25, %v5331_v55 }
 0x5ae   : > { %2835 = vadd.xlane.f32.xlu2 %v2833_v40  ;;  %2889 = vadd.xlane.f32.xlu1 %v2886_v17  ;;  %v790_v47 = vld.sshfl [vmem:[#allocation1 + $0x28] sm:$0xff pattern:$0x75316420]  ;;  %v789_v30 = vld.sshfl [vmem:[#allocation1 + $0x20] sm:$0xff pattern:$0x75316420]  ;;  %vm2917_vm8 = vcmp.gt.s32.totalorder %v5337_v63, %v5331_v55  ;;  %vm2918_vm9 = vcmp.gt.s32.totalorder %v5372_v32, %v5368_v45  ;;  %vm2919_vm6 = vcmp.gt.s32.totalorder %v5376_v22, %v5368_v45 }
 0x5af   : > { %2848 = vadd.xlane.f32.xlu0 %v2846_v19  ;;  %v800_v44 = vrot.slane %v790_v47, 2  ;;  %v799_v10 = vrot.slane %v789_v30, 2  ;;  %v703_v40 = vrot.slane %v702_v48, 4  ;;  %v697_v12 = vadd.f32 %v696_v2, %v695_v56 }
 0x5b1   : > { %v846_v53 = vsel %vm666_vm13, %v800_v44, 0.0  ;;  %v839_v19 = vsel %vm666_vm13, %v799_v10, 0.0  ;;  %v704_v51 = vadd.f32 %v703_v40, %v702_v48  ;;  %v698_v60 = vrot.slane %v697_v12, 2  ;;  %v781_v39 = vld.sshfl [vmem:[#allocation1] sm:$0xff pattern:$0x75316420] }
 0x5b2   : > { %v847_v17 = vrot.slane %v846_v53, 4  ;;  %v840_v43 = vrot.slane %v839_v19, 4  ;;  %v795_v54 = vrot.slane %v781_v39, 2  ;;  %v667_v48 = vsel %vm666_vm13, %v644_v42, 0.0 }
 0x5b3   : > { %v705_v35 = vrot.slane %v704_v51, 2  ;;  %v699_v14 = vadd.f32 %v698_v60, %v697_v12  ;;  %v675_v10 = vrot.slane %v674_v18, 4 }
 0x5b4   : > { %v848_v6 = vadd.f32 %v847_v17, %v846_v53  ;;  %v668_v17 = vrot.slane %v667_v48, 4  ;;  %v811_v2 = vsel %vm666_vm13, %v795_v54, 0.0 }
 0x5b5   : > { %v706_v21 = vadd.f32 %v705_v35, %v704_v51  ;;  %v700_v53 = vrot.slane %v699_v14, 1  ;;  %v676_v50 = vadd.f32 %v675_v10, %v674_v18 }
 0x5b6   : > { %2902 = vadd.xlane.f32.xlu2 %v2899_v7  ;;  %2874 = vadd.xlane.f32.xlu1 %v2872_v58  ;;  %v773_v7 = vsel %vm5447_vm14, %v765_v61, %v3329_v5  ;;  %v755_v58 = vand.u32 2147483647, %v4384_v34  ;;  %v782_v61 = vld.sshfl [vmem:[#allocation1 + $0x8] sm:$0xff pattern:$0x75316420] }
 0x5b7   : > { %2861 = vadd.xlane.f32.xlu0 %v2859_v57  ;;  %v763_v57 = vmul.f32 0.5, %v4384_v34  ;;  %784 = vst [vmem:[#allocation1 + $0x10] ss:$2 sm:$0xff] %v773_v7  ;;  %v707_v47 = vrot.slane %v706_v21, 1  ;;  %v677_v42 = vrot.slane %v676_v50, 2 }
 0x5b8   : > { %vm5457_vm2 = vcmp.lt.f32.partialorder %v755_v58, 1.0  ;;  %v3331_v7 = vadd.f32 -0.5, %v755_v58 }
 0x5b9   : > { %v5463_v27 = vmul.f32 %v763_v57, %v4384_v34  ;;  %v708_v23 = vadd.f32 %v707_v47, %v706_v21  ;;  %v701_v34 = vadd.f32 %v700_v53, %v699_v14  ;;  %v3690_v14 = vmov 0.0  }
 0x5ba   : > { %v5473_v58 = vsel %vm418_vm12, 1.0, %v3690_v14 }
 0x5be   : > { %2887 = vadd.xlane.f32.xlu2 %v2885_v4  ;;  %v841_v4 = vadd.f32 %v840_v43, %v839_v19  ;;  %v796_v19 = vrot.slane %v782_v61, 2  ;;  %v669_v43 = vadd.f32 %v668_v17, %v667_v48 }
 0x5bf   : > { %2900 = vadd.xlane.f32.xlu0 %v2898_v37  ;;  %v849_v37 = vrot.slane %v848_v6, 2 }
 0x5c0   : > { %v842_v9 = vrot.slane %v841_v4, 2  ;;  %v818_v18 = vsel %vm666_vm13, %v796_v19, 0.0  ;;  %v785_v19 = vld.sshfl [vmem:[#allocation1 + $0x10] sm:$0xff pattern:$0x75316420] }
 0x5c1   : > { %v850_v8 = vadd.f32 %v849_v37, %v848_v6  ;;  %v812_v6 = vrot.slane %v811_v2, 4  ;;  %v819_v10 = vrot.slane %v818_v18, 4 }
 0x5c2   : > { %v843_v44 = vadd.f32 %v842_v9, %v841_v4  ;;  %v670_v9 = vrot.slane %v669_v43, 2 }
 0x5c3   : > { %v851_v5 = vrot.slane %v850_v8, 1 }
 0x5c4   : > { %v844_v40 = vrot.slane %v843_v44, 1 }
 0x5c5   : > { %v852_v56 = vadd.f32 %v851_v5, %v850_v8  ;;  %v813_v8 = vadd.f32 %v812_v6, %v811_v2  ;;  %v5483_v2 = vld.sshfl [vmem:[#allocation1 + $0x30] sm:$0xff pattern:$0x75316420]  ;;  %v689_v6 = vrot.slane %v688_v52, 4 }
 0x5c6   : > { %v845_v51 = vadd.f32 %v844_v40, %v843_v44  ;;  %v671_v44 = vadd.f32 %v670_v9, %v669_v43  ;;  %v681_v40 = vsel %vm666_vm13, %v648_v31, 0.0 }
 0x5c7   : > { %v872_v4 = vadd.f32 %v852_v56, %v708_v23  ;;  %v814_v61 = vrot.slane %v813_v8, 2  ;;  %v682_v43 = vrot.slane %v681_v40, 4  ;;  %v690_v25 = vadd.f32 %v689_v6, %v688_v52 }
 0x5c8   : > { %v871_v21 = vadd.f32 %v845_v51, %v701_v34  ;;  %v672_v34 = vrot.slane %v671_v44, 1  ;;  %v820_v51 = vadd.f32 %v819_v10, %v818_v18 }
 0x5c9   : > { %v885_v39 = vrot.slane %v872_v4, 7  ;;  %v815_v23 = vadd.f32 %v814_v61, %v813_v8  ;;  %v683_v9 = vadd.f32 %v682_v43, %v681_v40  ;;  %v691_v10 = vrot.slane %v690_v25, 2 }
 0x5cb   : > { %v889_v47 = vsel %vm436_vm1, %v871_v21, %v885_v39  ;;  %v821_v21 = vrot.slane %v820_v51, 2  ;;  %v786_v39 = vld.sshfl [vmem:[#allocation1 + $0x18] sm:$0xff pattern:$0x75316420] }
 0x5cc   : > { %v897_v48 = vmul.f32 %v5473_v58, %v889_v47  ;;  %v797_v47 = vrot.slane %v785_v19, 2 }
 0x5ce   : > { %v907_v17 = vperm.slane %v897_v48, 0  ;;  %v908_v56 = vperm.slane %v897_v48, 1 }
 0x5d0   : > { %v929_v11 = vsel %vm436_vm1, %v907_v17, 0.0 }
 0x609   : > { %v2825_v41 = vpop.xlane.xlu1 %2824 }
 0x60a   : > { %v2812_v3 = vpop.xlane.xlu0 %2811  ;;  %v2827_v57 = vcvt.f32.s32 %v2825_v41  ;;  %v678_v41 = vadd.f32 %v677_v42, %v676_v50 }
 0x60b   : > { %v2814_v30 = vcvt.f32.s32 %v2812_v3 }
 0x60c   : > { %v2828_v5 = vshll.u32 %v2827_v57, 16  ;;  %v679_v50 = vrot.slane %v678_v41, 1 }
 0x60d   : > { %v2815_v37 = vshll.u32 %v2814_v30, 16  ;;  %v775_v30 = vsel %vm5457_vm2, %v5463_v27, %v3331_v7  ;;  %v5485_v7 = vld.sshfl [vmem:[#allocation1 + $0x38] sm:$0xff pattern:$0x75316420] }
 0x60e   : > { %792 = vst [vmem:[#allocation1 + $0x30] ss:$2 sm:$0xff] %v775_v30  ;;  %v680_v18 = vadd.f32 %v679_v50, %v678_v41  ;;  %v822_v30 = vadd.f32 %v821_v21, %v820_v51  ;;  %v684_v41 = vrot.slane %v683_v9, 2 }
 0x611   : > { %v2838_v12 = vpop.xlane.xlu2 %2837  ;;  %v2810_v35 = vpop.xlane.xlu1 %2809 }
 0x612   : > { %v2813_v3 = vcvt.f32.s32 %v2810_v35  ;;  %v5467_v60 = vpop.xlane.xlu0 %2850  ;;  %v2840_v53 = vcvt.f32.s32 %v2838_v12  ;;  %v930_v12 = vsel %vm436_vm1, %v908_v56, 0.0  ;;  %v816_v35 = vrot.slane %v815_v23, 1 }
 0x613   : > { %v931_v4 = vadd.f32 %v930_v12, %v929_v11 }
 0x614   : > { %v2816_v54 = vadd.s32 %v2815_v37, %v2813_v3  ;;  %v2853_v37 = vcvt.f32.s32 %v5467_v60  ;;  %v2841_v8 = vshll.u32 %v2840_v53, 16  ;;  %v817_v61 = vadd.f32 %v816_v35, %v815_v23 }
 0x615   : > { %932 = vadd.xlane.f32.xlu2 %v931_v4  ;;  %v692_v35 = vadd.f32 %v691_v10, %v690_v25 }
 0x616   : > { %vm2908_vm12 = vcmp.ge.s32.totalorder %v2816_v54, %v4451_v28  ;;  %v673_v54 = vadd.f32 %v672_v34, %v671_v44  ;;  %v823_v44 = vrot.slane %v822_v30, 1  ;;  %v2854_v23 = vshll.u32 %v2853_v37, 16 }
 0x617   : > { %vm5497_vm4 = vmand %vm2908_vm12, %vm2916_vm3  ;;  %vm2920_vm12 = vcmp.gt.s32.totalorder %v5399_v13, %v5391_v15 }
 0x618   : > { %v2932_v60 = vsel %vm5497_vm4, 1, %v5778_v20  ;;  %v824_v34 = vadd.f32 %v823_v44, %v822_v30  ;;  %v867_v51 = vadd.f32 %v817_v61, %v673_v54  ;;  %v693_v54 = vrot.slane %v692_v35, 1 }
 0x619   : > { %v2823_v33 = vpop.xlane.xlu2 %2822  ;;  %v2877_v27 = vpop.xlane.xlu1 %2876 }
 0x61a   : > { %v2826_v57 = vcvt.f32.s32 %v2823_v33  ;;  %v5487_v31 = vpop.xlane.xlu0 %2863  ;;  %v2879_v52 = vcvt.f32.s32 %v2877_v27  ;;  %v5519_v33 = vsel %vm416_vm0, 1.0, %v3690_v14  ;;  %v868_v27 = vadd.f32 %v824_v34, %v680_v18 }
 0x61b   : > { %v2866_v17 = vcvt.f32.s32 %v5487_v31  ;;  %vm2921_vm0 = vcmp.gt.s32.totalorder %v5395_v38, %v5391_v15 }
 0x61c   : > { %v2829_v3 = vadd.s32 %v2828_v5, %v2826_v57  ;;  %v798_v5 = vrot.slane %v786_v39, 2  ;;  %v685_v57 = vadd.f32 %v684_v41, %v683_v9  ;;  %v2880_v42 = vshll.u32 %v2879_v52, 16 }
 0x61d   : > { %v883_v0 = vrot.slane %v868_v27, 7  ;;  %v2867_v9 = vshll.u32 %v2866_v17, 16 }
 0x61e   : > { %vm2909_vm15 = vcmp.ge.s32.totalorder %v2829_v3, %v4451_v28  ;;  %v825_v28 = vsel %vm666_vm13, %v797_v47, 0.0  ;;  %v832_v11 = vsel %vm666_vm13, %v798_v5, 0.0  ;;  %v686_v32 = vrot.slane %v685_v57, 1 }
 0x61f   : > { %vm2925_vm10 = vmand %vm2909_vm15, %vm2917_vm8  ;;  %v826_v53 = vrot.slane %v825_v28, 4  ;;  %v833_v39 = vrot.slane %v832_v11, 4  ;;  %v887_v25 = vsel %vm436_vm1, %v867_v51, %v883_v0  ;;  %vm2922_vm8 = vcmp.gt.s32.totalorder %v5418_v36, %v5414_v49 }
 0x620   : > { %v2933_v48 = vsel %vm2925_vm10, 1, %v5778_v20  ;;  %v895_v26 = vmul.f32 %v5519_v33, %v887_v25 }
 0x621   : > { %v2940_v40 = vadd.s32 %v2933_v48, %v2932_v60  ;;  %v2836_v56 = vpop.xlane.xlu2 %2835  ;;  %v2890_v63 = vpop.xlane.xlu1 %2889  ;;  %v827_v31 = vadd.f32 %v826_v53, %v825_v28  ;;  %v834_v10 = vadd.f32 %v833_v39, %v832_v11 }
 0x622   : > { %v2839_v50 = vcvt.f32.s32 %v2836_v56  ;;  %v2849_v19 = vpop.xlane.xlu0 %2848  ;;  %v2892_v37 = vcvt.f32.s32 %v2890_v63  ;;  %v709_v63 = vsel %vm666_vm13, %v5483_v2, 0.0 }
 0x623   : > { %v2941_v43 = vrot.slane %v2940_v40, 4  ;;  %v2852_v6 = vcvt.f32.s32 %v2849_v19  ;;  %v828_v21 = vrot.slane %v827_v31, 2  ;;  %v835_v11 = vrot.slane %v834_v10, 2 }
 0x624   : > { %v2842_v12 = vadd.s32 %v2841_v8, %v2839_v50  ;;  %v5534_v8 = vsel %vm417_vm5, 1.0, %v3690_v14  ;;  %v710_v0 = vrot.slane %v709_v63, 4 }
 0x625   : > { %v2942_v4 = vadd.s32 %v2941_v43, %v2940_v40  ;;  %v2855_v3 = vadd.s32 %v2854_v23, %v2852_v6  ;;  %v829_v44 = vadd.f32 %v828_v21, %v827_v31  ;;  %v903_v23 = vperm.slane %v895_v26, 0 }
 0x626   : > { %vm2910_vm11 = vcmp.ge.s32.totalorder %v2842_v12, %v4468_v62  ;;  %v904_v40 = vperm.slane %v895_v26, 1  ;;  %v687_v12 = vadd.f32 %v686_v32, %v685_v57  ;;  %v836_v38 = vadd.f32 %v835_v11, %v834_v10 }
 0x627   : > { %v2943_v47 = vrot.slane %v2942_v4, 2  ;;  %vm2926_vm14 = vmand %vm2910_vm11, %vm2918_vm9  ;;  %vm2911_vm2 = vcmp.ge.s32.totalorder %v2855_v3, %v4468_v62  ;;  %v2893_v62 = vshll.u32 %v2892_v37, 16  ;;  %v919_v34 = vsel %vm436_vm1, %v903_v23, 0.0 }
 0x628   : > { %v2934_v18 = vsel %vm2926_vm14, 1, %v5778_v20  ;;  %vm2927_vm3 = vmand %vm2911_vm2, %vm2919_vm6  ;;  %v920_v51 = vsel %vm436_vm1, %v904_v40, 0.0  ;;  %vm2923_vm9 = vcmp.gt.s32.totalorder %v5422_v1, %v5414_v49  ;;  %v830_v27 = vrot.slane %v829_v44, 1 }
 0x629   : > { %v2944_v61 = vadd.s32 %v2943_v47, %v2942_v4  ;;  %v2935_v30 = vsel %vm2927_vm3, 1, %v5778_v20  ;;  %v2903_v60 = vpop.xlane.xlu2 %2902  ;;  %v2875_v41 = vpop.xlane.xlu1 %2874  ;;  %v921_v6 = vadd.f32 %v920_v51, %v919_v34  ;;  %v711_v10 = vadd.f32 %v710_v0, %v709_v63  ;;  %v793_v51 = vld.sshfl [vmem:[#allocation1 + $0x30] sm:$0xff pattern:$0x75316420] }
 0x62a   : > { %v2947_v5 = vadd.s32 %v2935_v30, %v2934_v18  ;;  %v2878_v28 = vcvt.f32.s32 %v2875_v41  ;;  %v2862_v48 = vpop.xlane.xlu0 %2861  ;;  %v2905_v17 = vcvt.f32.s32 %v2903_v60  ;;  %v837_v18 = vrot.slane %v836_v38, 1 }
 0x62b   : > { %v2945_v53 = vrot.slane %v2944_v61, 1  ;;  %v2865_v22 = vcvt.f32.s32 %v2862_v48  ;;  %922 = vadd.xlane.f32.xlu1 %v921_v6  ;;  %v716_v60 = vsel %vm666_vm13, %v5485_v7, 0.0 }
 0x62c   : > { %v2948_v52 = vrot.slane %v2947_v5, 4  ;;  %v2881_v56 = vadd.s32 %v2880_v42, %v2878_v28  ;;  %v694_v42 = vadd.f32 %v693_v54, %v692_v35  ;;  %v2906_v37 = vshll.u32 %v2905_v17, 16 }
 0x62d   : > { %v2946_v50 = vadd.s32 %v2945_v53, %v2944_v61  ;;  %v2868_v19 = vadd.s32 %v2867_v9, %v2865_v22  ;;  %v831_v9 = vadd.f32 %v830_v27, %v829_v44 }
 0x62e   : > { %v2949_v43 = vadd.s32 %v2948_v52, %v2947_v5  ;;  %vm2913_vm5 = vcmp.ge.s32.totalorder %v2881_v56, %v4530_v29  ;;  %v5786_v52 = vld [vmem:[#allocation18_spill] sm:$0xff]  ;;  %v5787_v56 = vld [vmem:[#allocation17_spill] sm:$0xff] }
 0x62f   : > { %vm2929_vm4 = vmand %vm2913_vm5, %vm2921_vm0  ;;  %vm2912_vm15 = vcmp.ge.s32.totalorder %v2868_v19, %v4530_v29  ;;  %v2968_v2 = vadd.s32 %v2946_v50, %v5331_v55  ;;  %v869_v5 = vadd.f32 %v831_v9, %v687_v12  ;;  %v717_v19 = vrot.slane %v716_v60, 4 }
 0x630   : > { %v2950_v31 = vrot.slane %v2949_v43, 2  ;;  %v2937_v4 = vsel %vm2929_vm4, 1, %v5778_v20  ;;  %vm2928_vm10 = vmand %vm2912_vm15, %vm2920_vm12 }
 0x631   : > { %v2936_v29 = vsel %vm2928_vm10, 1, %v5778_v20  ;;  %v2888_v3 = vpop.xlane.xlu2 %2887  ;;  %vm2973_vm6 = vcmp.ge.s32.totalorder %v4243_v46, %v2968_v2  ;;  %vm2972_vm11 = vcmp.ge.s32.totalorder %v4236_v24, %v2968_v2  ;;  %v838_v46 = vadd.f32 %v837_v18, %v836_v38 }
 0x632   : > { %v2951_v55 = vadd.s32 %v2950_v31, %v2949_v43  ;;  %v2954_v57 = vadd.s32 %v2937_v4, %v2936_v29  ;;  %v2891_v21 = vcvt.f32.s32 %v2888_v3  ;;  %v2901_v39 = vpop.xlane.xlu0 %2900  ;;  %v3333_v13 = vsel %vm2973_vm6, 1.0, %v3690_v14  ;;  %v794_v4 = vld.sshfl [vmem:[#allocation1 + $0x38] sm:$0xff pattern:$0x75316420] }
 0x633   : > { %v2904_v47 = vcvt.f32.s32 %v2901_v39  ;;  %v3004_v54 = vrot.slane %v3333_v13, 7  ;;  %v3332_v30 = vsel %vm2972_vm11, 1.0, %v3690_v14  ;;  %v870_v28 = vadd.f32 %v838_v46, %v694_v42  ;;  %v5789_v46 = vld [vmem:[#allocation20_spill] sm:$0xff] }
 0x634   : > { %v2952_v35 = vrot.slane %v2951_v55, 1  ;;  %v2955_v25 = vrot.slane %v2954_v57, 4  ;;  %v2894_v32 = vadd.s32 %v2893_v62, %v2891_v21  ;;  %v801_v29 = vrot.slane %v793_v51, 2 }
 0x635   : > { %v2907_v61 = vadd.s32 %v2906_v37, %v2904_v47  ;;  %v3008_v24 = vsel %vm436_vm1, %v3332_v30, %v3004_v54  ;;  %v884_v23 = vrot.slane %v870_v28, 7  ;;  %v718_v37 = vadd.f32 %v717_v19, %v716_v60  ;;  %v5790_v60 = vld [vmem:[#allocation19_spill] sm:$0xff]  ;;  %v5794_v19 = vld [vmem:[#allocation29_spill] sm:$0xff] }
 0x636   : > { %v2953_v41 = vadd.s32 %v2952_v35, %v2951_v55  ;;  %v2956_v26 = vadd.s32 %v2955_v25, %v2954_v57  ;;  %vm2914_vm0 = vcmp.ge.s32.totalorder %v2894_v32, %v4532_v16  ;;  %v3016_v62 = vadd.f32 %v5519_v33, %v3008_v24  ;;  %v5785_v33 = vld [vmem:[#allocation21_spill] sm:$0xff] }
 0x637   : > { %vm2930_vm14 = vmand %vm2914_vm0, %vm2922_vm8  ;;  %vm2915_vm2 = vcmp.ge.s32.totalorder %v2907_v61, %v4532_v16  ;;  %v888_v1 = vsel %vm436_vm1, %v869_v5, %v884_v23  ;;  %v712_v39 = vrot.slane %v711_v10, 2  ;;  %v802_v47 = vrot.slane %v794_v4, 2  ;;  %v5788_v32 = vld [vmem:[#allocation25_spill] sm:$0xff] }
 0x638   : > { %v2957_v48 = vrot.slane %v2956_v26, 2  ;;  %v2938_v44 = vsel %vm2930_vm14, 1, %v5778_v20  ;;  %vm2931_vm12 = vmand %vm2915_vm2, %vm2923_vm9  ;;  %v2969_v7 = vadd.s32 %v2953_v41, %v5368_v45  ;;  %v3024_v36 = vperm.slane %v3016_v62, 0  ;;  %v5791_v41 = vld [vmem:[#allocation24_spill] sm:$0xff] }
 0x639   : > { %v2939_v53 = vsel %vm2931_vm12, 1, %v5778_v20  ;;  %v3025_v22 = vperm.slane %v3016_v62, 1  ;;  %v896_v20 = vmul.f32 %v5534_v8, %v888_v1  ;;  %v853_v13 = vsel %vm666_vm13, %v801_v29, 0.0  ;;  %v5793_v1 = vld [vmem:[#allocation28_spill] sm:$0xff] }
 0x63a   : > { %v2958_v16 = vadd.s32 %v2957_v48, %v2956_v26  ;;  %v2961_v40 = vadd.s32 %v2939_v53, %v2938_v44  ;;  %vm2974_vm3 = vcmp.ge.s32.totalorder %v4253_v59, %v2969_v7  ;;  %vm2975_vm5 = vcmp.ge.s32.totalorder %v5785_v33, %v2969_v7 }
 0x63b   : > { %v3040_v17 = vmul.f32 %v3024_v36, %v5786_v52  ;;  %v3041_v50 = vmul.f32 %v3025_v22, %v5787_v56  ;;  %v3335_v34 = vsel %vm2975_vm5, 1.0, %v3690_v14  ;;  %v3334_v6 = vsel %vm2974_vm3, 1.0, %v3690_v14 }
 0x63c   : > { %v2959_v45 = vrot.slane %v2958_v16, 1  ;;  %v2962_v63 = vrot.slane %v2961_v40, 4  ;;  %v3005_v11 = vrot.slane %v3335_v34, 7  ;;  %v905_v31 = vperm.slane %v896_v20, 0 }
 0x63d   : > { %v3048_v43 = vsel %vm436_vm1, %v3040_v17, 0.0  ;;  %v3049_v59 = vsel %vm436_vm1, %v3041_v50, 0.0  ;;  %v906_v42 = vperm.slane %v896_v20, 1  ;;  %v719_v54 = vrot.slane %v718_v37, 2 }
 0x63e   : > { %v2960_v2 = vadd.s32 %v2959_v45, %v2958_v16  ;;  %v2963_v12 = vadd.s32 %v2962_v63, %v2961_v40  ;;  %v3050_v27 = vadd.f32 %v3049_v59, %v3048_v43  ;;  %v3009_v38 = vsel %vm436_vm1, %v3334_v6, %v3005_v11  ;;  %v5796_v11 = vld [vmem:[#allocation23_spill] sm:$0xff] }
 0x63f   : > { %v924_v0 = vsel %vm436_vm1, %v905_v31, 0.0  ;;  %v3017_v55 = vadd.f32 %v5534_v8, %v3009_v38  ;;  %v925_v21 = vsel %vm436_vm1, %v906_v42, 0.0  ;;  %v854_v61 = vrot.slane %v853_v13, 4 }
 0x640   : > { %v2964_v3 = vrot.slane %v2963_v12, 2  ;;  %3051 = vadd.xlane.f32.xlu2 %v3050_v27  ;;  %v2970_v57 = vadd.s32 %v2960_v2, %v5391_v15  ;;  %v926_v18 = vadd.f32 %v925_v21, %v924_v0  ;;  %v713_v24 = vadd.f32 %v712_v39, %v711_v10 }
 0x641   : > { %v3026_v35 = vperm.slane %v3017_v55, 0  ;;  %v3027_v25 = vperm.slane %v3017_v55, 1  ;;  %v855_v62 = vadd.f32 %v854_v61, %v853_v13  ;;  %v860_v5 = vsel %vm666_vm13, %v802_v47, 0.0  ;;  %v5797_v47 = vld [vmem:[#allocation26_spill] sm:$0xff] }
 0x642   : > { %v2965_v9 = vadd.s32 %v2964_v3, %v2963_v12  ;;  %vm2977_vm8 = vcmp.ge.s32.totalorder %v5788_v32, %v2970_v57  ;;  %927 = vadd.xlane.f32.xlu0 %v926_v18  ;;  %vm2976_vm4 = vcmp.ge.s32.totalorder %v5791_v41, %v2970_v57  ;;  %v861_v23 = vrot.slane %v860_v5, 4 }
 0x643   : > { %v3042_v8 = vmul.f32 %v3026_v35, %v5789_v46  ;;  %v3043_v15 = vmul.f32 %v3027_v25, %v5790_v60  ;;  %v3337_v26 = vsel %vm2977_vm8, 1.0, %v3690_v14  ;;  %v3336_v36 = vsel %vm2976_vm4, 1.0, %v3690_v14 }
 0x644   : > { %v2966_v30 = vrot.slane %v2965_v9, 1  ;;  %v3006_v7 = vrot.slane %v3337_v26, 7  ;;  %v856_v22 = vrot.slane %v855_v62, 2  ;;  %v720_v33 = vadd.f32 %v719_v54, %v718_v37 }
 0x645   : > { %v3053_v48 = vsel %vm436_vm1, %v3042_v8, 0.0  ;;  %v3054_v44 = vsel %vm436_vm1, %v3043_v15, 0.0  ;;  %v862_v17 = vadd.f32 %v861_v23, %v860_v5  ;;  %v3323_v50 = vsel %vm419_vm7, 1.0, %v3690_v14 }
 0x646   : > { %v2967_v28 = vadd.s32 %v2966_v30, %v2965_v9  ;;  %v3055_v53 = vadd.f32 %v3054_v44, %v3053_v48  ;;  %v3010_v16 = vsel %vm436_vm1, %v3336_v36, %v3006_v7  ;;  %v857_v52 = vadd.f32 %v856_v22, %v855_v62  ;;  %v5798_v9 = vld [vmem:[#allocation27_spill] sm:$0xff]  ;;  %v5799_v62 = vld [vmem:[#allocation30_spill] sm:$0xff]  ;;  %v5801_v22 = vld [vmem:[#allocation32_spill] sm:$0xff] }
 0x647   : > { %v3018_v10 = vadd.f32 %v5473_v58, %v3010_v16  ;;  %v714_v34 = vrot.slane %v713_v24, 1  ;;  %v721_v51 = vrot.slane %v720_v33, 1  ;;  %v863_v59 = vrot.slane %v862_v17, 2  ;;  %v5795_v58 = vld [vmem:[#allocation22_spill] sm:$0xff]  ;;  %v5800_v48 = vld [vmem:[#allocation31_spill] sm:$0xff] }
 0x648   : > { %v2971_v40 = vadd.s32 %v2967_v28, %v5414_v49  ;;  %3056 = vadd.xlane.f32.xlu1 %v3055_v53  ;;  %v858_v43 = vrot.slane %v857_v52, 1  ;;  %v497_v5 = vcvt.s32.f32 %v5799_v62  ;;  %v498_v44 = vcvt.s32.f32 %v5800_v48 }
 0x649   : > { %v3028_v45 = vperm.slane %v3018_v10, 0  ;;  %v3029_v63 = vperm.slane %v3018_v10, 1  ;;  %v864_v31 = vadd.f32 %v863_v59, %v862_v17  ;;  %v715_v37 = vadd.f32 %v714_v34, %v713_v24 }
 0x64a   : > { %vm2978_vm13 = vcmp.ge.s32.totalorder %v5793_v1, %v2971_v40  ;;  %vm2979_vm15 = vcmp.ge.s32.totalorder %v5794_v19, %v2971_v40  ;;  %v722_v3 = vadd.f32 %v721_v51, %v720_v33  ;;  %v859_v0 = vadd.f32 %v858_v43, %v857_v52 }
 0x64b   : > { %v3339_v20 = vsel %vm2979_vm15, 1.0, %v3690_v14  ;;  %v3044_v6 = vmul.f32 %v3028_v45, %v5795_v58  ;;  %v3045_v2 = vmul.f32 %v3029_v63, %v5796_v11  ;;  %v3338_v12 = vsel %vm2978_vm13, 1.0, %v3690_v14 }
 0x64c   : > { %v3007_v49 = vrot.slane %v3339_v20, 7  ;;  %v865_v55 = vrot.slane %v864_v31, 1  ;;  %v873_v35 = vadd.f32 %v859_v0, %v715_v37  ;;  %v3084_v28 = vmax.f32 %v497_v5, 1e-06  ;;  %v5804_v20 = vld [vmem:[#allocation33_spill] sm:$0xff] }
 0x64d   : > { %v3058_v4 = vsel %vm436_vm1, %v3044_v6, 0.0  ;;  %v3059_v42 = vsel %vm436_vm1, %v3045_v2, 0.0  ;;  %v3085_v7 = vmax.f32 %v498_v44, 1e-06  ;;  %v499_v23 = vcvt.s32.f32 %v5801_v22 }
 0x64e   : > { %v3011_v27 = vsel %vm436_vm1, %v3338_v12, %v3007_v49  ;;  %v3060_v29 = vadd.f32 %v3059_v42, %v3058_v4  ;;  %v866_v39 = vadd.f32 %v865_v55, %v864_v31  ;;  %3476 = vrcp.f32 %v3084_v28 }
 0x64f   : > { %v3019_v38 = vadd.f32 %v3323_v50, %v3011_v27  ;;  %3478 = vrcp.f32 %v3085_v7  ;;  %v5631_v40 = vmax.f32 %v499_v23, 1e-06  ;;  %v3103_v56 = vand.u32 2147483648, %v3084_v28 }
 0x650   : > { %3061 = vadd.xlane.f32.xlu0 %v3060_v29  ;;  %v874_v25 = vadd.f32 %v866_v39, %v722_v3  ;;  %v3101_v1 = vand.u32 2147483647, %v3084_v28  ;;  %v500_v34 = vcvt.s32.f32 %v5804_v20  ;;  %vm3072_vm10 = vcmp.gt.s32.totalorder %v5799_v62, 0 }
 0x651   : > { %v3030_v57 = vperm.slane %v3019_v38, 0  ;;  %v3031_v21 = vperm.slane %v3019_v38, 1  ;;  %3480 = vrcp.f32 %v5631_v40  ;;  %v3104_v43 = vor.u32 1.1754944e-38, %v3103_v56 }
 0x652   : > { %v886_v30 = vrot.slane %v874_v25, 7  ;;  %vm3102_vm6 = vcmp.eq.f32.partialorder %v3101_v1, 8.507059e+37  ;;  %v3340_v6 = vsel %vm3072_vm10, 1.0, %v3690_v14  ;;  %v3087_v2 = vmax.f32 %v500_v34, 1e-06 }
 0x653   : > { %v3046_v13 = vmul.f32 %v3030_v57, %v5797_v47  ;;  %v3047_v18 = vmul.f32 %v3031_v21, %v5798_v9  ;;  %vm3152_vm11 = vcmask 0   ;;  %vm3112_vm0 = vweird.f32 %v3085_v7 }
 0x654   : > { %v890_v46 = vsel %vm436_vm1, %v873_v35, %v886_v30  ;;  %v3477_v53 = vpop.eup %3476  ;;  %v3118_v42 = vand.u32 2147483648, %v3085_v7  ;;  %v3116_v37 = vand.u32 2147483647, %v3085_v7  ;;  %3482 = vrcp.f32 %v3087_v2 }
 0x655   : > { %v3063_v32 = vsel %vm436_vm1, %v3046_v13, 0.0  ;;  %v3064_v54 = vsel %vm436_vm1, %v3047_v18, 0.0  ;;  %v898_v8 = vmul.f32 %v3323_v50, %v890_v46  ;;  %v3093_v36 = vmul.f32 %v3477_v53, %v3084_v28  ;;  %v3479_v10 = vpop.eup %3478 }
 0x656   : > { %v3065_v61 = vadd.f32 %v3064_v54, %v3063_v32  ;;  %v3108_v17 = vmul.f32 %v3479_v10, %v3085_v7  ;;  %vm3098_vm7 = vweird.f32 %v3477_v53  ;;  %vm3113_vm14 = vweird.f32 %v3479_v10 }
 0x657   : > { %v909_v60 = vperm.slane %v898_v8, 0  ;;  %v910_v15 = vperm.slane %v898_v8, 1  ;;  %v3094_v16 = vsub.f32 1.0, %v3093_v36  ;;  %v3481_v49 = vpop.eup %3480  ;;  %vm3114_vm2 = vmor %vm3112_vm0, %vm3113_vm14  ;;  %vm3073_vm12 = vcmp.gt.s32.totalorder %v5800_v48, 0 }
 0x658   : > { %3066 = vadd.xlane.f32.xlu2 %v3065_v61  ;;  %v3109_v63 = vsub.f32 1.0, %v3108_v17  ;;  %v3123_v27 = vmul.f32 %v3481_v49, %v5631_v40  ;;  %v3119_v0 = vor.u32 1.1754944e-38, %v3118_v42  ;;  %vm3117_vm3 = vcmp.eq.f32.partialorder %v3116_v37, 8.507059e+37 }
 0x659   : > { %v934_v41 = vsel %vm436_vm1, %v909_v60, 0.0  ;;  %v935_v26 = vsel %vm436_vm1, %v910_v15, 0.0  ;;  %v3095_v52 = vmul.f32 %v3477_v53, %v3094_v16  ;;  %vm3097_vm1 = vweird.f32 %v3084_v28 }
 0x65a   : > { %v936_v24 = vadd.f32 %v935_v26, %v934_v41  ;;  %vm5637_vm9 = vmor %vm3097_vm1, %vm3098_vm7  ;;  %v3110_v11 = vmul.f32 %v3479_v10, %v3109_v63  ;;  %v3124_v3 = vsub.f32 1.0, %v3123_v27  ;;  %v3341_v39 = vsel %vm3073_vm12, 1.0, %v3690_v14  ;;  %v3483_v18 = vpop.eup %3482 }
 0x65b   : > { %v3096_v50 = vadd.f32 %v3477_v53, %v3095_v52  ;;  %vm3127_vm5 = vweird.f32 %v5631_v40  ;;  %vm3128_vm8 = vweird.f32 %v3481_v49  ;;  %v3133_v25 = vand.u32 2147483648, %v5631_v40 }
 0x65c   : > { %937 = vadd.xlane.f32.xlu1 %v936_v24  ;;  %v3111_v38 = vadd.f32 %v3479_v10, %v3110_v11  ;;  %v3125_v47 = vmul.f32 %v3481_v49, %v3124_v3  ;;  %v3131_v54 = vand.u32 2147483647, %v5631_v40  ;;  %vm3129_vm4 = vmor %vm3127_vm5, %vm3128_vm8  ;;  %vm3074_vm13 = vcmp.gt.s32.totalorder %v5801_v22, 0 }
 0x65d   : > { %v3100_v59 = vsel %vm5637_vm9, %v3477_v53, %v3096_v50  ;;  %v3138_v61 = vmul.f32 %v3483_v18, %v3087_v2  ;;  %v3134_v30 = vor.u32 1.1754944e-38, %v3133_v25  ;;  %v3342_v15 = vsel %vm3074_vm13, 1.0, %v3690_v14 }
 0x65e   : > { %v3105_v31 = vsel %vm3102_vm6, %v3104_v43, %v3100_v59  ;;  %v3115_v57 = vsel %vm3114_vm2, %v3479_v10, %v3111_v38  ;;  %v3126_v32 = vadd.f32 %v3481_v49, %v3125_v47  ;;  %vm3132_vm15 = vcmp.eq.f32.partialorder %v3131_v54, 8.507059e+37 }
 0x65f   : > { %v3120_v9 = vsel %vm3117_vm3, %v3119_v0, %v3115_v57  ;;  %v3139_v26 = vsub.f32 1.0, %v3138_v61  ;;  %vm3142_vm1 = vweird.f32 %v3087_v2  ;;  %vm3143_vm7 = vweird.f32 %v3483_v18 }
 0x660   : > { %v3130_v8 = vsel %vm3129_vm4, %v3481_v49, %v3126_v32  ;;  %v3148_v28 = vand.u32 2147483648, %v3087_v2  ;;  %v3146_v44 = vand.u32 2147483647, %v3087_v2  ;;  %vm3144_vm9 = vmor %vm3142_vm1, %vm3143_vm7  ;;  %vm3075_vm10 = vcmp.gt.s32.totalorder %v5804_v20, 0 }
 0x661   : > { %v3135_v24 = vsel %vm3132_vm15, %v3134_v30, %v3130_v8  ;;  %v3140_v5 = vmul.f32 %v3483_v18, %v3139_v26  ;;  %v3343_v16 = vsel %vm3075_vm10, 1.0, %v3690_v14 }
 0x662   : > { %v3149_v53 = vor.u32 1.1754944e-38, %v3148_v28  ;;  %vm3147_vm6 = vcmp.eq.f32.partialorder %v3146_v44, 8.507059e+37 }
 0x663   : > { %v3141_v48 = vadd.f32 %v3483_v18, %v3140_v5 }
 0x665   : > { %v3145_v22 = vsel %vm3144_vm9, %v3483_v18, %v3141_v48 }
 0x688   : > { %v5633_v33 = vpop.xlane.xlu2 %932 }
 0x69e   : > { %v923_v45 = vpop.xlane.xlu1 %922 }
 0x6b3   : > { %v3052_v51 = vpop.xlane.xlu2 %3051 }
 0x6b4   : > { %v3068_v58 = vadd.f32 %v3052_v51, %v923_v45 }
 0x6b5   : > { %v928_v29 = vpop.xlane.xlu0 %927 }
 0x6b6   : > { %v3088_v12 = vmul.f32 %v3340_v6, %v3068_v58 }
 0x6b8   : > { %v3106_v4 = vmul.f32 %v3105_v31, %v3088_v12 }
 0x6ba   : > { %3153 = vst.msk [vmem:[%s5650_s15] sm:$0x1] %vm3152_vm11, %v3106_v4 }
 0x6bb   : > { %v3057_v55 = vpop.xlane.xlu1 %3056 }
 0x6bc   : > { %v3069_v21 = vadd.f32 %v3057_v55, %v928_v29 }
 0x6be   : > { %v3089_v13 = vmul.f32 %v3341_v39, %v3069_v21 }
 0x6c0   : > { %v3121_v35 = vmul.f32 %v3120_v9, %v3089_v13 }
 0x6c2   : > { %3154 = vst.msk [vmem:[%s5650_s15 + $0x1] sm:$0x1] %vm3152_vm11, %v3121_v35 }
 0x6c3   : > { %v3062_v46 = vpop.xlane.xlu0 %3061 }
 0x6c4   : > { %v3070_v60 = vadd.f32 %v3062_v46, %v5633_v33  ;;  %v3150_v33 = vsel %vm3147_vm6, %v3149_v53, %v3145_v22 }
 0x6c6   : > { %v3090_v41 = vmul.f32 %v3342_v15, %v3070_v60 }
 0x6c8   : > { %v3136_v62 = vmul.f32 %v3135_v24, %v3090_v41 }
 0x6ca   : > { %3155 = vst.msk [vmem:[%s5650_s15 + $0x2] sm:$0x1] %vm3152_vm11, %v3136_v62 }
 0x6cb   : > { %v3067_v7 = vpop.xlane.xlu2 %3066 }
 0x6cf   : > { %v938_v36 = vpop.xlane.xlu1 %937 }
 0x6d0   : > { %v3071_v23 = vadd.f32 %v3067_v7, %v938_v36 }
 0x6d2   : > { %v3091_v40 = vmul.f32 %v3343_v16, %v3071_v23 }
 0x6d4   : > { %v3151_v10 = vmul.f32 %v3150_v33, %v3091_v40 }
 0x6d6   : > { %3156 = vst.msk [vmem:[%s5650_s15 + $0x3] sm:$0x1] %vm3152_vm11, %v3151_v10 }
 0x6d7 PF: > { %s5805_s16 = sld [smem:[#allocation14_spill]]  ;;  %p21_p8 = scmp.ge.s32.totalorder %s3743_s23, 4  }
 0x6d8   : > { %s5806_s20 = sld [smem:[#allocation15_spill]]  ;;  %s5807_s18 = smov %s3672_s19 }
 0x6d9   : > { %s5809_s21 = smov %s3743_s23  ;;  %23 = sbr.rel (!%p21_p8) target bundleno = 10 (0xa), region = 130 }
 0x6dd   : > { %s5808_s19 = smov %s5805_s16 }
 0x6de   :  { %3177 = vsyncpa [#allocation3], 1 }
 0x6df   :  { %3179 = vsyncpa [#allocation3 + $0x1], 1 }
 0x6e0   :  { %3180 = vsyncpa [#allocation5], 1 }
 0x6e1   :  { %3182 = vsyncpa [#allocation5 + $0x1], 1 }
 0x6e2   :  { %3183 = vsyncpa [#allocation8], 1 }
 0x6e3   :  { %3185 = vsyncpa [#allocation8 + $0x1], 1 }

</bundles_post_ra>
